<compile_context>
chip_gen: v5e
topology: v5e:2x2
jax: 0.10.0
libtpu: 0.0.40
codegen_flags: <defaults>
</compile_context>

<pallas_src>
import jax
import jax.numpy as jnp
from jax.experimental import pallas as pl
from jax.experimental.pallas import tpu as pltpu

BN_EPS = 1e-5      # nn.BatchNorm1d default
K_PAD = 64         # first-layer contraction dim padded 51 -> 64
OUT_PAD = 128      # output head padded out_dim -> 128 lanes (lane-dense stores)


# --------------------------------------------------------------------------- #
# Pallas kernel
# --------------------------------------------------------------------------- #
def mlp_kernel(x_ref, w1_ref, ws_ref, bs_ref, head_ref, out_ref):
    """One batch-row block of the full forward pass.

    x_ref    : (BLOCK_N, K_PAD)  bf16   input rows (zero-padded 51 -> 64)
    w1_ref   : (K_PAD, L)        bf16   input Linear (BN1 folded in)
    ws_ref   : (2*num_stage*L, L) bf16  all stage Linears stacked row-wise (BN folded)
    bs_ref   : (1 + 2*num_stage, L) f32 all (folded) biases, one per row
    head_ref : (L + 1, OUT_PAD)  bf16   rows 0..L-1 = W2^T (zero-padded cols), row L = b2
    out_ref  : (BLOCK_N, OUT_PAD) f32
    """
    L = ws_ref.shape[-1]
    n_stage = ws_ref.shape[0] // (2 * L)

    biases = bs_ref[...]                                   # (1 + 2*n_stage, L) f32

    x = x_ref[...]                                         # (BLOCK_N, K_PAD) bf16
    h = jnp.dot(x, w1_ref[...], preferred_element_type=jnp.float32) + biases[0:1, :]
    h = jnp.maximum(h, 0.0)                                # ReLU (Dropout = identity)

    # Residual MyLinear stages (static Python loop -> fully unrolled).
    for s in range(n_stage):
        wa = ws_ref[(2 * s) * L:(2 * s + 1) * L, :]        # static, L-row aligned
        wb = ws_ref[(2 * s + 1) * L:(2 * s + 2) * L, :]
        ba = biases[1 + 2 * s:2 + 2 * s, :]
        bb = biases[2 + 2 * s:3 + 2 * s, :]
        z = jnp.dot(h.astype(jnp.bfloat16), wa,
                    preferred_element_type=jnp.float32) + ba
        z = jnp.maximum(z, 0.0)
        z = jnp.dot(z.astype(jnp.bfloat16), wb,
                    preferred_element_type=jnp.float32) + bb
        z = jnp.maximum(z, 0.0)
        h = h + z                                          # residual (f32)

    # Output head: Linear(L -> OUT_PAD), lane-dense store.
    w2 = head_ref[:L, :]
    b2 = head_ref[L:L + 1, :].astype(jnp.float32)
    out_ref[...] = jnp.dot(h.astype(jnp.bfloat16), w2,
                           preferred_element_type=jnp.float32) + b2


# --------------------------------------------------------------------------- #
# Wrapper
# --------------------------------------------------------------------------- #
def modified_human_model_2(x_padded, packed, *, out_dim, block_n=128):
    """x_padded: (N, K_PAD) bf16 (already feature-padded + cast). Returns (N, out_dim) f32."""
    w1, ws, bs, head = packed
    n, k = x_padded.shape

    # Pad the batch so every grid step gets a full row block; slice the tail off.
    n_pad = ((n + block_n - 1) // block_n) * block_n
    if n_pad != n:
        x_padded = jnp.pad(x_padded, ((0, n_pad - n), (0, 0)))
    grid = (n_pad // block_n,)

    out = pl.pallas_call(
        mlp_kernel,
        out_shape=jax.ShapeDtypeStruct((n_pad, OUT_PAD), jnp.float32),
        grid_spec=pltpu.PrefetchScalarGridSpec(
            num_scalar_prefetch=0,
            grid=grid,
            in_specs=[
                pl.BlockSpec((block_n, k), lambda i: (i, 0)),     # x row block
                pl.BlockSpec(w1.shape, lambda i: (0, 0)),         # resident weight slabs
                pl.BlockSpec(ws.shape, lambda i: (0, 0)),
                pl.BlockSpec(bs.shape, lambda i: (0, 0)),
                pl.BlockSpec(head.shape, lambda i: (0, 0)),
            ],
            out_specs=pl.BlockSpec((block_n, OUT_PAD), lambda i: (i, 0)),
        ),
        compiler_params=pltpu.CompilerParams(
            dimension_semantics=("parallel",)),   # shard batch across TCs on v7x
    )(x_padded, w1, ws, bs, head)

    return out[:n, :out_dim]


# --------------------------------------------------------------------------- #
# Synthetic PyTorch-layout parameters, reference forward, packing, input prep
# --------------------------------------------------------------------------- #
def init_torch_params(key, in_dim=51, lin=256, out_dim=2, num_stage=3):
    keys = iter(jax.random.split(key, 64))

    def linear(fan_in, fan_out):
        lim = fan_in ** -0.5
        return {
            "w": jax.random.uniform(next(keys), (fan_out, fan_in), jnp.float32, -lim, lim),
            "b": jax.random.uniform(next(keys), (fan_out,), jnp.float32, -lim, lim),
        }

    def bnorm(n):
        return {
            "g": 1.0 + 0.1 * jax.random.normal(next(keys), (n,), jnp.float32),
            "b": 0.1 * jax.random.normal(next(keys), (n,), jnp.float32),
            "m": 0.1 * jax.random.normal(next(keys), (n,), jnp.float32),
            "v": 0.5 + jnp.abs(jax.random.normal(next(keys), (n,), jnp.float32)),
        }

    p = {"w1": linear(in_dim, lin), "bn1": bnorm(lin), "stages": []}
    for _ in range(num_stage):
        p["stages"].append({"w1": linear(lin, lin), "bn1": bnorm(lin),
                            "w2": linear(lin, lin), "bn2": bnorm(lin)})
    p["w2"] = linear(lin, out_dim)
    return p


def reference_forward(x, p):
    """Pure-JAX eval-mode reference (unfolded BN, full f32, highest precision)."""
    hp = jax.lax.Precision.HIGHEST

    def lin(v, q):
        return jnp.dot(v, q["w"].T, precision=hp) + q["b"]

    def bn(v, q):
        return (v - q["m"]) * jax.lax.rsqrt(q["v"] + BN_EPS) * q["g"] + q["b"]

    y = jnp.maximum(bn(lin(x, p["w1"]), p["bn1"]), 0.0)
    for st in p["stages"]:
        z = jnp.maximum(bn(lin(y, st["w1"]), st["bn1"]), 0.0)
        z = jnp.maximum(bn(lin(z, st["w2"]), st["bn2"]), 0.0)
        y = y + z
    return lin(y, p["w2"])


def fold_and_pack(p):
    """Fold eval-mode BN into the preceding Linear; pack into 4 slabs (weights bf16)."""
    def fold(linr, bn):
        s = bn["g"] * jax.lax.rsqrt(bn["v"] + BN_EPS)          # (L,) per-feature scale
        w = linr["w"].T * s[None, :]                            # (in, L), x @ W layout
        b = (linr["b"] - bn["m"]) * s + bn["b"]                 # (L,)
        return w, b

    w1f, b1 = fold(p["w1"], p["bn1"])
    in_dim, lin = w1f.shape
    # Pad contraction dim 51 -> K_PAD with zero rows (matches zero-padded x cols).
    w1 = jnp.zeros((K_PAD, lin), jnp.float32).at[:in_dim, :].set(w1f)

    stage_w, stage_b = [], [b1]
    for st in p["stages"]:
        wa, ba = fold(st["w1"], st["bn1"])
        wb, bb = fold(st["w2"], st["bn2"])
        stage_w += [wa, wb]
        stage_b += [ba, bb]

    ws = jnp.concatenate(stage_w, axis=0)                       # (2*num_stage*L, L)
    bs = jnp.stack(stage_b, axis=0).astype(jnp.float32)         # (1 + 2*num_stage, L)

    out_dim = p["w2"]["w"].shape[0]
    head = jnp.zeros((lin + 1, OUT_PAD), jnp.float32)
    head = head.at[:lin, :out_dim].set(p["w2"]["w"].T)
    head = head.at[lin, :out_dim].set(p["w2"]["b"])             # last row = b2

    return (w1.astype(jnp.bfloat16), ws.astype(jnp.bfloat16),
            bs, head.astype(jnp.bfloat16))


def prepare_input(x):
    """Zero-pad features 51 -> K_PAD and cast to bf16 for the MXU."""
    n, in_dim = x.shape
    xp = jnp.zeros((n, K_PAD), jnp.float32).at[:, :in_dim].set(x)
    return xp.astype(jnp.bfloat16)


# --------------------------------------------------------------------------- #
if __name__ == "__main__":
    # Module hard-codes 51 input features; linear_size=256 / output_size=2 /
    # num_stage=3 are the module defaults.  Batch 256 -> two parallel grid steps.
    N, IN_DIM, LIN, OUT_DIM, NUM_STAGE = 256, 51, 256, 2, 3

    key = jax.random.PRNGKey(0)
    kx, kp = jax.random.split(key)
    x = jax.random.normal(kx, (N, IN_DIM), dtype=jnp.float32)
    params = init_torch_params(kp, IN_DIM, LIN, OUT_DIM, NUM_STAGE)
    packed = fold_and_pack(params)
    x_padded = prepare_input(x)

    out = modified_human_model_2(x_padded, packed, out_dim=OUT_DIM, block_n=128)
    jax.block_until_ready(out)

    ref = reference_forward(x, params)
    err = float(jnp.max(jnp.abs(out - ref)) / (jnp.max(jnp.abs(ref)) + 1e-6))

    assert out.shape == (N, OUT_DIM) and out.dtype == jnp.float32
    assert bool(jnp.all(jnp.isfinite(out)))
    assert err < 2e-2, f"kernel/reference mismatch: {err}"
    print("KERNEL_OK")
</pallas_src>

<mosaic_0001>
module attributes {stable_mosaic.version = 11 : i64} {
  func.func @mlp_kernel(%arg0: i32, %arg1: memref<128x64xbf16, #tpu.memory_space<vmem>>, %arg2: memref<64x256xbf16, #tpu.memory_space<vmem>>, %arg3: memref<1536x256xbf16, #tpu.memory_space<vmem>>, %arg4: memref<7x256xf32, #tpu.memory_space<vmem>>, %arg5: memref<257x128xbf16, #tpu.memory_space<vmem>>, %arg6: memref<128x128xf32, #tpu.memory_space<vmem>>) attributes {dimension_semantics = [#tpu.dimension_semantics<parallel>], iteration_bounds = array<i64: 2>, scalar_prefetch = 0 : i64, scratch_operands = 0 : i64, tpu.core_type = #tpu.core_type<tc>, window_params = [{transform_indices = @transform_0, window_bounds = array<i64: 128, 64>}, {pipeline_mode = #tpu.pipeline_mode<synchronous>, transform_indices = @transform_1, window_bounds = array<i64: 64, 256>}, {pipeline_mode = #tpu.pipeline_mode<synchronous>, transform_indices = @transform_2, window_bounds = array<i64: 1536, 256>}, {pipeline_mode = #tpu.pipeline_mode<synchronous>, transform_indices = @transform_3, window_bounds = array<i64: 7, 256>}, {pipeline_mode = #tpu.pipeline_mode<synchronous>, transform_indices = @transform_4, window_bounds = array<i64: 257, 128>}, {transform_indices = @transform_5, window_bounds = array<i64: 128, 128>}]} {
    %c0 = arith.constant 0 : index
    %c0_0 = arith.constant 0 : index
    %0 = vector.load %arg4[%c0, %c0_0] : memref<7x256xf32, #tpu.memory_space<vmem>>, vector<7x256xf32>
    %c0_1 = arith.constant 0 : index
    %c0_2 = arith.constant 0 : index
    %1 = vector.load %arg1[%c0_1, %c0_2] : memref<128x64xbf16, #tpu.memory_space<vmem>>, vector<128x64xbf16>
    %c0_3 = arith.constant 0 : index
    %c0_4 = arith.constant 0 : index
    %2 = vector.load %arg2[%c0_3, %c0_4] : memref<64x256xbf16, #tpu.memory_space<vmem>>, vector<64x256xbf16>
    %cst = arith.constant dense<0.000000e+00> : vector<128x256xf32>
    %3 = tpu.matmul %1, %2, %cst {dimension_numbers = #tpu.dot_dimension_numbers<[1], [0], [0], [1], [0, 0, 1, 1], [], []>} : vector<128x64xbf16>, vector<64x256xbf16>, vector<128x256xf32> -> vector<128x256xf32>
    %4 = vector.extract_strided_slice %0 {offsets = [0, 0], sizes = [1, 256], strides = [1, 1]} : vector<7x256xf32> to vector<1x256xf32>
    %5 = vector.broadcast %4 : vector<1x256xf32> to vector<128x256xf32>
    %6 = arith.addf %3, %5 : vector<128x256xf32>
    %cst_5 = arith.constant 0.000000e+00 : f32
    %7 = vector.broadcast %cst_5 : f32 to vector<128x256xf32>
    %8 = arith.maximumf %6, %7 : vector<128x256xf32>
    %c0_6 = arith.constant 0 : index
    %c0_7 = arith.constant 0 : index
    %9 = vector.load %arg3[%c0_6, %c0_7] : memref<1536x256xbf16, #tpu.memory_space<vmem>>, vector<256x256xbf16>
    %c256 = arith.constant 256 : index
    %c0_8 = arith.constant 0 : index
    %10 = vector.load %arg3[%c256, %c0_8] : memref<1536x256xbf16, #tpu.memory_space<vmem>>, vector<256x256xbf16>
    %11 = vector.extract_strided_slice %0 {offsets = [1, 0], sizes = [1, 256], strides = [1, 1]} : vector<7x256xf32> to vector<1x256xf32>
    %12 = vector.extract_strided_slice %0 {offsets = [2, 0], sizes = [1, 256], strides = [1, 1]} : vector<7x256xf32> to vector<1x256xf32>
    %13 = arith.truncf %8 : vector<128x256xf32> to vector<128x256xbf16>
    %cst_9 = arith.constant dense<0.000000e+00> : vector<128x256xf32>
    %14 = tpu.matmul %13, %9, %cst_9 {dimension_numbers = #tpu.dot_dimension_numbers<[1], [0], [0], [1], [0, 0, 1, 1], [], []>} : vector<128x256xbf16>, vector<256x256xbf16>, vector<128x256xf32> -> vector<128x256xf32>
    %15 = vector.broadcast %11 : vector<1x256xf32> to vector<128x256xf32>
    %16 = arith.addf %14, %15 : vector<128x256xf32>
    %cst_10 = arith.constant 0.000000e+00 : f32
    %17 = vector.broadcast %cst_10 : f32 to vector<128x256xf32>
    %18 = arith.maximumf %16, %17 : vector<128x256xf32>
    %19 = arith.truncf %18 : vector<128x256xf32> to vector<128x256xbf16>
    %cst_11 = arith.constant dense<0.000000e+00> : vector<128x256xf32>
    %20 = tpu.matmul %19, %10, %cst_11 {dimension_numbers = #tpu.dot_dimension_numbers<[1], [0], [0], [1], [0, 0, 1, 1], [], []>} : vector<128x256xbf16>, vector<256x256xbf16>, vector<128x256xf32> -> vector<128x256xf32>
    %21 = vector.broadcast %12 : vector<1x256xf32> to vector<128x256xf32>
    %22 = arith.addf %20, %21 : vector<128x256xf32>
    %cst_12 = arith.constant 0.000000e+00 : f32
    %23 = vector.broadcast %cst_12 : f32 to vector<128x256xf32>
    %24 = arith.maximumf %22, %23 : vector<128x256xf32>
    %25 = arith.addf %8, %24 : vector<128x256xf32>
    %c512 = arith.constant 512 : index
    %c0_13 = arith.constant 0 : index
    %26 = vector.load %arg3[%c512, %c0_13] : memref<1536x256xbf16, #tpu.memory_space<vmem>>, vector<256x256xbf16>
    %c768 = arith.constant 768 : index
    %c0_14 = arith.constant 0 : index
    %27 = vector.load %arg3[%c768, %c0_14] : memref<1536x256xbf16, #tpu.memory_space<vmem>>, vector<256x256xbf16>
    %28 = vector.extract_strided_slice %0 {offsets = [3, 0], sizes = [1, 256], strides = [1, 1]} : vector<7x256xf32> to vector<1x256xf32>
    %29 = vector.extract_strided_slice %0 {offsets = [4, 0], sizes = [1, 256], strides = [1, 1]} : vector<7x256xf32> to vector<1x256xf32>
    %30 = arith.truncf %25 : vector<128x256xf32> to vector<128x256xbf16>
    %cst_15 = arith.constant dense<0.000000e+00> : vector<128x256xf32>
    %31 = tpu.matmul %30, %26, %cst_15 {dimension_numbers = #tpu.dot_dimension_numbers<[1], [0], [0], [1], [0, 0, 1, 1], [], []>} : vector<128x256xbf16>, vector<256x256xbf16>, vector<128x256xf32> -> vector<128x256xf32>
    %32 = vector.broadcast %28 : vector<1x256xf32> to vector<128x256xf32>
    %33 = arith.addf %31, %32 : vector<128x256xf32>
    %cst_16 = arith.constant 0.000000e+00 : f32
    %34 = vector.broadcast %cst_16 : f32 to vector<128x256xf32>
    %35 = arith.maximumf %33, %34 : vector<128x256xf32>
    %36 = arith.truncf %35 : vector<128x256xf32> to vector<128x256xbf16>
    %cst_17 = arith.constant dense<0.000000e+00> : vector<128x256xf32>
    %37 = tpu.matmul %36, %27, %cst_17 {dimension_numbers = #tpu.dot_dimension_numbers<[1], [0], [0], [1], [0, 0, 1, 1], [], []>} : vector<128x256xbf16>, vector<256x256xbf16>, vector<128x256xf32> -> vector<128x256xf32>
    %38 = vector.broadcast %29 : vector<1x256xf32> to vector<128x256xf32>
    %39 = arith.addf %37, %38 : vector<128x256xf32>
    %cst_18 = arith.constant 0.000000e+00 : f32
    %40 = vector.broadcast %cst_18 : f32 to vector<128x256xf32>
    %41 = arith.maximumf %39, %40 : vector<128x256xf32>
    %42 = arith.addf %25, %41 : vector<128x256xf32>
    %c1024 = arith.constant 1024 : index
    %c0_19 = arith.constant 0 : index
    %43 = vector.load %arg3[%c1024, %c0_19] : memref<1536x256xbf16, #tpu.memory_space<vmem>>, vector<256x256xbf16>
    %c1280 = arith.constant 1280 : index
    %c0_20 = arith.constant 0 : index
    %44 = vector.load %arg3[%c1280, %c0_20] : memref<1536x256xbf16, #tpu.memory_space<vmem>>, vector<256x256xbf16>
    %45 = vector.extract_strided_slice %0 {offsets = [5, 0], sizes = [1, 256], strides = [1, 1]} : vector<7x256xf32> to vector<1x256xf32>
    %46 = vector.extract_strided_slice %0 {offsets = [6, 0], sizes = [1, 256], strides = [1, 1]} : vector<7x256xf32> to vector<1x256xf32>
    %47 = arith.truncf %42 : vector<128x256xf32> to vector<128x256xbf16>
    %cst_21 = arith.constant dense<0.000000e+00> : vector<128x256xf32>
    %48 = tpu.matmul %47, %43, %cst_21 {dimension_numbers = #tpu.dot_dimension_numbers<[1], [0], [0], [1], [0, 0, 1, 1], [], []>} : vector<128x256xbf16>, vector<256x256xbf16>, vector<128x256xf32> -> vector<128x256xf32>
    %49 = vector.broadcast %45 : vector<1x256xf32> to vector<128x256xf32>
    %50 = arith.addf %48, %49 : vector<128x256xf32>
    %cst_22 = arith.constant 0.000000e+00 : f32
    %51 = vector.broadcast %cst_22 : f32 to vector<128x256xf32>
    %52 = arith.maximumf %50, %51 : vector<128x256xf32>
    %53 = arith.truncf %52 : vector<128x256xf32> to vector<128x256xbf16>
    %cst_23 = arith.constant dense<0.000000e+00> : vector<128x256xf32>
    %54 = tpu.matmul %53, %44, %cst_23 {dimension_numbers = #tpu.dot_dimension_numbers<[1], [0], [0], [1], [0, 0, 1, 1], [], []>} : vector<128x256xbf16>, vector<256x256xbf16>, vector<128x256xf32> -> vector<128x256xf32>
    %55 = vector.broadcast %46 : vector<1x256xf32> to vector<128x256xf32>
    %56 = arith.addf %54, %55 : vector<128x256xf32>
    %cst_24 = arith.constant 0.000000e+00 : f32
    %57 = vector.broadcast %cst_24 : f32 to vector<128x256xf32>
    %58 = arith.maximumf %56, %57 : vector<128x256xf32>
    %59 = arith.addf %42, %58 : vector<128x256xf32>
    %c0_25 = arith.constant 0 : index
    %c0_26 = arith.constant 0 : index
    %60 = vector.load %arg5[%c0_25, %c0_26] : memref<257x128xbf16, #tpu.memory_space<vmem>>, vector<256x128xbf16>
    %c256_27 = arith.constant 256 : index
    %c0_28 = arith.constant 0 : index
    %61 = vector.load %arg5[%c256_27, %c0_28] : memref<257x128xbf16, #tpu.memory_space<vmem>>, vector<1x128xbf16>
    %62 = arith.extf %61 : vector<1x128xbf16> to vector<1x128xf32>
    %63 = arith.truncf %59 : vector<128x256xf32> to vector<128x256xbf16>
    %cst_29 = arith.constant dense<0.000000e+00> : vector<128x128xf32>
    %64 = tpu.matmul %63, %60, %cst_29 {dimension_numbers = #tpu.dot_dimension_numbers<[1], [0], [0], [1], [0, 0, 1, 1], [], []>} : vector<128x256xbf16>, vector<256x128xbf16>, vector<128x128xf32> -> vector<128x128xf32>
    %65 = vector.broadcast %62 : vector<1x128xf32> to vector<128x128xf32>
    %66 = arith.addf %64, %65 : vector<128x128xf32>
    %c0_30 = arith.constant 0 : index
    %c0_31 = arith.constant 0 : index
    %67 = vector.load %arg6[%c0_30, %c0_31] : memref<128x128xf32, #tpu.memory_space<vmem>>, vector<128x128xf32>
    tpu.vector_store %arg6[%c0_30, %c0_31], %66 {strides = array<i32>} : memref<128x128xf32, #tpu.memory_space<vmem>>, vector<128x128xf32>,
    return
  }
  func.func @transform_0(%arg0: i32) -> (i32, i32) {
    %c0_i32 = arith.constant 0 : i32
    %c0_i32_0 = arith.constant 0 : i32
    return %arg0, %c0_i32 : i32, i32
  }
  func.func @transform_1(%arg0: i32) -> (i32, i32) {
    %c0_i32 = arith.constant 0 : i32
    %c0_i32_0 = arith.constant 0 : i32
    %c0_i32_1 = arith.constant 0 : i32
    return %c0_i32, %c0_i32_0 : i32, i32
  }
  func.func @transform_2(%arg0: i32) -> (i32, i32) {
    %c0_i32 = arith.constant 0 : i32
    %c0_i32_0 = arith.constant 0 : i32
    %c0_i32_1 = arith.constant 0 : i32
    return %c0_i32, %c0_i32_0 : i32, i32
  }
  func.func @transform_3(%arg0: i32) -> (i32, i32) {
    %c0_i32 = arith.constant 0 : i32
    %c0_i32_0 = arith.constant 0 : i32
    %c0_i32_1 = arith.constant 0 : i32
    return %c0_i32, %c0_i32_0 : i32, i32
  }
  func.func @transform_4(%arg0: i32) -> (i32, i32) {
    %c0_i32 = arith.constant 0 : i32
    %c0_i32_0 = arith.constant 0 : i32
    %c0_i32_1 = arith.constant 0 : i32
    return %c0_i32, %c0_i32_0 : i32, i32
  }
  func.func @transform_5(%arg0: i32) -> (i32, i32) {
    %c0_i32 = arith.constant 0 : i32
    %c0_i32_0 = arith.constant 0 : i32
    return %arg0, %c0_i32 : i32, i32
  }
}

</mosaic_0001>

<bundles_post_ra>
// kernel: tpu_custom_call.1
= control target key start
LH: loop header
LB: loop body
LE: loop exit
PB: predicated region body
PF: predicated region fallthrough
CT: control target
= control target key end

     0   :  { %10 = vsyncpa [#allocation3], 0  ;;  %s6007_s0 = inlined_call_operand.vmem [shape: bf16[256,64], index: 0, kind: input, shape index: {}]   ;;  %s6008_s1 = inlined_call_operand.hbm [shape: bf16[64,256], index: 1, kind: input, shape index: {}]   ;;  %s6009_s2 = inlined_call_operand.hbm [shape: bf16[1536,256], index: 2, kind: input, shape index: {}]   ;;  %s6010_s3 = inlined_call_operand.vmem [shape: f32[7,256], index: 3, kind: input, shape index: {}]   ;;  %s6011_s4 = inlined_call_operand.vmem [shape: bf16[257,128], index: 4, kind: input, shape index: {}]   ;;  %s6012_s5 = inlined_call_operand.hbm [shape: f32[256,128], index: 5, kind: output, shape index: {}]  }
   0x1   :  { %11 = vsyncpa [#allocation6], 0 }
   0x2   :  { %12 = vsyncpa [#allocation4], 0 }
   0x3   :  { %14 = vsyncpa [#allocation4 + $0x1], 0  ;;  %s5000_s18 = smov 0   ;;  %s5002_s19 = smov 0  }
   0x4   :  { %s5004_s20 = smov 0   ;;  %s5006_s21 = smov 0  }
   0x5 LB: > { %s5021_s22 = sadd.s32 4294967295, %s4962_s21   ;;  %s3609_s23 = sadd.s32 4294967294, %s4962_s21   ;;  %s4962_s21 = sphi %s5006_s21, %s6071_s21   ;;  %s4958_s20 = sphi %s5004_s20, %s6070_s20   ;;  %s4954_s19 = sphi %s5002_s19, %s6069_s19   ;;  %s4950_s18 = sphi %s5000_s18, %s6068_s18  }
   0x6   : > { %s5025_s24 = sadd.s32 1, %s4962_s21   ;;  %s137_s25 = sadd.s32 1, %s4958_s20 }
   0x7   : > { %s134_s26 = ssub.s32 %s4962_s21, %s5025_s24  ;;  %p147_p0 = scmp.ne.s32.totalorder %s4958_s20, %s4954_s19 }
   0x8   : > { %p135_p1 = scmp.eq.s32.totalorder %s134_s26, 0  ;;  %p148_p2 = scmp.eq.s32.totalorder %s5021_s22, 1 }
   0x9   : > { %p153_p3 = scmp.ne.s32.totalorder %s4954_s19, %s4950_s18  ;;  %p154_p4 = scmp.eq.s32.totalorder %s3609_s23, 1 }
   0xa   : > { %s5036_s27 = scalar_select %p135_p1, %s4958_s20, %s137_s25  }
   0xb   : > { %p5038_p5 = por %p148_p2, %p147_p0  ;;  %p5042_p6 = por %p154_p4, %p153_p3 }
   0xc   : > { %p3610_p7 = scmp.ge.s32.totalorder %s4962_s21, 1  ;;  %p161_p8 = scmp.lt.s32.totalorder %s4962_s21, 3 }
   0xd   : > { %p4783_p9 = scmp.eq.s32.totalorder %s5021_s22, 0  ;;  %s172_s8 = sshll.u32 %s6008_s1, 4  ;;  %s173_s8 = int_to_ptr.hbm [resolvable:$true] %s172_s8 }
   0xe   : > { %p5049_p10 = pnand %p3610_p7, %p161_p8  ;;  %s4964_s9 = smov [#allocation2]  }
   0xf   : > { %s174_s10 = sshll.u32 %s4964_s9, 4  ;;  %s186_s13 = sshll.u32 %s6009_s2, 4  ;;  %s175_s10 = int_to_ptr.vmem [resolvable:$true] %s174_s10  ;;  %s187_s13 = int_to_ptr.hbm [resolvable:$true] %s186_s13 }
  0x10   : > { %p4772_p11 = pneg %p5049_p10  ;;  %s4965_s14 = smov 128  }
  0x11   : > { %s4966_s15 = smov 8   ;;  %s4967_s16 = smov [#allocation5]  }
  0x12   : > { %p4773_p12 = pnand %p4783_p9, %p4772_p11  ;;  %s188_s17 = sshll.u32 %s4967_s16, 4  ;;  %s189_s17 = int_to_ptr.vmem [resolvable:$true] %s188_s17 }
  0x13   : > { %219 = sbr.rel (%p5049_p10) target bundleno = 1340 (0x53c), region = 40 }
  0x14   : > { %4775 = dma.hbm_to_vmem [thread:$0]  (!%p4773_p12), %s173_s8, 1024, %s175_s10, [#allocation3], %s4965_s14, %s4965_s14, %s4966_s15  }
  0x15   : > { %4778 = dma.hbm_to_vmem [thread:$0]  (!%p4773_p12), %s187_s13, 24576, %s189_s17, [#allocation6], %s4965_s14, %s4965_s14, %s4966_s15  }
  0x18   : > { %4937 = dma.done.wait (%p4783_p9), [#allocation3], 1024  }
  0x19   : > { %4939 = vsyncadd (%p4783_p9), [#allocation3], 4294966272 }
  0x1a   : > { %4941 = dma.done.wait (%p4783_p9), [#allocation6], 24576  }
  0x1b   : > { %4943 = vsyncadd (%p4783_p9), [#allocation6], 4294942720  ;;  %s3618_s23 = sshll.u32 %s5021_s22, 4  ;;  %v3678_v0 = vld [vmem:[#allocation2 + $0x30] sm:$0xf]  ;;  %vm369_vm0 = vcmask 523264  }
  0x1c   : > { %p254_p13 = scmp.lt.s32.totalorder %s3618_s23, 31  ;;  %v4552_v1 = vld [vmem:[#allocation2 + $0x34] sm:$0xf0]  ;;  %v4551_v2 = vld [vmem:[#allocation2 + $0x34] sm:$0xf]  ;;  %s250_s9 = sand.u32 1, %s4954_s19  }
  0x1d   : > { %v3679_v3 = vor.u32 %v4552_v1, %v3678_v0  ;;  %v3680_v4 = vld [vmem:[#allocation2 + $0x38] sm:$0xf0]  ;;  %v3670_v5 = vld [vmem:[#allocation2 + $0x20] sm:$0xf]  ;;  %v4550_v6 = vld [vmem:[#allocation2 + $0x24] sm:$0xf0] }
  0x1e   : > { %v3683_v7 = vor.u32 %v4551_v2, %v3680_v4  ;;  %v4549_v8 = vld [vmem:[#allocation2 + $0x24] sm:$0xf]  ;;  %v3672_v9 = vld [vmem:[#allocation2 + $0x28] sm:$0xf0]  ;;  %v3671_v10 = vor.u32 %v4550_v6, %v3670_v5  ;;  %s6073_s23 = smov (!%p254_p13, %s3618_s23), 31  ;;  %s3617_s10 = sshll.u32 %s250_s9, 7 }
  0x1f   : > { %398 = vmatpush.bf16.msra.mxu0 %v3679_v3  ;;  %v3675_v11 = vor.u32 %v4549_v8, %v3672_v9  ;;  %v3662_v12 = vld [vmem:[#allocation2 + $0x10] sm:$0xf]  ;;  %v4548_v13 = vld [vmem:[#allocation2 + $0x14] sm:$0xf0]  ;;  %v4547_v14 = vld [vmem:[#allocation2 + $0x14] sm:$0xf] }
  0x20   : > { %447 = vmatpush.bf16.msra.mxu1 %v3683_v7  ;;  %v3664_v15 = vld [vmem:[#allocation2 + $0x18] sm:$0xf0]  ;;  %v3663_v16 = vor.u32 %v4548_v13, %v3662_v12  ;;  %s3619_s25 = sshll.u32 %s6073_s23, 2  ;;  %v3654_v18 = vld [vmem:[#allocation2] sm:$0xf]  ;;  %s5940_s11 = scalar_lea.vmem [#allocation7], %s3617_s10 }
  0x21   : > { %v3667_v17 = vor.u32 %v4547_v14, %v3664_v15  ;;  %v4546_v19 = vld [vmem:[#allocation2 + $0x4] sm:$0xf0]  ;;  %v4545_v20 = vld [vmem:[#allocation2 + $0x4] sm:$0xf]  ;;  %v3656_v21 = vld [vmem:[#allocation2 + $0x8] sm:$0xf0]  ;;  %s5077_s6 = scalar_lea.vmem %s6007_s0, %s3619_s25 }
  0x22   : > { %v4567_v22 = vld [vmem:[#allocation5 + $0x74] sm:$0xf]  ;;  %v3760_v23 = vld [vmem:[#allocation5 + $0x78] sm:$0xf0]  ;;  %v3655_v26 = vor.u32 %v4546_v19, %v3654_v18  ;;  %v3659_v27 = vor.u32 %v4545_v20, %v3656_v21  ;;  %v4537_v30 = vld [vmem:[%s5077_s6] sm:$0xff]  ;;  %s4761_s12 = sshll.u32 %s5021_s22, 7 }
  0x23   : > { %399 = vmatpush.bf16.msra.mxu0 %v3671_v10  ;;  %v4583_v24 = vld [vmem:[#allocation5 + $0xf4] sm:$0xf]  ;;  %v3824_v25 = vld [vmem:[#allocation5 + $0xf8] sm:$0xf0]  ;;  %v3763_v28 = vor.u32 %v4567_v22, %v3760_v23  ;;  %v4565_v31 = vld [vmem:[#allocation5 + $0x64] sm:$0xf]  ;;  %s3521_s15 = scalar_lea.hbm %s6012_s5, %s4761_s12 }
  0x24   : > { %448 = vmatpush.bf16.msra.mxu1 %v3675_v11  ;;  %v3827_v29 = vor.u32 %v4583_v24, %v3824_v25  ;;  %v3752_v32 = vld [vmem:[#allocation5 + $0x68] sm:$0xf0]  ;;  %v4581_v33 = vld [vmem:[#allocation5 + $0xe4] sm:$0xf]  ;;  %v4563_v38 = vld [vmem:[#allocation5 + $0x54] sm:$0xf] }
  0x25   : > { %v3755_v34 = vor.u32 %v4565_v31, %v3752_v32  ;;  %v3816_v35 = vld [vmem:[#allocation5 + $0xe8] sm:$0xf0]  ;;  %v3744_v39 = vld [vmem:[#allocation5 + $0x58] sm:$0xf0]  ;;  %v4579_v40 = vld [vmem:[#allocation5 + $0xd4] sm:$0xf] }
  0x26   : > { %v3819_v36 = vor.u32 %v4581_v33, %v3816_v35  ;;  %v4538_v37 = vld [vmem:[%s5077_s6 + $0x8] sm:$0xff]  ;;  %v3747_v41 = vor.u32 %v4563_v38, %v3744_v39  ;;  %v3808_v42 = vld [vmem:[#allocation5 + $0xd8] sm:$0xf0]  ;;  %v4539_v44 = vld [vmem:[%s5077_s6 + $0x10] sm:$0xff]  ;;  %s3522_s16 = sshll.u32 %s5940_s11, 4  ;;  %s3524_s17 = sshll.u32 %s3521_s15, 4  ;;  %s3523_s16 = int_to_ptr.vmem [resolvable:$true] %s3522_s16  ;;  %s3525_s17 = int_to_ptr.hbm [resolvable:$true] %s3524_s17 }
  0x27   : > { %400 = vmatpush.bf16.msra.mxu0 %v3663_v16  ;;  %v3811_v43 = vor.u32 %v4579_v40, %v3808_v42  ;;  %v4561_v45 = vld [vmem:[#allocation5 + $0x44] sm:$0xf]  ;;  %v3736_v46 = vld [vmem:[#allocation5 + $0x48] sm:$0xf0]  ;;  %v4540_v51 = vld [vmem:[%s5077_s6 + $0x18] sm:$0xff]  ;;  %s3510_s23 = scalar_lea.sflag [#allocation4], %s250_s9 }
  0x28   : > { %449 = vmatpush.bf16.msra.mxu1 %v3667_v17  ;;  %v4577_v47 = vld [vmem:[#allocation5 + $0xc4] sm:$0xf]  ;;  %v3739_v48 = vor.u32 %v4561_v45, %v3736_v46  ;;  %v3800_v49 = vld [vmem:[#allocation5 + $0xc8] sm:$0xf0]  ;;  %v4559_v52 = vld [vmem:[#allocation5 + $0x34] sm:$0xf] }
  0x29   : > { %v3803_v50 = vor.u32 %v4577_v47, %v3800_v49  ;;  %v3728_v53 = vld [vmem:[#allocation5 + $0x38] sm:$0xf0]  ;;  %v4575_v54 = vld [vmem:[#allocation5 + $0xb4] sm:$0xf]  ;;  %v4541_v58 = vld [vmem:[%s5077_s6 + $0x20] sm:$0xff]  ;;  %s4906_s22 = sshra.s32 %s3525_s17, 4  ;;  %s4907_s22 = int_to_ptr.hbm [resolvable:$true] %s4906_s22 }
  0x2a   : > { %v3731_v55 = vor.u32 %v4559_v52, %v3728_v53  ;;  %v3792_v56 = vld [vmem:[#allocation5 + $0xb8] sm:$0xf0]  ;;  %v4557_v59 = vld [vmem:[#allocation5 + $0x24] sm:$0xf]  ;;  %v3720_v60 = vld [vmem:[#allocation5 + $0x28] sm:$0xf0]  ;;  %p4913_p3 = scmp.lt.s32.totalorder %s4907_s22, %s6012_s5 }
  0x2b   : > { %401 = vmatpush.bf16.msra.mxu0 %v3655_v26  ;;  %v3795_v57 = vor.u32 %v4575_v54, %v3792_v56  ;;  %v4573_v61 = vld [vmem:[#allocation5 + $0xa4] sm:$0xf]  ;;  %v3723_v62 = vor.u32 %v4557_v59, %v3720_v60  ;;  %v3784_v63 = vld [vmem:[#allocation5 + $0xa8] sm:$0xf0]  ;;  %v3758_v0 = vld [vmem:[#allocation5 + $0x70] sm:$0xf] }
  0x2c   : > { %450 = vmatpush.bf16.msra.mxu1 %v3659_v27  ;;  %v4568_v1 = vld [vmem:[#allocation5 + $0x74] sm:$0xf0]  ;;  %v3787_v2 = vor.u32 %v4573_v61, %v3784_v63  ;;  %v3822_v4 = vld [vmem:[#allocation5 + $0xf0] sm:$0xf]  ;;  %v4542_v7 = vld [vmem:[%s5077_s6 + $0x28] sm:$0xff]  ;;  %s4908_s25 = scalar_lea.hbm %s4907_s22, 128 }
  0x2d   : > { %v3759_v3 = vor.u32 %v4568_v1, %v3758_v0  ;;  %v4584_v5 = vld [vmem:[#allocation5 + $0xf4] sm:$0xf0]  ;;  %v3750_v8 = vld [vmem:[#allocation5 + $0x60] sm:$0xf]  ;;  %v4566_v9 = vld [vmem:[#allocation5 + $0x64] sm:$0xf0]  ;;  %p4909_p0 = scmp.ne.s32.totalorder %s4907_s22, %s4908_s25 }
  0x2e   : > { %3684 = vmatmul.msk.bf16.vlgmr.msra.gmra.mxu0 %vm369_vm0, %v4537_v30  ;;  %v3823_v6 = vor.u32 %v4584_v5, %v3822_v4  ;;  %v3814_v10 = vld [vmem:[#allocation5 + $0xe0] sm:$0xf]  ;;  %v3751_v11 = vor.u32 %v4566_v9, %v3750_v8  ;;  %v4582_v12 = vld [vmem:[#allocation5 + $0xe4] sm:$0xf0]  ;;  %v4555_v14 = vld [vmem:[#allocation5 + $0x14] sm:$0xf] }
  0x2f   : > { %864 = vmatpush.bf16.msrb.mxu0 %v3763_v28  ;;  %3692 = vmatmul.msk.bf16.vlgmr.msra.gmra.mxu1 %vm369_vm0, %v4537_v30  ;;  %v3815_v13 = vor.u32 %v4582_v12, %v3814_v10  ;;  %v3712_v15 = vld [vmem:[#allocation5 + $0x18] sm:$0xf0]  ;;  %v3742_v16 = vld [vmem:[#allocation5 + $0x50] sm:$0xf]  ;;  %v4564_v18 = vld [vmem:[#allocation5 + $0x54] sm:$0xf0]  ;;  %p4910_p1 = pnand %p4909_p0, %p5038_p5 }
  0x30   : > { %913 = vmatpush.bf16.msrb.mxu1 %v3827_v29  ;;  %766 = vmatpush.bf16.msra.mxu2 %v3759_v3  ;;  %v3715_v17 = vor.u32 %v4555_v14, %v3712_v15  ;;  %v3806_v19 = vld [vmem:[#allocation5 + $0xd0] sm:$0xf]  ;;  %v4580_v20 = vld [vmem:[#allocation5 + $0xd4] sm:$0xf0]  ;;  %v3743_v21 = vor.u32 %v4564_v18, %v3742_v16  ;;  %v4571_v23 = vld [vmem:[#allocation5 + $0x94] sm:$0xf] }
  0x31   : > { %815 = vmatpush.bf16.msra.mxu3 %v3823_v6  ;;  %v3807_v22 = vor.u32 %v4580_v20, %v3806_v19  ;;  %v3776_v24 = vld [vmem:[#allocation5 + $0x98] sm:$0xf0]  ;;  %v3734_v25 = vld [vmem:[#allocation5 + $0x40] sm:$0xf]  ;;  %v4562_v27 = vld [vmem:[#allocation5 + $0x44] sm:$0xf0]  ;;  %p4911_p2 = pneg %p4910_p1 }
  0x32   : > { %v3779_v26 = vor.u32 %v4571_v23, %v3776_v24  ;;  %v3798_v28 = vld [vmem:[#allocation5 + $0xc0] sm:$0xf]  ;;  %v4578_v29 = vld [vmem:[#allocation5 + $0xc4] sm:$0xf0]  ;;  %v3735_v30 = vor.u32 %v4562_v27, %v3734_v25  ;;  %v3726_v32 = vld [vmem:[#allocation5 + $0x30] sm:$0xf] }
  0x33   : > { %865 = vmatpush.bf16.msrb.mxu0 %v3755_v34  ;;  %v3799_v31 = vor.u32 %v4578_v29, %v3798_v28  ;;  %v4560_v33 = vld [vmem:[#allocation5 + $0x34] sm:$0xf0]  ;;  %v3790_v34 = vld [vmem:[#allocation5 + $0xb0] sm:$0xf]  ;;  %v3718_v39 = vld [vmem:[#allocation5 + $0x20] sm:$0xf] }
  0x34   : > { %914 = vmatpush.bf16.msrb.mxu1 %v3819_v36  ;;  %767 = vmatpush.bf16.msra.mxu2 %v3751_v11  ;;  %v4543_v35 = vld [vmem:[%s5077_s6 + $0x30] sm:$0xff]  ;;  %v3727_v36 = vor.u32 %v4560_v33, %v3726_v32  ;;  %v4558_v40 = vld [vmem:[#allocation5 + $0x24] sm:$0xf0]  ;;  %v3782_v42 = vld [vmem:[#allocation5 + $0xa0] sm:$0xf] }
  0x35   : > { %816 = vmatpush.bf16.msra.mxu3 %v3815_v13  ;;  %v4553_v45 = vld [vmem:[#allocation5 + $0x4] sm:$0xf]  ;;  %v3704_v46 = vld [vmem:[#allocation5 + $0x8] sm:$0xf0]  ;;  %v4556_v49 = vld [vmem:[#allocation5 + $0x14] sm:$0xf0] }
  0x36   : > { %v3707_v47 = vor.u32 %v4553_v45, %v3704_v46  ;;  %v4572_v52 = vld [vmem:[#allocation5 + $0x94] sm:$0xf0]  ;;  %v4569_v54 = vld [vmem:[#allocation5 + $0x84] sm:$0xf]  ;;  %v3702_v56 = vld [vmem:[#allocation5] sm:$0xf] }
  0x37   : > { %866 = vmatpush.bf16.msrb.mxu0 %v3747_v41  ;;  %v3719_v41 = vor.u32 %v4558_v40, %v3718_v39  ;;  %v3766_v59 = vld [vmem:[#allocation5 + $0x80] sm:$0xf]  ;;  %v4570_v60 = vld [vmem:[#allocation5 + $0x84] sm:$0xf0]  ;;  %v4544_v63 = vld [vmem:[%s5077_s6 + $0x38] sm:$0xff]  ;;  %s4912_s6 = scalar_lea.hbm %s6012_s5, 256 }
  0x38   : > { %915 = vmatpush.bf16.msrb.mxu1 %v3811_v43  ;;  %768 = vmatpush.bf16.msra.mxu2 %v3743_v21  ;;  %v4574_v43 = vld [vmem:[#allocation5 + $0xa4] sm:$0xf0]  ;;  %v5106_v0 = vld [vmem:[%s6010_s3] sm:$0x7f]  ;;  %v3886_v6 = vld [vmem:[#allocation5 + $0x170] sm:$0xf]  ;;  %p4914_p4 = scmp.lt.s32.totalorder %s4912_s6, %s4908_s25 }
  0x39   : > { %817 = vmatpush.bf16.msra.mxu3 %v3807_v22  ;;  %v5114_v4 = vperm.slane %v5106_v0, 0  ;;  %v3950_v9 = vld [vmem:[#allocation5 + $0x1f0] sm:$0xf]  ;;  %v4616_v10 = vld [vmem:[#allocation5 + $0x1f4] sm:$0xf0] }
  0x3a   : > { %v3951_v11 = vor.u32 %v4616_v10, %v3950_v9  ;;  %v4599_v22 = vld [vmem:[#allocation5 + $0x174] sm:$0xf]  ;;  %v3888_v23 = vld [vmem:[#allocation5 + $0x178] sm:$0xf0]  ;;  %v3878_v32 = vld [vmem:[#allocation5 + $0x160] sm:$0xf]  ;;  %p4915_p7 = por %p4914_p4, %p4913_p3 }
  0x3b   : > { %867 = vmatpush.bf16.msrb.mxu0 %v3739_v48  ;;  %v3710_v48 = vld [vmem:[#allocation5 + $0x10] sm:$0xf]  ;;  %v3891_v25 = vor.u32 %v4599_v22, %v3888_v23  ;;  %v3952_v27 = vld [vmem:[#allocation5 + $0x1f8] sm:$0xf0]  ;;  %v4598_v33 = vld [vmem:[#allocation5 + $0x164] sm:$0xf0] }
  0x3c   : > { %916 = vmatpush.bf16.msrb.mxu1 %v3803_v50  ;;  %769 = vmatpush.bf16.msra.mxu2 %v3735_v30  ;;  %v3774_v50 = vld [vmem:[#allocation5 + $0x90] sm:$0xf]  ;;  %v4595_v22 = vld [vmem:[#allocation5 + $0x154] sm:$0xf]  ;;  %v3872_v23 = vld [vmem:[#allocation5 + $0x158] sm:$0xf0]  ;;  %p4916_p8 = pnand %p4915_p7, %p4911_p2 }
  0x3d   : > { %818 = vmatpush.bf16.msra.mxu3 %v3799_v31  ;;  %v3775_v53 = vor.u32 %v4572_v52, %v3774_v50  ;;  %v4613_v52 = vld [vmem:[#allocation5 + $0x1e4] sm:$0xf] }
  0x3e   : > { %3685 = vmatmul.msk.bf16.gmra.mxu0 %vm369_vm0, %v4538_v37 }
  0x3f   : > { %3693 = vmatmul.msk.bf16.gmra.mxu1 %vm369_vm0, %v4538_v37  ;;  %868 = vmatpush.bf16.msrb.mxu0 %v3731_v55  ;;  %v4576_v37 = vld [vmem:[#allocation5 + $0xb4] sm:$0xf0]  ;;  %v3768_v55 = vld [vmem:[#allocation5 + $0x88] sm:$0xf0] }
  0x40   : > { %917 = vmatpush.bf16.msrb.mxu1 %v3795_v57  ;;  %v3791_v38 = vor.u32 %v4576_v37, %v3790_v34  ;;  %770 = vmatpush.bf16.msra.mxu2 %v3727_v36  ;;  %v3771_v57 = vor.u32 %v4569_v54, %v3768_v55  ;;  %v3879_v34 = vor.u32 %v4598_v33, %v3878_v32  ;;  %v4614_v36 = vld [vmem:[#allocation5 + $0x1e4] sm:$0xf0]  ;;  %v3862_v32 = vld [vmem:[#allocation5 + $0x140] sm:$0xf] }
  0x41   : > { %v4594_v33 = vld [vmem:[#allocation5 + $0x144] sm:$0xf0] }
  0x42   : > { %819 = vmatpush.bf16.msra.mxu3 %v3791_v38 }
  0x43   : > { %869 = vmatpush.bf16.msrb.mxu0 %v3723_v62  ;;  %v3767_v62 = vor.u32 %v4570_v60, %v3766_v59  ;;  %v4596_v59 = vld [vmem:[#allocation5 + $0x154] sm:$0xf0] }
  0x44   : > { %918 = vmatpush.bf16.msrb.mxu1 %v3787_v2  ;;  %771 = vmatpush.bf16.msra.mxu2 %v3719_v41  ;;  %v5111_v2 = vld [vmem:[%s6010_s3 + $0x8] sm:$0x7f] }
  0x45   : > { %v5117_v5 = vperm.slane %v5111_v2, 0 }
  0x47   : > { %870 = vmatpush.bf16.msrb.mxu0 %v3715_v17 }
  0x48   : > { %919 = vmatpush.bf16.msrb.mxu1 %v3779_v26  ;;  %v4615_v26 = vld [vmem:[#allocation5 + $0x1f4] sm:$0xf] }
  0x49   : > { %v3955_v29 = vor.u32 %v4615_v26, %v3952_v27  ;;  %v4611_v26 = vld [vmem:[#allocation5 + $0x1d4] sm:$0xf]  ;;  %v3936_v27 = vld [vmem:[#allocation5 + $0x1d8] sm:$0xf0] }
  0x4b   : > { %871 = vmatpush.bf16.msrb.mxu0 %v3707_v47 }
  0x4c   : > { %920 = vmatpush.bf16.msrb.mxu1 %v3771_v57 }
  0x4e   : > { %3686 = vmatmul.msk.bf16.gmra.mxu0 %vm369_vm0, %v4539_v44 }
  0x4f   : > { %3694 = vmatmul.msk.bf16.gmra.mxu1 %vm369_vm0, %v4539_v44  ;;  %v3783_v44 = vor.u32 %v4574_v43, %v3782_v42  ;;  %1270 = vmatpush.bf16.msra.mxu0 %v3891_v25  ;;  %v3875_v25 = vor.u32 %v4595_v22, %v3872_v23  ;;  %v3854_v22 = vld [vmem:[#allocation5 + $0x130] sm:$0xf]  ;;  %v4592_v23 = vld [vmem:[#allocation5 + $0x134] sm:$0xf0] }
  0x50   : > { %1319 = vmatpush.bf16.msra.mxu1 %v3955_v29  ;;  %v3939_v29 = vor.u32 %v4611_v26, %v3936_v27  ;;  %v4608_v26 = vld [vmem:[#allocation5 + $0x1b4] sm:$0xf0] }
  0x51   : > { %820 = vmatpush.bf16.msra.mxu3 %v3783_v44 }
  0x55   : > { %821 = vmatpush.bf16.msra.mxu3 %v3775_v53  ;;  %v3944_v53 = vld [vmem:[#allocation5 + $0x1e8] sm:$0xf0] }
  0x56   : > { %v3947_v55 = vor.u32 %v4613_v52, %v3944_v53 }
  0x58   : > { %1320 = vmatpush.bf16.msra.mxu1 %v3947_v55 }
  0x59   : > { %822 = vmatpush.bf16.msra.mxu3 %v3767_v62  ;;  %v4612_v62 = vld [vmem:[#allocation5 + $0x1d4] sm:$0xf0] }
  0x5c   : > { %1321 = vmatpush.bf16.msra.mxu1 %v3939_v29 }
  0x5d   : > { %1221 = vmatpush.bf16.msrb.mxu3 %v3951_v11 }
  0x5e   : > { %3687 = vmatmul.msk.bf16.gmra.mxu0 %vm369_vm0, %v4540_v51 }
  0x5f   : > { %3695 = vmatmul.msk.bf16.gmra.mxu1 %vm369_vm0, %v4540_v51  ;;  %v3711_v51 = vor.u32 %v4556_v49, %v3710_v48  ;;  %v4597_v48 = vld [vmem:[#allocation5 + $0x164] sm:$0xf]  ;;  %v3880_v49 = vld [vmem:[#allocation5 + $0x168] sm:$0xf0] }
  0x61   : > { %772 = vmatpush.bf16.msra.mxu2 %v3711_v51  ;;  %v3883_v51 = vor.u32 %v4597_v48, %v3880_v49 }
  0x63   : > { %1271 = vmatpush.bf16.msra.mxu0 %v3883_v51 }
  0x67   : > { %1272 = vmatpush.bf16.msra.mxu0 %v3875_v25  ;;  %v3918_v25 = vld [vmem:[#allocation5 + $0x1b0] sm:$0xf] }
  0x68   : > { %v3919_v27 = vor.u32 %v4608_v26, %v3918_v25 }
  0x6e   : > { %3688 = vmatmul.msk.bf16.gmra.mxu0 %vm369_vm0, %v4541_v58 }
  0x6f   : > { %3696 = vmatmul.msk.bf16.gmra.mxu1 %vm369_vm0, %v4541_v58  ;;  %v4554_v58 = vld [vmem:[#allocation5 + $0x4] sm:$0xf0] }
  0x70   : > { %v3703_v61 = vor.u32 %v4554_v58, %v3702_v56  ;;  %v3870_v58 = vld [vmem:[#allocation5 + $0x150] sm:$0xf] }
  0x71   : > { %v3871_v60 = vor.u32 %v4596_v59, %v3870_v58 }
  0x72   : > { %773 = vmatpush.bf16.msra.mxu2 %v3703_v61  ;;  %v3934_v61 = vld [vmem:[#allocation5 + $0x1d0] sm:$0xf] }
  0x7e   : > { %3689 = vmatmul.msk.bf16.gmra.mxu0 %vm369_vm0, %v4542_v7 }
  0x7f   : > { %3697 = vmatmul.msk.bf16.gmra.mxu1 %vm369_vm0, %v4542_v7  ;;  %v4600_v7 = vld [vmem:[#allocation5 + $0x174] sm:$0xf0] }
  0x80   : > { %v3887_v8 = vor.u32 %v4600_v7, %v3886_v6 }
  0x82   : > { %1172 = vmatpush.bf16.msrb.mxu2 %v3887_v8 }
  0x86   : > { %1173 = vmatpush.bf16.msrb.mxu2 %v3879_v34  ;;  %v3863_v34 = vor.u32 %v4594_v33, %v3862_v32 }
  0x8a   : > { %1174 = vmatpush.bf16.msrb.mxu2 %v3871_v60  ;;  %v4609_v60 = vld [vmem:[#allocation5 + $0x1c4] sm:$0xf] }
  0x8e   : > { %3690 = vmatmul.msk.bf16.gmra.mxu0 %vm369_vm0, %v4543_v35  ;;  %1175 = vmatpush.bf16.msrb.mxu2 %v3863_v34 }
  0x8f   : > { %3698 = vmatmul.msk.bf16.gmra.mxu1 %vm369_vm0, %v4543_v35  ;;  %v3942_v35 = vld [vmem:[#allocation5 + $0x1e0] sm:$0xf] }
  0x90   : > { %v3943_v37 = vor.u32 %v4614_v36, %v3942_v35  ;;  %v3926_v35 = vld [vmem:[#allocation5 + $0x1c0] sm:$0xf]  ;;  %v4610_v36 = vld [vmem:[#allocation5 + $0x1c4] sm:$0xf0] }
  0x92   : > { %1222 = vmatpush.bf16.msrb.mxu3 %v3943_v37  ;;  %v3927_v37 = vor.u32 %v4610_v36, %v3926_v35 }
  0x9e   : > { %3691 = vmatmul.msk.bf16.gmra.mxu0 %vm369_vm0, %v4544_v63 }
  0x9f   : > { %3699 = vmatmul.msk.bf16.gmra.mxu1 %vm369_vm0, %v4544_v63  ;;  %v3935_v63 = vor.u32 %v4612_v62, %v3934_v61  ;;  %v3928_v61 = vld [vmem:[#allocation5 + $0x1c8] sm:$0xf0] }
  0xa1   : > { %1223 = vmatpush.bf16.msrb.mxu3 %v3935_v63  ;;  %v3931_v63 = vor.u32 %v4609_v60, %v3928_v61 }
  0xa3   : > { %1322 = vmatpush.bf16.msra.mxu1 %v3931_v63 }
  0xa5   : > { %1224 = vmatpush.bf16.msrb.mxu3 %v3927_v37 }
  0xa9   : > { %1225 = vmatpush.bf16.msrb.mxu3 %v3919_v27 }
  0xab   : > { %v403_v1 = vpop.f32.mrf.mxu0 }
  0xac   : > { %v452_v3 = vpop.f32.mrf.mxu1  ;;  %v5120_v12 = vadd.f32 %v403_v1, %v5114_v4 }
  0xad   : > { %v5123_v13 = vadd.f32 %v452_v3, %v5117_v5 }
  0xae   : > { %v492_v18 = vmax.f32 %v5120_v12, 0.0 }
  0xaf   : > { %v493_v20 = vmax.f32 %v5123_v13, 0.0 }
  0xb3   : > { %v405_v14 = vpop.f32.mrf.mxu0 }
  0xb4   : > { %v5126_v15 = vadd.f32 %v405_v14, %v5114_v4  ;;  %v454_v16 = vpop.f32.mrf.mxu1 }
  0xb5   : > { %v5129_v17 = vadd.f32 %v454_v16, %v5117_v5 }
  0xb6   : > { %v494_v19 = vmax.f32 %v5126_v15, 0.0 }
  0xb7   : > { %v495_v21 = vmax.f32 %v5129_v17, 0.0  ;;  %v4680_v17 = vld [vmem:[#allocation5 + $0x3f4] sm:$0xf0] }
  0xb8   : > { %v588_v24 = vpack.c.bf16 %v494_v19, %v492_v18 }
  0xb9   : > { %v589_v28 = vpack.c.bf16 %v495_v21, %v493_v20 }
  0xba   : > { %774 = vmatmul.bf16.vlgmr.msra.gmra.mxu2 %v588_v24  ;;  %872 = vmatmul.bf16.vlgmr.msrb.gmra.mxu0 %v588_v24 }
  0xbb   : > { %823 = vmatmul.bf16.vlgmr.msra.gmra.mxu3 %v589_v28  ;;  %921 = vmatmul.bf16.vlgmr.msrb.gmra.mxu1 %v589_v28  ;;  %v408_v30 = vpop.f32.mrf.mxu0 }
  0xbc   : > { %v457_v31 = vpop.f32.mrf.mxu1  ;;  %v5144_v38 = vadd.f32 %v408_v30, %v5114_v4 }
  0xbd   : > { %v5147_v39 = vadd.f32 %v457_v31, %v5117_v5 }
  0xbe   : > { %v6038_v44 = vmax.f32 %v5144_v38, 0.0 }
  0xbf   : > { %v497_v46 = vmax.f32 %v5147_v39, 0.0 }
  0xc3   : > { %v410_v40 = vpop.f32.mrf.mxu0 }
  0xc4   : > { %v5150_v41 = vadd.f32 %v410_v40, %v5114_v4  ;;  %v459_v42 = vpop.f32.mrf.mxu1 }
  0xc5   : > { %v5153_v43 = vadd.f32 %v459_v42, %v5117_v5 }
  0xc6   : > { %v6037_v45 = vmax.f32 %v5150_v41, 0.0 }
  0xc7   : > { %v499_v47 = vmax.f32 %v5153_v43, 0.0  ;;  %v4678_v43 = vld [vmem:[#allocation5 + $0x3e4] sm:$0xf0] }
  0xc8   : > { %v590_v50 = vpack.c.bf16 %v6037_v45, %v6038_v44  ;;  %v3976_v45 = vld [vmem:[#allocation5 + $0x228] sm:$0xf0] }
  0xc9   : > { %v591_v54 = vpack.c.bf16 %v499_v47, %v497_v46 }
  0xca   : > { %779 = vmatmul.bf16.gmra.mxu2 %v590_v50  ;;  %877 = vmatmul.bf16.gmra.mxu0 %v590_v50 }
  0xcb   : > { %828 = vmatmul.bf16.gmra.mxu3 %v591_v54  ;;  %926 = vmatmul.bf16.gmra.mxu1 %v591_v54  ;;  %v413_v56 = vpop.f32.mrf.mxu0 }
  0xcc   : > { %v462_v57 = vpop.f32.mrf.mxu1  ;;  %v5168_v1 = vadd.f32 %v413_v56, %v5114_v4  ;;  %v4593_v56 = vld [vmem:[#allocation5 + $0x144] sm:$0xf] }
  0xcd   : > { %v5171_v3 = vadd.f32 %v462_v57, %v5117_v5  ;;  %v3864_v57 = vld [vmem:[#allocation5 + $0x148] sm:$0xf0] }
  0xce   : > { %v6034_v10 = vmax.f32 %v5168_v1, 0.0  ;;  %v3867_v59 = vor.u32 %v4593_v56, %v3864_v57 }
  0xcf   : > { %v6036_v14 = vmax.f32 %v5171_v3, 0.0 }
  0xd0   : > { %1273 = vmatpush.bf16.msra.mxu0 %v3867_v59  ;;  %v3920_v59 = vld [vmem:[#allocation5 + $0x1b8] sm:$0xf0] }
  0xd3   : > { %v415_v6 = vpop.f32.mrf.mxu0 }
  0xd4   : > { %v5174_v7 = vadd.f32 %v415_v6, %v5114_v4  ;;  %v464_v8 = vpop.f32.mrf.mxu1 }
  0xd5   : > { %v5177_v9 = vadd.f32 %v464_v8, %v5117_v5 }
  0xd6   : > { %v6033_v11 = vmax.f32 %v5174_v7, 0.0 }
  0xd7   : > { %v6035_v16 = vmax.f32 %v5177_v9, 0.0 }
  0xd8   : > { %v592_v24 = vpack.c.bf16 %v6033_v11, %v6034_v10 }
  0xd9   : > { %v593_v28 = vpack.c.bf16 %v6035_v16, %v6036_v14 }
  0xda   : > { %784 = vmatmul.bf16.gmra.mxu2 %v592_v24  ;;  %882 = vmatmul.bf16.gmra.mxu0 %v592_v24  ;;  %v3855_v24 = vor.u32 %v4592_v23, %v3854_v22  ;;  %v3910_v23 = vld [vmem:[#allocation5 + $0x1a0] sm:$0xf] }
  0xdb   : > { %833 = vmatmul.bf16.gmra.mxu3 %v593_v28  ;;  %931 = vmatmul.bf16.gmra.mxu1 %v593_v28  ;;  %v418_v30 = vpop.f32.mrf.mxu0 }
  0xdc   : > { %v467_v31 = vpop.f32.mrf.mxu1  ;;  %v5192_v40 = vadd.f32 %v418_v30, %v5114_v4  ;;  %1176 = vmatpush.bf16.msrb.mxu2 %v3855_v24  ;;  %v4606_v24 = vld [vmem:[#allocation5 + $0x1a4] sm:$0xf0] }
  0xdd   : > { %v5195_v42 = vadd.f32 %v467_v31, %v5117_v5  ;;  %v3911_v25 = vor.u32 %v4606_v24, %v3910_v23 }
  0xde   : > { %v6030_v52 = vmax.f32 %v5192_v40, 0.0 }
  0xdf   : > { %v6032_v54 = vmax.f32 %v5195_v42, 0.0  ;;  %1226 = vmatpush.bf16.msrb.mxu3 %v3911_v25  ;;  %v3838_v25 = vld [vmem:[#allocation5 + $0x110] sm:$0xf] }
  0xe3   : > { %v420_v48 = vpop.f32.mrf.mxu0 }
  0xe4   : > { %v5198_v49 = vadd.f32 %v420_v48, %v5114_v4  ;;  %v469_v50 = vpop.f32.mrf.mxu1  ;;  %v4591_v48 = vld [vmem:[#allocation5 + $0x134] sm:$0xf] }
  0xe5   : > { %v5201_v51 = vadd.f32 %v469_v50, %v5117_v5  ;;  %v3856_v50 = vld [vmem:[#allocation5 + $0x138] sm:$0xf0] }
  0xe6   : > { %v6025_v53 = vmax.f32 %v5198_v49, 0.0  ;;  %v3859_v57 = vor.u32 %v4591_v48, %v3856_v50 }
  0xe7   : > { %v6031_v55 = vmax.f32 %v5201_v51, 0.0 }
  0xe8   : > { %v594_v58 = vpack.c.bf16 %v6025_v53, %v6030_v52  ;;  %1274 = vmatpush.bf16.msra.mxu0 %v3859_v57  ;;  %v4632_v52 = vld [vmem:[#allocation5 + $0x274] sm:$0xf0] }
  0xe9   : > { %v595_v62 = vpack.c.bf16 %v6031_v55, %v6032_v54 }
  0xea   : > { %789 = vmatmul.bf16.gmra.mxu2 %v594_v58  ;;  %887 = vmatmul.bf16.gmra.mxu0 %v594_v58  ;;  %v4607_v58 = vld [vmem:[#allocation5 + $0x1b4] sm:$0xf] }
  0xeb   : > { %838 = vmatmul.bf16.gmra.mxu3 %v595_v62  ;;  %936 = vmatmul.bf16.gmra.mxu1 %v595_v62  ;;  %v423_v6 = vpop.f32.mrf.mxu0  ;;  %v3923_v61 = vor.u32 %v4607_v58, %v3920_v59 }
  0xec   : > { %v472_v8 = vpop.f32.mrf.mxu1  ;;  %v5216_v28 = vadd.f32 %v423_v6, %v5114_v4  ;;  %v3846_v6 = vld [vmem:[#allocation5 + $0x120] sm:$0xf] }
  0xed   : > { %v5219_v29 = vadd.f32 %v472_v8, %v5117_v5  ;;  %1323 = vmatpush.bf16.msra.mxu1 %v3923_v61  ;;  %v4590_v8 = vld [vmem:[#allocation5 + $0x124] sm:$0xf0]  ;;  %v3848_v61 = vld [vmem:[#allocation5 + $0x128] sm:$0xf0] }
  0xee   : > { %v6016_v34 = vmax.f32 %v5216_v28, 0.0  ;;  %v3847_v22 = vor.u32 %v4590_v8, %v3846_v6  ;;  %v4605_v6 = vld [vmem:[#allocation5 + $0x1a4] sm:$0xf]  ;;  %v3912_v8 = vld [vmem:[#allocation5 + $0x1a8] sm:$0xf0] }
  0xef   : > { %v6024_v36 = vmax.f32 %v5219_v29, 0.0  ;;  %v3915_v23 = vor.u32 %v4605_v6, %v3912_v8 }
  0xf0   : > { %1177 = vmatpush.bf16.msrb.mxu2 %v3847_v22 }
  0xf1   : > { %1324 = vmatpush.bf16.msra.mxu1 %v3915_v23 }
  0xf3   : > { %v425_v30 = vpop.f32.mrf.mxu0 }
  0xf4   : > { %v5222_v31 = vadd.f32 %v425_v30, %v5114_v4  ;;  %v474_v32 = vpop.f32.mrf.mxu1 }
  0xf5   : > { %v5225_v33 = vadd.f32 %v474_v32, %v5117_v5 }
  0xf6   : > { %v6013_v35 = vmax.f32 %v5222_v31, 0.0 }
  0xf7   : > { %v6017_v37 = vmax.f32 %v5225_v33, 0.0 }
  0xf8   : > { %v596_v56 = vpack.c.bf16 %v6013_v35, %v6016_v34 }
  0xf9   : > { %v597_v60 = vpack.c.bf16 %v6017_v37, %v6024_v36 }
  0xfa   : > { %794 = vmatmul.bf16.gmra.mxu2 %v596_v56  ;;  %892 = vmatmul.bf16.gmra.mxu0 %v596_v56 }
  0xfb   : > { %843 = vmatmul.bf16.gmra.mxu3 %v597_v60  ;;  %941 = vmatmul.bf16.gmra.mxu1 %v597_v60  ;;  %v428_v62 = vpop.f32.mrf.mxu0  ;;  %v4589_v60 = vld [vmem:[#allocation5 + $0x124] sm:$0xf] }
  0xfc   : > { %v477_v63 = vpop.f32.mrf.mxu1  ;;  %v5240_v26 = vadd.f32 %v428_v62, %v5114_v4 }
  0xfd   : > { %v5243_v27 = vadd.f32 %v477_v63, %v5117_v5  ;;  %v3851_v63 = vor.u32 %v4589_v60, %v3848_v61  ;;  %v4604_v61 = vld [vmem:[#allocation5 + $0x194] sm:$0xf0] }
  0xfe   : > { %v6015_v56 = vmax.f32 %v5240_v26, 0.0 }
  0xff   : > { %v6023_v58 = vmax.f32 %v5243_v27, 0.0  ;;  %1275 = vmatpush.bf16.msra.mxu0 %v3851_v63 }
 0x103   : > { %v430_v30 = vpop.f32.mrf.mxu0 }
 0x104   : > { %v5246_v32 = vadd.f32 %v430_v30, %v5114_v4  ;;  %v479_v48 = vpop.f32.mrf.mxu1  ;;  %v4588_v30 = vld [vmem:[#allocation5 + $0x114] sm:$0xf0] }
 0x105   : > { %v5249_v50 = vadd.f32 %v479_v48, %v5117_v5  ;;  %v3902_v48 = vld [vmem:[#allocation5 + $0x190] sm:$0xf]  ;;  %v3839_v60 = vor.u32 %v4588_v30, %v3838_v25 }
 0x106   : > { %v6014_v57 = vmax.f32 %v5246_v32, 0.0  ;;  %v3903_v34 = vor.u32 %v4604_v61, %v3902_v48  ;;  %v4603_v48 = vld [vmem:[#allocation5 + $0x194] sm:$0xf] }
 0x107   : > { %v6020_v59 = vmax.f32 %v5249_v50, 0.0  ;;  %1178 = vmatpush.bf16.msrb.mxu2 %v3839_v60  ;;  %v3904_v60 = vld [vmem:[#allocation5 + $0x198] sm:$0xf0] }
 0x108   : > { %v598_v62 = vpack.c.bf16 %v6014_v57, %v6015_v56  ;;  %v4587_v57 = vld [vmem:[#allocation5 + $0x114] sm:$0xf]  ;;  %v3840_v56 = vld [vmem:[#allocation5 + $0x118] sm:$0xf0]  ;;  %1227 = vmatpush.bf16.msrb.mxu3 %v3903_v34  ;;  %v3907_v61 = vor.u32 %v4603_v48, %v3904_v60  ;;  %v3896_v48 = vld [vmem:[#allocation5 + $0x188] sm:$0xf0] }
 0x109   : > { %v599_v22 = vpack.c.bf16 %v6020_v59, %v6023_v58  ;;  %v3843_v37 = vor.u32 %v4587_v57, %v3840_v56  ;;  %v4601_v58 = vld [vmem:[#allocation5 + $0x184] sm:$0xf] }
 0x10a   : > { %799 = vmatmul.bf16.gmra.mxu2 %v598_v62  ;;  %897 = vmatmul.bf16.gmra.mxu0 %v598_v62 }
 0x10b   : > { %848 = vmatmul.bf16.gmra.mxu3 %v599_v22  ;;  %946 = vmatmul.bf16.gmra.mxu1 %v599_v22  ;;  %v433_v24 = vpop.f32.mrf.mxu0 }
 0x10c   : > { %v482_v35 = vpop.f32.mrf.mxu1  ;;  %1276 = vmatpush.bf16.msra.mxu0 %v3843_v37  ;;  %v5264_v62 = vadd.f32 %v433_v24, %v5114_v4  ;;  %1325 = vmatpush.bf16.msra.mxu1 %v3907_v61 }
 0x10d   : > { %v5267_v6 = vadd.f32 %v482_v35, %v5117_v5 }
 0x10e   : > { %v6019_v25 = vmax.f32 %v5264_v62, 0.0 }
 0x10f   : > { %v6022_v34 = vmax.f32 %v5267_v6, 0.0 }
 0x113   : > { %v435_v8 = vpop.f32.mrf.mxu0 }
 0x114   : > { %v5270_v22 = vadd.f32 %v435_v8, %v5114_v4  ;;  %v484_v63 = vpop.f32.mrf.mxu1 }
 0x115   : > { %v5273_v23 = vadd.f32 %v484_v63, %v5117_v5  ;;  %v3830_v63 = vld [vmem:[#allocation5 + $0x100] sm:$0xf] }
 0x116   : > { %v6018_v56 = vmax.f32 %v5270_v22, 0.0 }
 0x117   : > { %v6021_v37 = vmax.f32 %v5273_v23, 0.0 }
 0x118   : > { %v600_v35 = vpack.c.bf16 %v6018_v56, %v6019_v25  ;;  %v4586_v56 = vld [vmem:[#allocation5 + $0x104] sm:$0xf0] }
 0x119   : > { %v601_v57 = vpack.c.bf16 %v6021_v37, %v6022_v34  ;;  %v3831_v37 = vor.u32 %v4586_v56, %v3830_v63  ;;  %v3894_v34 = vld [vmem:[#allocation5 + $0x180] sm:$0xf] }
 0x11a   : > { %804 = vmatmul.bf16.gmra.mxu2 %v600_v35  ;;  %902 = vmatmul.bf16.gmra.mxu0 %v600_v35  ;;  %v4602_v35 = vld [vmem:[#allocation5 + $0x184] sm:$0xf0] }
 0x11b   : > { %853 = vmatmul.bf16.gmra.mxu3 %v601_v57  ;;  %951 = vmatmul.bf16.gmra.mxu1 %v601_v57  ;;  %v438_v24 = vpop.f32.mrf.mxu0  ;;  %v3895_v53 = vor.u32 %v4602_v35, %v3894_v34  ;;  %v5312_v34 = vperm.slane %v5111_v2, 1  ;;  %v4014_v2 = vld [vmem:[#allocation5 + $0x270] sm:$0xf] }
 0x11c   : > { %v487_v30 = vpop.f32.mrf.mxu1  ;;  %v5288_v8 = vadd.f32 %v438_v24, %v5114_v4  ;;  %1179 = vmatpush.bf16.msrb.mxu2 %v3831_v37  ;;  %v3899_v24 = vor.u32 %v4601_v58, %v3896_v48  ;;  %v3832_v58 = vld [vmem:[#allocation5 + $0x108] sm:$0xf0]  ;;  %v4015_v54 = vor.u32 %v4632_v52, %v4014_v2  ;;  %v4631_v52 = vld [vmem:[#allocation5 + $0x274] sm:$0xf] }
 0x11d   : > { %v5291_v25 = vadd.f32 %v487_v30, %v5117_v5  ;;  %1228 = vmatpush.bf16.msrb.mxu3 %v3895_v53 }
 0x11e   : > { %v6027_v61 = vmax.f32 %v5288_v8, 0.0  ;;  %1326 = vmatpush.bf16.msra.mxu1 %v3899_v24  ;;  %v5316_v24 = vperm.slane %v5106_v0, 1 }
 0x11f   : > { %v6029_v56 = vmax.f32 %v5291_v25, 0.0 }
 0x120   : > { %1674 = vmatpush.bf16.msra.mxu2 %v4015_v54 }
 0x123   : > { %v440_v59 = vpop.f32.mrf.mxu0 }
 0x124   : > { %v5294_v57 = vadd.f32 %v440_v59, %v5114_v4  ;;  %v489_v36 = vpop.f32.mrf.mxu1 }
 0x125   : > { %v5297_v60 = vadd.f32 %v489_v36, %v5117_v5  ;;  %v4585_v36 = vld [vmem:[#allocation5 + $0x104] sm:$0xf] }
 0x126   : > { %v6026_v30 = vmax.f32 %v5294_v57, 0.0  ;;  %v3835_v53 = vor.u32 %v4585_v36, %v3832_v58 }
 0x127   : > { %v6028_v63 = vmax.f32 %v5297_v60, 0.0 }
 0x128   : > { %v602_v4 = vpack.c.bf16 %v6026_v30, %v6027_v61  ;;  %1277 = vmatpush.bf16.msra.mxu0 %v3835_v53 }
 0x129   : > { %v603_v5 = vpack.c.bf16 %v6028_v63, %v6029_v56 }
 0x12a   : > { %809 = vmatmul.bf16.gmra.mxu2 %v602_v4  ;;  %907 = vmatmul.bf16.gmra.mxu0 %v602_v4 }
 0x12b   : > { %858 = vmatmul.bf16.gmra.mxu3 %v603_v5  ;;  %956 = vmatmul.bf16.gmra.mxu1 %v603_v5 }
 0x137   : > { %v873_v59 = vpop.f32.mrf.mxu0 }
 0x138   : > { %v922_v37 = vpop.f32.mrf.mxu1  ;;  %v874_v35 = vadd.f32 %v873_v59, %v5312_v34 }
 0x13a   : > { %v923_v63 = vadd.f32 %v922_v37, %v874_v35 }
 0x13c   : > { %v963_v53 = vmax.f32 %v923_v63, 0.0  ;;  %v4648_v63 = vld [vmem:[#allocation5 + $0x2f4] sm:$0xf0] }
 0x13d   : > { %v775_v48 = vpop.f32.mrf.mxu2 }
 0x13e   : > { %v824_v30 = vpop.f32.mrf.mxu3  ;;  %v776_v5 = vadd.f32 %v775_v48, %v5316_v24 }
 0x13f   : > { %v875_v61 = vpop.f32.mrf.mxu0 }
 0x140   : > { %v876_v4 = vadd.f32 %v875_v61, %v5312_v34  ;;  %v924_v36 = vpop.f32.mrf.mxu1  ;;  %v825_v59 = vadd.f32 %v824_v30, %v776_v5  ;;  %v4016_v30 = vld [vmem:[#allocation5 + $0x278] sm:$0xf0] }
 0x142   : > { %v925_v58 = vadd.f32 %v924_v36, %v876_v4  ;;  %v962_v61 = vmax.f32 %v825_v59, 0.0  ;;  %v4078_v4 = vld [vmem:[#allocation5 + $0x2f0] sm:$0xf] }
 0x143   : > { %v4079_v36 = vor.u32 %v4648_v63, %v4078_v4  ;;  %v4006_v4 = vld [vmem:[#allocation5 + $0x260] sm:$0xf]  ;;  %v4630_v63 = vld [vmem:[#allocation5 + $0x264] sm:$0xf0] }
 0x144   : > { %v965_v56 = vmax.f32 %v925_v58, 0.0 }
 0x145   : > { %v777_v55 = vpop.f32.mrf.mxu2  ;;  %1723 = vmatpush.bf16.msra.mxu3 %v4079_v36 }
 0x146   : > { %v778_v11 = vadd.f32 %v777_v55, %v5316_v24  ;;  %v826_v0 = vpop.f32.mrf.mxu3  ;;  %v995_v10 = vpack.c.bf16 %v965_v56, %v963_v53  ;;  %v4019_v55 = vor.u32 %v4631_v52, %v4016_v30  ;;  %v4007_v52 = vor.u32 %v4630_v63, %v4006_v4  ;;  %v4629_v4 = vld [vmem:[#allocation5 + $0x264] sm:$0xf] }
 0x147   : > { %v878_v16 = vpop.f32.mrf.mxu0 }
 0x148   : > { %v827_v37 = vadd.f32 %v826_v0, %v778_v11  ;;  %v927_v35 = vpop.f32.mrf.mxu1  ;;  %1229 = vmatmul.bf16.vlgmr.msrb.gmra.mxu3 %v995_v10  ;;  %1327 = vmatmul.bf16.vlgmr.msra.gmra.mxu1 %v995_v10  ;;  %v879_v58 = vadd.f32 %v878_v16, %v5312_v34  ;;  %v4647_v0 = vld [vmem:[#allocation5 + $0x2f4] sm:$0xf]  ;;  %v4080_v16 = vld [vmem:[#allocation5 + $0x2f8] sm:$0xf0] }
 0x149   : > { %1772 = vmatpush.bf16.msrb.mxu0 %v4019_v55  ;;  %1675 = vmatpush.bf16.msra.mxu2 %v4007_v52 }
 0x14a   : > { %v964_v48 = vmax.f32 %v827_v37, 0.0  ;;  %v928_v54 = vadd.f32 %v927_v35, %v879_v58  ;;  %v4083_v37 = vor.u32 %v4647_v0, %v4080_v16 }
 0x14c   : > { %v994_v14 = vpack.c.bf16 %v964_v48, %v962_v61  ;;  %v967_v61 = vmax.f32 %v928_v54, 0.0  ;;  %1821 = vmatpush.bf16.msrb.mxu1 %v4083_v37  ;;  %v4070_v54 = vld [vmem:[#allocation5 + $0x2e0] sm:$0xf] }
 0x14d   : > { %v780_v5 = vpop.f32.mrf.mxu2 }
 0x14e   : > { %v829_v56 = vpop.f32.mrf.mxu3  ;;  %1180 = vmatmul.bf16.vlgmr.msrb.gmra.mxu2 %v994_v14  ;;  %1278 = vmatmul.bf16.vlgmr.msra.gmra.mxu0 %v994_v14  ;;  %v781_v2 = vadd.f32 %v780_v5, %v5316_v24 }
 0x14f   : > { %v880_v11 = vpop.f32.mrf.mxu0 }
 0x150   : > { %v881_v10 = vadd.f32 %v880_v11, %v5312_v34  ;;  %v929_v53 = vpop.f32.mrf.mxu1  ;;  %v830_v14 = vadd.f32 %v829_v56, %v781_v2  ;;  %v4008_v56 = vld [vmem:[#allocation5 + $0x268] sm:$0xf0] }
 0x151   : > { %v4011_v63 = vor.u32 %v4629_v4, %v4008_v56 }
 0x152   : > { %v930_v59 = vadd.f32 %v929_v53, %v881_v10  ;;  %v966_v10 = vmax.f32 %v830_v14, 0.0 }
 0x153   : > { %1773 = vmatpush.bf16.msrb.mxu0 %v4011_v63 }
 0x154   : > { %v969_v48 = vmax.f32 %v930_v59, 0.0  ;;  %v4646_v59 = vld [vmem:[#allocation5 + $0x2e4] sm:$0xf0] }
 0x155   : > { %v782_v36 = vpop.f32.mrf.mxu2  ;;  %v4071_v0 = vor.u32 %v4646_v59, %v4070_v54  ;;  %v3998_v54 = vld [vmem:[#allocation5 + $0x250] sm:$0xf]  ;;  %v4628_v59 = vld [vmem:[#allocation5 + $0x254] sm:$0xf0] }
 0x156   : > { %v783_v30 = vadd.f32 %v782_v36, %v5316_v24  ;;  %v831_v35 = vpop.f32.mrf.mxu3  ;;  %v997_v58 = vpack.c.bf16 %v969_v48, %v967_v61  ;;  %v3999_v4 = vor.u32 %v4628_v59, %v3998_v54  ;;  %v4627_v54 = vld [vmem:[#allocation5 + $0x254] sm:$0xf] }
 0x157   : > { %v883_v55 = vpop.f32.mrf.mxu0  ;;  %1724 = vmatpush.bf16.msra.mxu3 %v4071_v0 }
 0x158   : > { %v832_v11 = vadd.f32 %v831_v35, %v783_v30  ;;  %v932_v5 = vpop.f32.mrf.mxu1  ;;  %1234 = vmatmul.bf16.gmra.mxu3 %v997_v58  ;;  %1332 = vmatmul.bf16.gmra.mxu1 %v997_v58  ;;  %v884_v16 = vadd.f32 %v883_v55, %v5312_v34  ;;  %v4645_v58 = vld [vmem:[#allocation5 + $0x2e4] sm:$0xf]  ;;  %v4072_v55 = vld [vmem:[#allocation5 + $0x2e8] sm:$0xf0] }
 0x159   : > { %1676 = vmatpush.bf16.msra.mxu2 %v3999_v4 }
 0x15a   : > { %v968_v53 = vmax.f32 %v832_v11, 0.0  ;;  %v933_v36 = vadd.f32 %v932_v5, %v884_v16  ;;  %v4075_v11 = vor.u32 %v4645_v58, %v4072_v55 }
 0x15c   : > { %v996_v37 = vpack.c.bf16 %v968_v53, %v966_v10  ;;  %v971_v10 = vmax.f32 %v933_v36, 0.0  ;;  %1822 = vmatpush.bf16.msrb.mxu1 %v4075_v11  ;;  %v4062_v36 = vld [vmem:[#allocation5 + $0x2d0] sm:$0xf] }
 0x15d   : > { %v785_v2 = vpop.f32.mrf.mxu2 }
 0x15e   : > { %v834_v61 = vpop.f32.mrf.mxu3  ;;  %1185 = vmatmul.bf16.gmra.mxu2 %v996_v37  ;;  %1283 = vmatmul.bf16.gmra.mxu0 %v996_v37  ;;  %v786_v30 = vadd.f32 %v785_v2, %v5316_v24 }
 0x15f   : > { %v885_v48 = vpop.f32.mrf.mxu0 }
 0x160   : > { %v886_v52 = vadd.f32 %v885_v48, %v5312_v34  ;;  %v934_v14 = vpop.f32.mrf.mxu1  ;;  %v835_v37 = vadd.f32 %v834_v61, %v786_v30  ;;  %v4000_v61 = vld [vmem:[#allocation5 + $0x258] sm:$0xf0] }
 0x161   : > { %v4003_v59 = vor.u32 %v4627_v54, %v4000_v61 }
 0x162   : > { %v935_v35 = vadd.f32 %v934_v14, %v886_v52  ;;  %v970_v52 = vmax.f32 %v835_v37, 0.0 }
 0x163   : > { %1774 = vmatpush.bf16.msrb.mxu0 %v4003_v59 }
 0x164   : > { %v973_v53 = vmax.f32 %v935_v35, 0.0  ;;  %v4644_v35 = vld [vmem:[#allocation5 + $0x2d4] sm:$0xf0] }
 0x165   : > { %v787_v0 = vpop.f32.mrf.mxu2  ;;  %v4063_v58 = vor.u32 %v4644_v35, %v4062_v36  ;;  %v3990_v36 = vld [vmem:[#allocation5 + $0x240] sm:$0xf]  ;;  %v4626_v35 = vld [vmem:[#allocation5 + $0x244] sm:$0xf0] }
 0x166   : > { %v788_v56 = vadd.f32 %v787_v0, %v5316_v24  ;;  %v836_v5 = vpop.f32.mrf.mxu3  ;;  %v999_v16 = vpack.c.bf16 %v973_v53, %v971_v10  ;;  %v3991_v54 = vor.u32 %v4626_v35, %v3990_v36  ;;  %v4625_v36 = vld [vmem:[#allocation5 + $0x244] sm:$0xf] }
 0x167   : > { %v888_v63 = vpop.f32.mrf.mxu0  ;;  %1725 = vmatpush.bf16.msra.mxu3 %v4063_v58 }
 0x168   : > { %v837_v48 = vadd.f32 %v836_v5, %v788_v56  ;;  %v937_v2 = vpop.f32.mrf.mxu1  ;;  %1239 = vmatmul.bf16.gmra.mxu3 %v999_v16  ;;  %1337 = vmatmul.bf16.gmra.mxu1 %v999_v16  ;;  %v889_v55 = vadd.f32 %v888_v63, %v5312_v34  ;;  %v4643_v16 = vld [vmem:[#allocation5 + $0x2d4] sm:$0xf]  ;;  %v4064_v63 = vld [vmem:[#allocation5 + $0x2d8] sm:$0xf0] }
 0x169   : > { %1677 = vmatpush.bf16.msra.mxu2 %v3991_v54 }
 0x16a   : > { %v972_v14 = vmax.f32 %v837_v48, 0.0  ;;  %v938_v0 = vadd.f32 %v937_v2, %v889_v55  ;;  %v4067_v48 = vor.u32 %v4643_v16, %v4064_v63 }
 0x16c   : > { %v998_v11 = vpack.c.bf16 %v972_v14, %v970_v52  ;;  %v975_v52 = vmax.f32 %v938_v0, 0.0  ;;  %1823 = vmatpush.bf16.msrb.mxu1 %v4067_v48  ;;  %v4054_v0 = vld [vmem:[#allocation5 + $0x2c0] sm:$0xf] }
 0x16d   : > { %v790_v30 = vpop.f32.mrf.mxu2 }
 0x16e   : > { %v839_v10 = vpop.f32.mrf.mxu3  ;;  %1190 = vmatmul.bf16.gmra.mxu2 %v998_v11  ;;  %1288 = vmatmul.bf16.gmra.mxu0 %v998_v11  ;;  %v791_v56 = vadd.f32 %v790_v30, %v5316_v24 }
 0x16f   : > { %v890_v53 = vpop.f32.mrf.mxu0 }
 0x170   : > { %v891_v4 = vadd.f32 %v890_v53, %v5312_v34  ;;  %v939_v37 = vpop.f32.mrf.mxu1  ;;  %v840_v11 = vadd.f32 %v839_v10, %v791_v56  ;;  %v3992_v10 = vld [vmem:[#allocation5 + $0x248] sm:$0xf0] }
 0x171   : > { %v3995_v35 = vor.u32 %v4625_v36, %v3992_v10 }
 0x172   : > { %v940_v5 = vadd.f32 %v939_v37, %v891_v4  ;;  %v974_v4 = vmax.f32 %v840_v11, 0.0 }
 0x173   : > { %1775 = vmatpush.bf16.msrb.mxu0 %v3995_v35 }
 0x174   : > { %v977_v14 = vmax.f32 %v940_v5, 0.0  ;;  %v4642_v5 = vld [vmem:[#allocation5 + $0x2c4] sm:$0xf0] }
 0x175   : > { %v792_v58 = vpop.f32.mrf.mxu2  ;;  %v4055_v16 = vor.u32 %v4642_v5, %v4054_v0  ;;  %v3982_v0 = vld [vmem:[#allocation5 + $0x230] sm:$0xf]  ;;  %v4624_v5 = vld [vmem:[#allocation5 + $0x234] sm:$0xf0] }
 0x176   : > { %v793_v61 = vadd.f32 %v792_v58, %v5316_v24  ;;  %v841_v2 = vpop.f32.mrf.mxu3  ;;  %v1001_v55 = vpack.c.bf16 %v977_v14, %v975_v52  ;;  %v3983_v36 = vor.u32 %v4624_v5, %v3982_v0  ;;  %v4623_v0 = vld [vmem:[#allocation5 + $0x234] sm:$0xf] }
 0x177   : > { %v893_v59 = vpop.f32.mrf.mxu0  ;;  %1726 = vmatpush.bf16.msra.mxu3 %v4055_v16 }
 0x178   : > { %v842_v53 = vadd.f32 %v841_v2, %v793_v61  ;;  %v942_v30 = vpop.f32.mrf.mxu1  ;;  %1244 = vmatmul.bf16.gmra.mxu3 %v1001_v55  ;;  %1342 = vmatmul.bf16.gmra.mxu1 %v1001_v55  ;;  %v894_v63 = vadd.f32 %v893_v59, %v5312_v34  ;;  %v4641_v55 = vld [vmem:[#allocation5 + $0x2c4] sm:$0xf]  ;;  %v4056_v59 = vld [vmem:[#allocation5 + $0x2c8] sm:$0xf0] }
 0x179   : > { %1678 = vmatpush.bf16.msra.mxu2 %v3983_v36 }
 0x17a   : > { %v976_v37 = vmax.f32 %v842_v53, 0.0  ;;  %v943_v58 = vadd.f32 %v942_v30, %v894_v63  ;;  %v4059_v53 = vor.u32 %v4641_v55, %v4056_v59 }
 0x17c   : > { %v1000_v48 = vpack.c.bf16 %v976_v37, %v974_v4  ;;  %v979_v4 = vmax.f32 %v943_v58, 0.0  ;;  %1824 = vmatpush.bf16.msrb.mxu1 %v4059_v53  ;;  %v4046_v58 = vld [vmem:[#allocation5 + $0x2b0] sm:$0xf] }
 0x17d   : > { %v795_v56 = vpop.f32.mrf.mxu2 }
 0x17e   : > { %v844_v52 = vpop.f32.mrf.mxu3  ;;  %1195 = vmatmul.bf16.gmra.mxu2 %v1000_v48  ;;  %1293 = vmatmul.bf16.gmra.mxu0 %v1000_v48  ;;  %v796_v61 = vadd.f32 %v795_v56, %v5316_v24 }
 0x17f   : > { %v895_v14 = vpop.f32.mrf.mxu0 }
 0x180   : > { %v896_v54 = vadd.f32 %v895_v14, %v5312_v34  ;;  %v944_v11 = vpop.f32.mrf.mxu1  ;;  %v845_v48 = vadd.f32 %v844_v52, %v796_v61  ;;  %v3984_v52 = vld [vmem:[#allocation5 + $0x238] sm:$0xf0] }
 0x181   : > { %v3987_v5 = vor.u32 %v4623_v0, %v3984_v52 }
 0x182   : > { %v945_v2 = vadd.f32 %v944_v11, %v896_v54  ;;  %v978_v54 = vmax.f32 %v845_v48, 0.0 }
 0x183   : > { %1776 = vmatpush.bf16.msrb.mxu0 %v3987_v5 }
 0x184   : > { %v981_v37 = vmax.f32 %v945_v2, 0.0  ;;  %v4640_v2 = vld [vmem:[#allocation5 + $0x2b4] sm:$0xf0] }
 0x185   : > { %v797_v16 = vpop.f32.mrf.mxu2  ;;  %v4047_v55 = vor.u32 %v4640_v2, %v4046_v58  ;;  %v3974_v58 = vld [vmem:[#allocation5 + $0x220] sm:$0xf]  ;;  %v4622_v2 = vld [vmem:[#allocation5 + $0x224] sm:$0xf0] }
 0x186   : > { %v798_v10 = vadd.f32 %v797_v16, %v5316_v24  ;;  %v846_v30 = vpop.f32.mrf.mxu3  ;;  %v1003_v63 = vpack.c.bf16 %v981_v37, %v979_v4  ;;  %v3975_v0 = vor.u32 %v4622_v2, %v3974_v58  ;;  %v4040_v2 = vld [vmem:[#allocation5 + $0x2a8] sm:$0xf0] }
 0x187   : > { %v898_v35 = vpop.f32.mrf.mxu0  ;;  %1727 = vmatpush.bf16.msra.mxu3 %v4047_v55 }
 0x188   : > { %v847_v14 = vadd.f32 %v846_v30, %v798_v10  ;;  %v947_v56 = vpop.f32.mrf.mxu1  ;;  %1249 = vmatmul.bf16.gmra.mxu3 %v1003_v63  ;;  %1347 = vmatmul.bf16.gmra.mxu1 %v1003_v63  ;;  %v899_v59 = vadd.f32 %v898_v35, %v5312_v34  ;;  %v4639_v63 = vld [vmem:[#allocation5 + $0x2b4] sm:$0xf]  ;;  %v4048_v35 = vld [vmem:[#allocation5 + $0x2b8] sm:$0xf0] }
 0x189   : > { %1679 = vmatpush.bf16.msra.mxu2 %v3975_v0 }
 0x18a   : > { %v980_v11 = vmax.f32 %v847_v14, 0.0  ;;  %v948_v16 = vadd.f32 %v947_v56, %v899_v59  ;;  %v4051_v14 = vor.u32 %v4639_v63, %v4048_v35  ;;  %v4621_v35 = vld [vmem:[#allocation5 + $0x224] sm:$0xf] }
 0x18c   : > { %v1002_v53 = vpack.c.bf16 %v980_v11, %v978_v54  ;;  %v983_v54 = vmax.f32 %v948_v16, 0.0  ;;  %1825 = vmatpush.bf16.msrb.mxu1 %v4051_v14  ;;  %v4038_v16 = vld [vmem:[#allocation5 + $0x2a0] sm:$0xf] }
 0x18d   : > { %v800_v61 = vpop.f32.mrf.mxu2 }
 0x18e   : > { %v849_v4 = vpop.f32.mrf.mxu3  ;;  %1200 = vmatmul.bf16.gmra.mxu2 %v1002_v53  ;;  %1298 = vmatmul.bf16.gmra.mxu0 %v1002_v53  ;;  %v801_v10 = vadd.f32 %v800_v61, %v5316_v24 }
 0x18f   : > { %v900_v37 = vpop.f32.mrf.mxu0 }
 0x190   : > { %v901_v36 = vadd.f32 %v900_v37, %v5312_v34  ;;  %v949_v48 = vpop.f32.mrf.mxu1  ;;  %v850_v53 = vadd.f32 %v849_v4, %v801_v10  ;;  %v3979_v10 = vor.u32 %v4621_v35, %v3976_v45  ;;  %v4636_v35 = vld [vmem:[#allocation5 + $0x294] sm:$0xf0] }
 0x192   : > { %v950_v30 = vadd.f32 %v949_v48, %v901_v36  ;;  %v982_v36 = vmax.f32 %v850_v53, 0.0  ;;  %1777 = vmatpush.bf16.msrb.mxu0 %v3979_v10 }
 0x194   : > { %v985_v11 = vmax.f32 %v950_v30, 0.0  ;;  %v4638_v30 = vld [vmem:[#allocation5 + $0x2a4] sm:$0xf0] }
 0x195   : > { %v802_v55 = vpop.f32.mrf.mxu2  ;;  %v4039_v63 = vor.u32 %v4638_v30, %v4038_v16 }
 0x196   : > { %v803_v52 = vadd.f32 %v802_v55, %v5316_v24  ;;  %v851_v56 = vpop.f32.mrf.mxu3  ;;  %v1005_v59 = vpack.c.bf16 %v985_v11, %v983_v54  ;;  %v4637_v11 = vld [vmem:[#allocation5 + $0x2a4] sm:$0xf]  ;;  %v3966_v55 = vld [vmem:[#allocation5 + $0x210] sm:$0xf] }
 0x197   : > { %v903_v5 = vpop.f32.mrf.mxu0  ;;  %1728 = vmatpush.bf16.msra.mxu3 %v4039_v63  ;;  %v4043_v53 = vor.u32 %v4637_v11, %v4040_v2  ;;  %v4030_v63 = vld [vmem:[#allocation5 + $0x290] sm:$0xf] }
 0x198   : > { %v852_v37 = vadd.f32 %v851_v56, %v803_v52  ;;  %v952_v61 = vpop.f32.mrf.mxu1  ;;  %1254 = vmatmul.bf16.gmra.mxu3 %v1005_v59  ;;  %1352 = vmatmul.bf16.gmra.mxu1 %v1005_v59  ;;  %v904_v14 = vadd.f32 %v903_v5, %v5312_v34  ;;  %v4620_v52 = vld [vmem:[#allocation5 + $0x214] sm:$0xf0] }
 0x199   : > { %v3967_v16 = vor.u32 %v4620_v52, %v3966_v55  ;;  %1826 = vmatpush.bf16.msrb.mxu1 %v4043_v53 }
 0x19a   : > { %v984_v48 = vmax.f32 %v852_v37, 0.0  ;;  %v953_v56 = vadd.f32 %v952_v61, %v904_v14  ;;  %v4031_v61 = vor.u32 %v4636_v35, %v4030_v63  ;;  %v4635_v35 = vld [vmem:[#allocation5 + $0x294] sm:$0xf] }
 0x19b   : > { %1680 = vmatpush.bf16.msra.mxu2 %v3967_v16 }
 0x19c   : > { %v1004_v4 = vpack.c.bf16 %v984_v48, %v982_v36  ;;  %v987_v36 = vmax.f32 %v953_v56, 0.0  ;;  %1729 = vmatpush.bf16.msra.mxu3 %v4031_v61 }
 0x19d   : > { %v805_v58 = vpop.f32.mrf.mxu2 }
 0x19e   : > { %v854_v54 = vpop.f32.mrf.mxu3  ;;  %1205 = vmatmul.bf16.gmra.mxu2 %v1004_v4  ;;  %1303 = vmatmul.bf16.gmra.mxu0 %v1004_v4  ;;  %v806_v45 = vadd.f32 %v805_v58, %v5316_v24 }
 0x19f   : > { %v905_v0 = vpop.f32.mrf.mxu0 }
 0x1a0   : > { %v906_v59 = vadd.f32 %v905_v0, %v5312_v34  ;;  %v954_v37 = vpop.f32.mrf.mxu1  ;;  %v855_v4 = vadd.f32 %v854_v54, %v806_v45 }
 0x1a2   : > { %v955_v5 = vadd.f32 %v954_v37, %v906_v59  ;;  %v986_v58 = vmax.f32 %v855_v4, 0.0  ;;  %v4032_v4 = vld [vmem:[#allocation5 + $0x298] sm:$0xf0] }
 0x1a4   : > { %v989_v48 = vmax.f32 %v955_v5, 0.0 }
 0x1a5   : > { %v807_v30 = vpop.f32.mrf.mxu2 }
 0x1a6   : > { %v808_v10 = vadd.f32 %v807_v30, %v5316_v24  ;;  %v856_v11 = vpop.f32.mrf.mxu3  ;;  %v1007_v2 = vpack.c.bf16 %v989_v48, %v987_v36  ;;  %v4619_v48 = vld [vmem:[#allocation5 + $0x214] sm:$0xf]  ;;  %v3968_v30 = vld [vmem:[#allocation5 + $0x218] sm:$0xf0] }
 0x1a7   : > { %v908_v14 = vpop.f32.mrf.mxu0  ;;  %v3971_v63 = vor.u32 %v4619_v48, %v3968_v30  ;;  %v3958_v48 = vld [vmem:[#allocation5 + $0x200] sm:$0xf]  ;;  %v4618_v30 = vld [vmem:[#allocation5 + $0x204] sm:$0xf0] }
 0x1a8   : > { %v857_v0 = vadd.f32 %v856_v11, %v808_v10  ;;  %v957_v44 = vpop.f32.mrf.mxu1  ;;  %1259 = vmatmul.bf16.gmra.mxu3 %v1007_v2  ;;  %1357 = vmatmul.bf16.gmra.mxu1 %v1007_v2  ;;  %v909_v53 = vadd.f32 %v908_v14, %v5312_v34  ;;  %v4035_v2 = vor.u32 %v4635_v35, %v4032_v4  ;;  %v5352_v4 = vld [vmem:[%s6010_s3 + $0x8] sm:$0x7f] }
 0x1a9   : > { %1778 = vmatpush.bf16.msrb.mxu0 %v3971_v63 }
 0x1aa   : > { %v988_v55 = vmax.f32 %v857_v0, 0.0  ;;  %v958_v37 = vadd.f32 %v957_v44, %v909_v53  ;;  %1827 = vmatpush.bf16.msrb.mxu1 %v4035_v2  ;;  %v4634_v53 = vld [vmem:[#allocation5 + $0x284] sm:$0xf0] }
 0x1ac   : > { %v1006_v52 = vpack.c.bf16 %v988_v55, %v986_v58  ;;  %v991_v10 = vmax.f32 %v958_v37, 0.0  ;;  %v4022_v55 = vld [vmem:[#allocation5 + $0x280] sm:$0xf]  ;;  %v4024_v37 = vld [vmem:[#allocation5 + $0x288] sm:$0xf0] }
 0x1ad   : > { %v810_v56 = vpop.f32.mrf.mxu2 }
 0x1ae   : > { %v859_v59 = vpop.f32.mrf.mxu3  ;;  %1210 = vmatmul.bf16.gmra.mxu2 %v1006_v52  ;;  %1308 = vmatmul.bf16.gmra.mxu0 %v1006_v52  ;;  %v811_v5 = vadd.f32 %v810_v56, %v5316_v24  ;;  %v4633_v52 = vld [vmem:[#allocation5 + $0x284] sm:$0xf] }
 0x1af   : > { %v910_v54 = vpop.f32.mrf.mxu0 }
 0x1b0   : > { %v911_v16 = vadd.f32 %v910_v54, %v5312_v34  ;;  %v959_v45 = vpop.f32.mrf.mxu1  ;;  %v860_v14 = vadd.f32 %v859_v59, %v811_v5  ;;  %v3959_v59 = vor.u32 %v4618_v30, %v3958_v48  ;;  %v3960_v5 = vld [vmem:[#allocation5 + $0x208] sm:$0xf0]  ;;  %v4142_v48 = vld [vmem:[#allocation5 + $0x370] sm:$0xf]  ;;  %v4664_v30 = vld [vmem:[#allocation5 + $0x374] sm:$0xf0] }
 0x1b2   : > { %v960_v36 = vadd.f32 %v959_v45, %v911_v16  ;;  %v990_v56 = vmax.f32 %v860_v14, 0.0  ;;  %v4023_v16 = vor.u32 %v4634_v53, %v4022_v55  ;;  %v4027_v45 = vor.u32 %v4633_v52, %v4024_v37  ;;  %1681 = vmatpush.bf16.msra.mxu2 %v3959_v59 }
 0x1b4   : > { %v993_v11 = vmax.f32 %v960_v36, 0.0  ;;  %1730 = vmatpush.bf16.msra.mxu3 %v4023_v16  ;;  %1828 = vmatpush.bf16.msrb.mxu1 %v4027_v45 }
 0x1b5   : > { %v812_v61 = vpop.f32.mrf.mxu2 }
 0x1b6   : > { %v813_v0 = vadd.f32 %v812_v61, %v5316_v24  ;;  %v1009_v44 = vpack.c.bf16 %v993_v11, %v991_v10  ;;  %v861_v34 = vpop.f32.mrf.mxu3  ;;  %v4617_v24 = vld [vmem:[#allocation5 + $0x204] sm:$0xf]  ;;  %v5355_v10 = vperm.slane %v5352_v4, 2 }
 0x1b7   : > { %v3963_v63 = vor.u32 %v4617_v24, %v3960_v5  ;;  %v4143_v24 = vor.u32 %v4664_v30, %v4142_v48 }
 0x1b8   : > { %v862_v58 = vadd.f32 %v861_v34, %v813_v0  ;;  %1264 = vmatmul.bf16.gmra.mxu3 %v1009_v44  ;;  %1362 = vmatmul.bf16.gmra.mxu1 %v1009_v44  ;;  %v5361_v0 = vld [vmem:[%s6010_s3] sm:$0x7f] }
 0x1b9   : > { %1779 = vmatpush.bf16.msrb.mxu0 %v3963_v63  ;;  %v5364_v44 = vperm.slane %v5361_v0, 2  ;;  %2080 = vmatpush.bf16.msrb.mxu2 %v4143_v24 }
 0x1ba   : > { %v992_v54 = vmax.f32 %v862_v58, 0.0 }
 0x1bc   : > { %v1008_v36 = vpack.c.bf16 %v992_v54, %v990_v56 }
 0x1be   : > { %1215 = vmatmul.bf16.gmra.mxu2 %v1008_v36  ;;  %1313 = vmatmul.bf16.gmra.mxu0 %v1008_v36 }
 0x1c5   : > { %v1328_v35 = vpop.f32.mrf.mxu1 }
 0x1cb   : > { %v1230_v11 = vpop.f32.mrf.mxu3  ;;  %v1279_v2 = vpop.f32.mrf.mxu0 }
 0x1cc   : > { %v1280_v14 = vadd.f32 %v1279_v2, %v5355_v10 }
 0x1cd   : > { %v1330_v61 = vpop.f32.mrf.mxu1 }
 0x1ce   : > { %v1329_v58 = vadd.f32 %v1328_v35, %v1280_v14 }
 0x1d0   : > { %v1369_v16 = vmax.f32 %v1329_v58, 0.0 }
 0x1d1   : > { %v1181_v34 = vpop.f32.mrf.mxu2 }
 0x1d2   : > { %v1182_v52 = vadd.f32 %v1181_v34, %v5364_v44  ;;  %v5370_v5 = vadd.f32 %v1369_v16, %v493_v20  ;;  %v4206_v20 = vld [vmem:[#allocation5 + $0x3f0] sm:$0xf] }
 0x1d3   : > { %v1232_v55 = vpop.f32.mrf.mxu3  ;;  %v1281_v53 = vpop.f32.mrf.mxu0 }
 0x1d4   : > { %v1282_v56 = vadd.f32 %v1281_v53, %v5355_v10  ;;  %v1231_v45 = vadd.f32 %v1230_v11, %v1182_v52 }
 0x1d5   : > { %v1333_v54 = vpop.f32.mrf.mxu1 }
 0x1d6   : > { %v1331_v37 = vadd.f32 %v1330_v61, %v1282_v56  ;;  %v1368_v61 = vmax.f32 %v1231_v45, 0.0  ;;  %v4663_v45 = vld [vmem:[#allocation5 + $0x374] sm:$0xf] }
 0x1d8   : > { %v1371_v36 = vmax.f32 %v1331_v37, 0.0  ;;  %v5382_v52 = vadd.f32 %v1368_v61, %v492_v18  ;;  %v4679_v61 = vld [vmem:[#allocation5 + $0x3f4] sm:$0xf] }
 0x1d9   : > { %v1183_v59 = vpop.f32.mrf.mxu2 }
 0x1da   : > { %v5374_v63 = vadd.f32 %v1371_v36, %v495_v21  ;;  %v1184_v35 = vadd.f32 %v1183_v59, %v5364_v44  ;;  %v4207_v21 = vor.u32 %v4680_v17, %v4206_v20  ;;  %v4144_v36 = vld [vmem:[#allocation5 + $0x378] sm:$0xf0] }
 0x1db   : > { %v1235_v2 = vpop.f32.mrf.mxu3  ;;  %v1284_v14 = vpop.f32.mrf.mxu0  ;;  %v4147_v59 = vor.u32 %v4663_v45, %v4144_v36 }
 0x1dc   : > { %v1497_v11 = vpack.c.bf16 %v5374_v63, %v5370_v5  ;;  %v1233_v34 = vadd.f32 %v1232_v55, %v1184_v35  ;;  %v1285_v13 = vadd.f32 %v1284_v14, %v5355_v10  ;;  %2129 = vmatpush.bf16.msrb.mxu3 %v4207_v21 }
 0x1dd   : > { %v1335_v58 = vpop.f32.mrf.mxu1  ;;  %2178 = vmatpush.bf16.msra.mxu0 %v4147_v59  ;;  %v6042_v59 = vmax.f32 %v5144_v38, 0.0 }
 0x1de   : > { %v1370_v53 = vmax.f32 %v1233_v34, 0.0  ;;  %1731 = vmatmul.bf16.vlgmr.msra.gmra.mxu3 %v1497_v11  ;;  %1829 = vmatmul.bf16.vlgmr.msrb.gmra.mxu1 %v1497_v11  ;;  %v1334_v37 = vadd.f32 %v1333_v54, %v1285_v13  ;;  %v4208_v11 = vld [vmem:[#allocation5 + $0x3f8] sm:$0xf0]  ;;  %v4662_v13 = vld [vmem:[#allocation5 + $0x364] sm:$0xf0] }
 0x1df   : > { %v4211_v34 = vor.u32 %v4679_v61, %v4208_v11  ;;  %v4136_v61 = vld [vmem:[#allocation5 + $0x368] sm:$0xf0] }
 0x1e0   : > { %v5386_v56 = vadd.f32 %v1370_v53, %v494_v19  ;;  %v1373_v18 = vmax.f32 %v1334_v37, 0.0  ;;  %v4134_v53 = vld [vmem:[#allocation5 + $0x360] sm:$0xf] }
 0x1e1   : > { %v1186_v16 = vpop.f32.mrf.mxu2  ;;  %2227 = vmatpush.bf16.msra.mxu1 %v4211_v34 }
 0x1e2   : > { %v1496_v55 = vpack.c.bf16 %v5386_v56, %v5382_v52  ;;  %v1187_v24 = vadd.f32 %v1186_v16, %v5364_v44  ;;  %v5394_v20 = vadd.f32 %v1373_v18, %v497_v46  ;;  %v4135_v16 = vor.u32 %v4662_v13, %v4134_v53 }
 0x1e3   : > { %v1237_v48 = vpop.f32.mrf.mxu3  ;;  %v1286_v30 = vpop.f32.mrf.mxu0 }
 0x1e4   : > { %v1287_v12 = vadd.f32 %v1286_v30, %v5355_v10  ;;  %1682 = vmatmul.bf16.vlgmr.msra.gmra.mxu2 %v1496_v55  ;;  %1780 = vmatmul.bf16.vlgmr.msrb.gmra.mxu0 %v1496_v55  ;;  %v1236_v35 = vadd.f32 %v1235_v2, %v1187_v24  ;;  %v4198_v30 = vld [vmem:[#allocation5 + $0x3e0] sm:$0xf] }
 0x1e5   : > { %v1338_v15 = vpop.f32.mrf.mxu1  ;;  %2081 = vmatpush.bf16.msrb.mxu2 %v4135_v16 }
 0x1e6   : > { %v1336_v19 = vadd.f32 %v1335_v58, %v1287_v12  ;;  %v1372_v55 = vmax.f32 %v1236_v35, 0.0  ;;  %v6043_v12 = vmax.f32 %v5150_v41, 0.0 }
 0x1e8   : > { %v1375_v14 = vmax.f32 %v1336_v19, 0.0  ;;  %v5406_v24 = vadd.f32 %v1372_v55, %v6042_v59  ;;  %v4200_v55 = vld [vmem:[#allocation5 + $0x3e8] sm:$0xf0]  ;;  %v6045_v59 = vmax.f32 %v5177_v9, 0.0  ;;  %v4676_v9 = vld [vmem:[#allocation5 + $0x3d4] sm:$0xf0] }
 0x1e9   : > { %v1188_v54 = vpop.f32.mrf.mxu2 }
 0x1ea   : > { %v1189_v17 = vadd.f32 %v1188_v54, %v5364_v44  ;;  %v5399_v21 = vadd.f32 %v1375_v14, %v499_v47  ;;  %v4199_v47 = vor.u32 %v4678_v43, %v4198_v30  ;;  %v4661_v14 = vld [vmem:[#allocation5 + $0x364] sm:$0xf]  ;;  %v6044_v30 = vmax.f32 %v5171_v3, 0.0 }
 0x1eb   : > { %v1240_v58 = vpop.f32.mrf.mxu3  ;;  %v1289_v2 = vpop.f32.mrf.mxu0  ;;  %v4139_v34 = vor.u32 %v4661_v14, %v4136_v61 }
 0x1ec   : > { %v1238_v37 = vadd.f32 %v1237_v48, %v1189_v17  ;;  %v1499_v45 = vpack.c.bf16 %v5399_v21, %v5394_v20  ;;  %v1290_v46 = vadd.f32 %v1289_v2, %v5355_v10  ;;  %2130 = vmatpush.bf16.msrb.mxu3 %v4199_v47  ;;  %v4677_v2 = vld [vmem:[#allocation5 + $0x3e4] sm:$0xf] }
 0x1ed   : > { %v1340_v36 = vpop.f32.mrf.mxu1  ;;  %2179 = vmatpush.bf16.msra.mxu0 %v4139_v34  ;;  %v4190_v34 = vld [vmem:[#allocation5 + $0x3d0] sm:$0xf] }
 0x1ee   : > { %v1374_v39 = vmax.f32 %v1238_v37, 0.0  ;;  %1736 = vmatmul.bf16.gmra.mxu3 %v1499_v45  ;;  %1834 = vmatmul.bf16.gmra.mxu1 %v1499_v45  ;;  %v1339_v19 = vadd.f32 %v1338_v15, %v1290_v46  ;;  %v4203_v45 = vor.u32 %v4677_v2, %v4200_v55  ;;  %v4660_v46 = vld [vmem:[#allocation5 + $0x354] sm:$0xf0]  ;;  %v4659_v55 = vld [vmem:[#allocation5 + $0x354] sm:$0xf] }
 0x1f0   : > { %v5410_v48 = vadd.f32 %v1374_v39, %v6043_v12  ;;  %v1377_v13 = vmax.f32 %v1339_v19, 0.0  ;;  %v4126_v39 = vld [vmem:[#allocation5 + $0x350] sm:$0xf]  ;;  %2228 = vmatpush.bf16.msra.mxu1 %v4203_v45 }
 0x1f1   : > { %v1191_v18 = vpop.f32.mrf.mxu2 }
 0x1f2   : > { %v1498_v35 = vpack.c.bf16 %v5410_v48, %v5406_v24  ;;  %v1192_v53 = vadd.f32 %v1191_v18, %v5364_v44  ;;  %v5418_v43 = vadd.f32 %v1377_v13, %v6044_v30  ;;  %v4127_v18 = vor.u32 %v4660_v46, %v4126_v39 }
 0x1f3   : > { %v1242_v11 = vpop.f32.mrf.mxu3  ;;  %v1291_v54 = vpop.f32.mrf.mxu0 }
 0x1f4   : > { %v1292_v38 = vadd.f32 %v1291_v54, %v5355_v10  ;;  %1687 = vmatmul.bf16.gmra.mxu2 %v1498_v35  ;;  %1785 = vmatmul.bf16.gmra.mxu0 %v1498_v35  ;;  %v1241_v16 = vadd.f32 %v1240_v58, %v1192_v53  ;;  %v4191_v53 = vor.u32 %v4676_v9, %v4190_v34  ;;  %v6048_v34 = vmax.f32 %v5195_v42, 0.0 }
 0x1f5   : > { %v1343_v41 = vpop.f32.mrf.mxu1  ;;  %2082 = vmatpush.bf16.msrb.mxu2 %v4127_v18 }
 0x1f6   : > { %v1341_v17 = vadd.f32 %v1340_v36, %v1292_v38  ;;  %v1376_v19 = vmax.f32 %v1241_v16, 0.0  ;;  %v6046_v38 = vmax.f32 %v5168_v1, 0.0  ;;  %2131 = vmatpush.bf16.msrb.mxu3 %v4191_v53 }
 0x1f8   : > { %v1379_v15 = vmax.f32 %v1341_v17, 0.0  ;;  %v5430_v13 = vadd.f32 %v1376_v19, %v6046_v38  ;;  %v6047_v17 = vmax.f32 %v5174_v7, 0.0  ;;  %v4192_v19 = vld [vmem:[#allocation5 + $0x3d8] sm:$0xf0]  ;;  %v6049_v38 = vmax.f32 %v5201_v51, 0.0 }
 0x1f9   : > { %v1193_v37 = vpop.f32.mrf.mxu2  ;;  %v4674_v51 = vld [vmem:[#allocation5 + $0x3c4] sm:$0xf0] }
 0x1fa   : > { %v1194_v47 = vadd.f32 %v1193_v37, %v5364_v44  ;;  %v5423_v12 = vadd.f32 %v1379_v15, %v6045_v59  ;;  %v4128_v37 = vld [vmem:[#allocation5 + $0x358] sm:$0xf0] }
 0x1fb   : > { %v1245_v36 = vpop.f32.mrf.mxu3  ;;  %v1294_v58 = vpop.f32.mrf.mxu0  ;;  %v4131_v46 = vor.u32 %v4659_v55, %v4128_v37 }
 0x1fc   : > { %v1243_v35 = vadd.f32 %v1242_v11, %v1194_v47  ;;  %v1501_v14 = vpack.c.bf16 %v5423_v12, %v5418_v43  ;;  %v1295_v54 = vadd.f32 %v1294_v58, %v5355_v10  ;;  %v4675_v58 = vld [vmem:[#allocation5 + $0x3d4] sm:$0xf] }
 0x1fd   : > { %v1345_v61 = vpop.f32.mrf.mxu1  ;;  %2180 = vmatpush.bf16.msra.mxu0 %v4131_v46  ;;  %v4182_v46 = vld [vmem:[#allocation5 + $0x3c0] sm:$0xf] }
 0x1fe   : > { %v1378_v3 = vmax.f32 %v1243_v35, 0.0  ;;  %1741 = vmatmul.bf16.gmra.mxu3 %v1501_v14  ;;  %1839 = vmatmul.bf16.gmra.mxu1 %v1501_v14  ;;  %v1344_v15 = vadd.f32 %v1343_v41, %v1295_v54  ;;  %v4195_v14 = vor.u32 %v4675_v58, %v4192_v19  ;;  %v4658_v54 = vld [vmem:[#allocation5 + $0x344] sm:$0xf0]  ;;  %v4657_v19 = vld [vmem:[#allocation5 + $0x344] sm:$0xf] }
 0x200   : > { %v5434_v11 = vadd.f32 %v1378_v3, %v6047_v17  ;;  %v1381_v47 = vmax.f32 %v1344_v15, 0.0  ;;  %v4118_v3 = vld [vmem:[#allocation5 + $0x340] sm:$0xf]  ;;  %2229 = vmatpush.bf16.msra.mxu1 %v4195_v14 }
 0x201   : > { %v1196_v16 = vpop.f32.mrf.mxu2 }
 0x202   : > { %v1500_v2 = vpack.c.bf16 %v5434_v11, %v5430_v13  ;;  %v1197_v30 = vadd.f32 %v1196_v16, %v5364_v44  ;;  %v5442_v9 = vadd.f32 %v1381_v47, %v6048_v34  ;;  %v4119_v16 = vor.u32 %v4658_v54, %v4118_v3 }
 0x203   : > { %v1247_v45 = vpop.f32.mrf.mxu3  ;;  %v1296_v39 = vpop.f32.mrf.mxu0 }
 0x204   : > { %v1297_v1 = vadd.f32 %v1296_v39, %v5355_v10  ;;  %1692 = vmatmul.bf16.gmra.mxu2 %v1500_v2  ;;  %1790 = vmatmul.bf16.gmra.mxu0 %v1500_v2  ;;  %v1246_v18 = vadd.f32 %v1245_v36, %v1197_v30  ;;  %v4183_v30 = vor.u32 %v4674_v51, %v4182_v46  ;;  %v6052_v46 = vmax.f32 %v5219_v29, 0.0 }
 0x205   : > { %v1348_v7 = vpop.f32.mrf.mxu1  ;;  %2083 = vmatpush.bf16.msrb.mxu2 %v4119_v16 }
 0x206   : > { %v1346_v59 = vadd.f32 %v1345_v61, %v1297_v1  ;;  %v1380_v15 = vmax.f32 %v1246_v18, 0.0  ;;  %v6050_v1 = vmax.f32 %v5192_v40, 0.0  ;;  %2132 = vmatpush.bf16.msrb.mxu3 %v4183_v30 }
 0x208   : > { %v1383_v41 = vmax.f32 %v1346_v59, 0.0  ;;  %v5454_v47 = vadd.f32 %v1380_v15, %v6050_v1  ;;  %v6051_v59 = vmax.f32 %v5198_v49, 0.0  ;;  %v4184_v15 = vld [vmem:[#allocation5 + $0x3c8] sm:$0xf0]  ;;  %v6053_v1 = vmax.f32 %v5225_v33, 0.0 }
 0x209   : > { %v1198_v35 = vpop.f32.mrf.mxu2  ;;  %v4672_v33 = vld [vmem:[#allocation5 + $0x3b4] sm:$0xf0] }
 0x20a   : > { %v1199_v53 = vadd.f32 %v1198_v35, %v5364_v44  ;;  %v5447_v17 = vadd.f32 %v1383_v41, %v6049_v38  ;;  %v4120_v35 = vld [vmem:[#allocation5 + $0x348] sm:$0xf0] }
 0x20b   : > { %v1250_v61 = vpop.f32.mrf.mxu3  ;;  %v1299_v36 = vpop.f32.mrf.mxu0  ;;  %v4123_v54 = vor.u32 %v4657_v19, %v4120_v35 }
 0x20c   : > { %v1248_v2 = vadd.f32 %v1247_v45, %v1199_v53  ;;  %v1503_v55 = vpack.c.bf16 %v5447_v17, %v5442_v9  ;;  %v1300_v39 = vadd.f32 %v1299_v36, %v5355_v10  ;;  %v4673_v36 = vld [vmem:[#allocation5 + $0x3c4] sm:$0xf] }
 0x20d   : > { %v1350_v37 = vpop.f32.mrf.mxu1  ;;  %2181 = vmatpush.bf16.msra.mxu0 %v4123_v54  ;;  %v4174_v54 = vld [vmem:[#allocation5 + $0x3b0] sm:$0xf] }
 0x20e   : > { %v1382_v42 = vmax.f32 %v1248_v2, 0.0  ;;  %1746 = vmatmul.bf16.gmra.mxu3 %v1503_v55  ;;  %1844 = vmatmul.bf16.gmra.mxu1 %v1503_v55  ;;  %v1349_v41 = vadd.f32 %v1348_v7, %v1300_v39  ;;  %v4187_v55 = vor.u32 %v4673_v36, %v4184_v15  ;;  %v4656_v39 = vld [vmem:[#allocation5 + $0x334] sm:$0xf0]  ;;  %v4655_v15 = vld [vmem:[#allocation5 + $0x334] sm:$0xf] }
 0x210   : > { %v5458_v45 = vadd.f32 %v1382_v42, %v6051_v59  ;;  %v1385_v53 = vmax.f32 %v1349_v41, 0.0  ;;  %v4110_v42 = vld [vmem:[#allocation5 + $0x330] sm:$0xf]  ;;  %2230 = vmatpush.bf16.msra.mxu1 %v4187_v55 }
 0x211   : > { %v1201_v18 = vpop.f32.mrf.mxu2 }
 0x212   : > { %v1502_v58 = vpack.c.bf16 %v5458_v45, %v5454_v47  ;;  %v1202_v34 = vadd.f32 %v1201_v18, %v5364_v44  ;;  %v5466_v51 = vadd.f32 %v1385_v53, %v6052_v46  ;;  %v4111_v18 = vor.u32 %v4656_v39, %v4110_v42 }
 0x213   : > { %v1252_v14 = vpop.f32.mrf.mxu3  ;;  %v1301_v3 = vpop.f32.mrf.mxu0 }
 0x214   : > { %v1302_v40 = vadd.f32 %v1301_v3, %v5355_v10  ;;  %1697 = vmatmul.bf16.gmra.mxu2 %v1502_v58  ;;  %1795 = vmatmul.bf16.gmra.mxu0 %v1502_v58  ;;  %v1251_v16 = vadd.f32 %v1250_v61, %v1202_v34  ;;  %v4175_v34 = vor.u32 %v4672_v33, %v4174_v54  ;;  %v6056_v54 = vmax.f32 %v5243_v27, 0.0 }
 0x215   : > { %v1353_v49 = vpop.f32.mrf.mxu1  ;;  %2084 = vmatpush.bf16.msrb.mxu2 %v4111_v18 }
 0x216   : > { %v1351_v38 = vadd.f32 %v1350_v37, %v1302_v40  ;;  %v1384_v41 = vmax.f32 %v1251_v16, 0.0  ;;  %v6054_v40 = vmax.f32 %v5216_v28, 0.0  ;;  %2133 = vmatpush.bf16.msrb.mxu3 %v4175_v34 }
 0x218   : > { %v1387_v7 = vmax.f32 %v1351_v38, 0.0  ;;  %v5478_v53 = vadd.f32 %v1384_v41, %v6054_v40  ;;  %v6055_v38 = vmax.f32 %v5222_v31, 0.0  ;;  %v4176_v41 = vld [vmem:[#allocation5 + $0x3b8] sm:$0xf0]  ;;  %v6057_v40 = vmax.f32 %v5249_v50, 0.0 }
 0x219   : > { %v1203_v2 = vpop.f32.mrf.mxu2 }
 0x21a   : > { %v1204_v30 = vadd.f32 %v1203_v2, %v5364_v44  ;;  %v5471_v59 = vadd.f32 %v1387_v7, %v6053_v1  ;;  %v4112_v2 = vld [vmem:[#allocation5 + $0x338] sm:$0xf0] }
 0x21b   : > { %v1255_v37 = vpop.f32.mrf.mxu3  ;;  %v1304_v61 = vpop.f32.mrf.mxu0  ;;  %v4115_v39 = vor.u32 %v4655_v15, %v4112_v2 }
 0x21c   : > { %v1253_v58 = vadd.f32 %v1252_v14, %v1204_v30  ;;  %v1505_v19 = vpack.c.bf16 %v5471_v59, %v5466_v51  ;;  %v1305_v3 = vadd.f32 %v1304_v61, %v5355_v10  ;;  %v4671_v61 = vld [vmem:[#allocation5 + $0x3b4] sm:$0xf] }
 0x21d   : > { %v1355_v35 = vpop.f32.mrf.mxu1  ;;  %2182 = vmatpush.bf16.msra.mxu0 %v4115_v39  ;;  %v4670_v39 = vld [vmem:[#allocation5 + $0x3a4] sm:$0xf0] }
 0x21e   : > { %v1386_v29 = vmax.f32 %v1253_v58, 0.0  ;;  %1751 = vmatmul.bf16.gmra.mxu3 %v1505_v19  ;;  %1849 = vmatmul.bf16.gmra.mxu1 %v1505_v19  ;;  %v1354_v7 = vadd.f32 %v1353_v49, %v1305_v3  ;;  %v4179_v19 = vor.u32 %v4671_v61, %v4176_v41  ;;  %v4654_v3 = vld [vmem:[#allocation5 + $0x324] sm:$0xf0]  ;;  %v4168_v41 = vld [vmem:[#allocation5 + $0x3a8] sm:$0xf0] }
 0x220   : > { %v5482_v14 = vadd.f32 %v1386_v29, %v6055_v38  ;;  %v1389_v31 = vmax.f32 %v1354_v7, 0.0  ;;  %v4102_v29 = vld [vmem:[#allocation5 + $0x320] sm:$0xf]  ;;  %2231 = vmatpush.bf16.msra.mxu1 %v4179_v19 }
 0x221   : > { %v1206_v16 = vpop.f32.mrf.mxu2 }
 0x222   : > { %v1504_v36 = vpack.c.bf16 %v5482_v14, %v5478_v53  ;;  %v1207_v46 = vadd.f32 %v1206_v16, %v5364_v44  ;;  %v5490_v33 = vadd.f32 %v1389_v31, %v6056_v54  ;;  %v4669_v31 = vld [vmem:[#allocation5 + $0x3a4] sm:$0xf] }
 0x223   : > { %v1257_v55 = vpop.f32.mrf.mxu3  ;;  %v1306_v42 = vpop.f32.mrf.mxu0 }
 0x224   : > { %v1307_v28 = vadd.f32 %v1306_v42, %v5355_v10  ;;  %1702 = vmatmul.bf16.gmra.mxu2 %v1504_v36  ;;  %1800 = vmatmul.bf16.gmra.mxu0 %v1504_v36  ;;  %v1256_v18 = vadd.f32 %v1255_v37, %v1207_v46  ;;  %v4166_v42 = vld [vmem:[#allocation5 + $0x3a0] sm:$0xf]  ;;  %v4653_v46 = vld [vmem:[#allocation5 + $0x324] sm:$0xf] }
 0x225   : > { %v1358_v1 = vpop.f32.mrf.mxu1  ;;  %v4167_v50 = vor.u32 %v4670_v39, %v4166_v42 }
 0x226   : > { %v1356_v30 = vadd.f32 %v1355_v35, %v1307_v28  ;;  %v4103_v35 = vor.u32 %v4654_v3, %v4102_v29  ;;  %v1388_v37 = vmax.f32 %v1256_v18, 0.0  ;;  %v4104_v28 = vld [vmem:[#allocation5 + $0x328] sm:$0xf0]  ;;  %v4171_v29 = vor.u32 %v4669_v31, %v4168_v41 }
 0x227   : > { %v4107_v61 = vor.u32 %v4653_v46, %v4104_v28  ;;  %2134 = vmatpush.bf16.msrb.mxu3 %v4167_v50  ;;  %v6060_v46 = vmax.f32 %v5267_v6, 0.0 }
 0x228   : > { %v1391_v49 = vmax.f32 %v1356_v30, 0.0  ;;  %2085 = vmatpush.bf16.msrb.mxu2 %v4103_v35  ;;  %v6058_v30 = vmax.f32 %v5240_v26, 0.0  ;;  %2232 = vmatpush.bf16.msra.mxu1 %v4171_v29  ;;  %v4652_v35 = vld [vmem:[#allocation5 + $0x314] sm:$0xf0] }
 0x229   : > { %v1208_v58 = vpop.f32.mrf.mxu2  ;;  %2183 = vmatpush.bf16.msra.mxu0 %v4107_v61 }
 0x22a   : > { %v1209_v34 = vadd.f32 %v1208_v58, %v5364_v44  ;;  %v5495_v38 = vadd.f32 %v1391_v49, %v6057_v40  ;;  %v5502_v18 = vadd.f32 %v1388_v37, %v6058_v30  ;;  %v6061_v30 = vmax.f32 %v5273_v23, 0.0 }
 0x22b   : > { %v1309_v16 = vpop.f32.mrf.mxu0  ;;  %v1260_v15 = vpop.f32.mrf.mxu3  ;;  %v6062_v23 = vmax.f32 %v5264_v62, 0.0 }
 0x22c   : > { %v1258_v7 = vadd.f32 %v1257_v55, %v1209_v34  ;;  %v1507_v36 = vpack.c.bf16 %v5495_v38, %v5490_v33  ;;  %v1310_v27 = vadd.f32 %v1309_v16, %v5355_v10  ;;  %v6059_v55 = vmax.f32 %v5246_v32, 0.0  ;;  %v4094_v32 = vld [vmem:[#allocation5 + $0x310] sm:$0xf] }
 0x22d   : > { %v1360_v58 = vpop.f32.mrf.mxu1  ;;  %v4158_v16 = vld [vmem:[#allocation5 + $0x390] sm:$0xf]  ;;  %v4095_v37 = vor.u32 %v4652_v35, %v4094_v32 }
 0x22e   : > { %v1390_v2 = vmax.f32 %v1258_v7, 0.0  ;;  %1756 = vmatmul.bf16.gmra.mxu3 %v1507_v36  ;;  %1854 = vmatmul.bf16.gmra.mxu1 %v1507_v36  ;;  %v1359_v3 = vadd.f32 %v1358_v1, %v1310_v27  ;;  %v4668_v7 = vld [vmem:[#allocation5 + $0x394] sm:$0xf0] }
 0x22f   : > { %v4159_v1 = vor.u32 %v4668_v7, %v4158_v16  ;;  %2086 = vmatpush.bf16.msrb.mxu2 %v4095_v37 }
 0x230   : > { %v5506_v49 = vadd.f32 %v1390_v2, %v6059_v55  ;;  %v1393_v36 = vmax.f32 %v1359_v3, 0.0 }
 0x231   : > { %v1211_v19 = vpop.f32.mrf.mxu2  ;;  %2135 = vmatpush.bf16.msrb.mxu3 %v4159_v1 }
 0x232   : > { %v1506_v54 = vpack.c.bf16 %v5506_v49, %v5502_v18  ;;  %v1212_v26 = vadd.f32 %v1211_v19, %v5364_v44  ;;  %v5514_v28 = vadd.f32 %v1393_v36, %v6060_v46  ;;  %v4096_v19 = vld [vmem:[#allocation5 + $0x318] sm:$0xf0] }
 0x233   : > { %v1311_v34 = vpop.f32.mrf.mxu0  ;;  %v1262_v27 = vpop.f32.mrf.mxu3 }
 0x234   : > { %v1312_v40 = vadd.f32 %v1311_v34, %v5355_v10  ;;  %1707 = vmatmul.bf16.gmra.mxu2 %v1506_v54  ;;  %1805 = vmatmul.bf16.gmra.mxu0 %v1506_v54  ;;  %v1261_v42 = vadd.f32 %v1260_v15, %v1212_v26 }
 0x235   : > { %v1363_v61 = vpop.f32.mrf.mxu1 }
 0x236   : > { %v1361_v2 = vadd.f32 %v1360_v58, %v1312_v40  ;;  %v4651_v58 = vld [vmem:[#allocation5 + $0x314] sm:$0xf]  ;;  %v1392_v29 = vmax.f32 %v1261_v42, 0.0  ;;  %v6063_v40 = vmax.f32 %v5270_v22, 0.0  ;;  %v4160_v22 = vld [vmem:[#allocation5 + $0x398] sm:$0xf0] }
 0x237   : > { %v4099_v54 = vor.u32 %v4651_v58, %v4096_v19 }
 0x238   : > { %v1395_v39 = vmax.f32 %v1361_v2, 0.0  ;;  %v5526_v26 = vadd.f32 %v1392_v29, %v6062_v23 }
 0x239   : > { %v1213_v50 = vpop.f32.mrf.mxu2  ;;  %2184 = vmatpush.bf16.msra.mxu0 %v4099_v54 }
 0x23a   : > { %v1214_v31 = vadd.f32 %v1213_v50, %v5364_v44  ;;  %v5519_v55 = vadd.f32 %v1395_v39, %v6061_v30  ;;  %v4667_v39 = vld [vmem:[#allocation5 + $0x394] sm:$0xf] }
 0x23b   : > { %v1314_v41 = vpop.f32.mrf.mxu0  ;;  %v1265_v35 = vpop.f32.mrf.mxu3  ;;  %v4163_v50 = vor.u32 %v4667_v39, %v4160_v22 }
 0x23c   : > { %v1263_v3 = vadd.f32 %v1262_v27, %v1214_v31  ;;  %v1509_v15 = vpack.c.bf16 %v5519_v55, %v5514_v28  ;;  %v1315_v6 = vadd.f32 %v1314_v41, %v5355_v10 }
 0x23d   : > { %v1365_v62 = vpop.f32.mrf.mxu1  ;;  %2233 = vmatpush.bf16.msra.mxu1 %v4163_v50 }
 0x23e   : > { %v1394_v34 = vmax.f32 %v1263_v3, 0.0  ;;  %1761 = vmatmul.bf16.gmra.mxu3 %v1509_v15  ;;  %1859 = vmatmul.bf16.gmra.mxu1 %v1509_v15  ;;  %v1364_v37 = vadd.f32 %v1363_v61, %v1315_v6  ;;  %v6064_v61 = vmax.f32 %v5291_v25, 0.0  ;;  %v4650_v6 = vld [vmem:[#allocation5 + $0x304] sm:$0xf0]  ;;  %v4665_v25 = vld [vmem:[#allocation5 + $0x384] sm:$0xf] }
 0x240   : > { %v5530_v32 = vadd.f32 %v1394_v34, %v6063_v40  ;;  %v1397_v27 = vmax.f32 %v1364_v37, 0.0  ;;  %v4086_v34 = vld [vmem:[#allocation5 + $0x300] sm:$0xf]  ;;  %v4152_v37 = vld [vmem:[#allocation5 + $0x388] sm:$0xf0] }
 0x241   : > { %v1216_v16 = vpop.f32.mrf.mxu2  ;;  %v4087_v23 = vor.u32 %v4650_v6, %v4086_v34  ;;  %v4150_v40 = vld [vmem:[#allocation5 + $0x380] sm:$0xf] }
 0x242   : > { %v1508_v7 = vpack.c.bf16 %v5530_v32, %v5526_v26  ;;  %v1217_v2 = vadd.f32 %v1216_v16, %v5364_v44  ;;  %v5538_v41 = vadd.f32 %v1397_v27, %v6064_v61  ;;  %v4649_v27 = vld [vmem:[#allocation5 + $0x304] sm:$0xf]  ;;  %v5562_v61 = vperm.slane %v5361_v0, 3 }
 0x243   : > { %v1316_v36 = vpop.f32.mrf.mxu0  ;;  %v1267_v29 = vpop.f32.mrf.mxu3  ;;  %2087 = vmatpush.bf16.msrb.mxu2 %v4087_v23 }
 0x244   : > { %v1317_v1 = vadd.f32 %v1316_v36, %v5355_v10  ;;  %1712 = vmatmul.bf16.gmra.mxu2 %v1508_v7  ;;  %1810 = vmatmul.bf16.gmra.mxu0 %v1508_v7  ;;  %v1266_v46 = vadd.f32 %v1265_v35, %v1217_v2  ;;  %v6065_v10 = vmax.f32 %v5297_v60, 0.0  ;;  %v4666_v35 = vld [vmem:[#allocation5 + $0x384] sm:$0xf0]  ;;  %v4155_v60 = vor.u32 %v4665_v25, %v4152_v37 }
 0x245   : > { %v6066_v7 = vmax.f32 %v5288_v8, 0.0  ;;  %v6067_v2 = vmax.f32 %v5294_v57, 0.0 }
 0x246   : > { %v1366_v42 = vadd.f32 %v1365_v62, %v1317_v1  ;;  %v1396_v3 = vmax.f32 %v1266_v46, 0.0  ;;  %2234 = vmatpush.bf16.msra.mxu1 %v4155_v60  ;;  %v5558_v46 = vperm.slane %v5352_v4, 3  ;;  %v4270_v4 = vld [vmem:[#allocation5 + $0x470] sm:$0xf] }
 0x248   : > { %v1399_v31 = vmax.f32 %v1366_v42, 0.0  ;;  %v5549_v36 = vadd.f32 %v1396_v3, %v6066_v7  ;;  %v4088_v42 = vld [vmem:[#allocation5 + $0x308] sm:$0xf0] }
 0x249   : > { %v1218_v30 = vpop.f32.mrf.mxu2  ;;  %v4091_v39 = vor.u32 %v4649_v27, %v4088_v42  ;;  %v4334_v42 = vld [vmem:[#allocation5 + $0x4f0] sm:$0xf] }
 0x24a   : > { %v1219_v58 = vadd.f32 %v1218_v30, %v5364_v44  ;;  %v5543_v19 = vadd.f32 %v1399_v31, %v6065_v10  ;;  %v4151_v44 = vor.u32 %v4666_v35, %v4150_v40  ;;  %v4696_v40 = vld [vmem:[#allocation5 + $0x474] sm:$0xf0] }
 0x24b   : > { %2185 = vmatpush.bf16.msra.mxu0 %v4091_v39  ;;  %v4271_v25 = vor.u32 %v4696_v40, %v4270_v4  ;;  %v4712_v39 = vld [vmem:[#allocation5 + $0x4f4] sm:$0xf0]  ;;  %v4711_v4 = vld [vmem:[#allocation5 + $0x4f4] sm:$0xf]  ;;  %v4336_v40 = vld [vmem:[#allocation5 + $0x4f8] sm:$0xf0] }
 0x24c   : > { %v1268_v15 = vadd.f32 %v1267_v29, %v1219_v58  ;;  %v1511_v54 = vpack.c.bf16 %v5543_v19, %v5538_v41  ;;  %2136 = vmatpush.bf16.msrb.mxu3 %v4151_v44 }
 0x24d   : > { %2582 = vmatpush.bf16.msra.mxu2 %v4271_v25 }
 0x24e   : > { %v1398_v16 = vmax.f32 %v1268_v15, 0.0  ;;  %1766 = vmatmul.bf16.gmra.mxu3 %v1511_v54  ;;  %1864 = vmatmul.bf16.gmra.mxu1 %v1511_v54 }
 0x250   : > { %v5553_v1 = vadd.f32 %v1398_v16, %v6067_v2 }
 0x252   : > { %v1510_v62 = vpack.c.bf16 %v5553_v1, %v5549_v36 }
 0x254   : > { %1717 = vmatmul.bf16.gmra.mxu2 %v1510_v62  ;;  %1815 = vmatmul.bf16.gmra.mxu0 %v1510_v62 }
 0x25b   : > { %v1830_v22 = vpop.f32.mrf.mxu1 }
 0x261   : > { %v1732_v50 = vpop.f32.mrf.mxu3  ;;  %v1781_v8 = vpop.f32.mrf.mxu0 }
 0x262   : > { %v1782_v31 = vadd.f32 %v1781_v8, %v5558_v46 }
 0x263   : > { %v1832_v57 = vpop.f32.mrf.mxu1 }
 0x264   : > { %v1831_v29 = vadd.f32 %v1830_v22, %v1782_v31  ;;  %v4335_v22 = vor.u32 %v4712_v39, %v4334_v42  ;;  %v4695_v31 = vld [vmem:[#allocation5 + $0x474] sm:$0xf] }
 0x266   : > { %v1871_v6 = vmax.f32 %v1831_v29, 0.0  ;;  %2631 = vmatpush.bf16.msra.mxu3 %v4335_v22 }
 0x267   : > { %v1683_v30 = vpop.f32.mrf.mxu2 }
 0x268   : > { %v1684_v54 = vadd.f32 %v1683_v30, %v5562_v61 }
 0x269   : > { %v1734_v58 = vpop.f32.mrf.mxu3  ;;  %v1783_v10 = vpop.f32.mrf.mxu0 }
 0x26a   : > { %v1784_v3 = vadd.f32 %v1783_v10, %v5558_v46  ;;  %v1733_v16 = vadd.f32 %v1732_v50, %v1684_v54  ;;  %v4272_v50 = vld [vmem:[#allocation5 + $0x478] sm:$0xf0] }
 0x26b   : > { %v1835_v15 = vpop.f32.mrf.mxu1  ;;  %v4275_v10 = vor.u32 %v4695_v31, %v4272_v50  ;;  %v4326_v31 = vld [vmem:[#allocation5 + $0x4e0] sm:$0xf]  ;;  %v4710_v50 = vld [vmem:[#allocation5 + $0x4e4] sm:$0xf0] }
 0x26c   : > { %v1833_v34 = vadd.f32 %v1832_v57, %v1784_v3  ;;  %v1870_v62 = vmax.f32 %v1733_v16, 0.0 }
 0x26d   : > { %2680 = vmatpush.bf16.msrb.mxu0 %v4275_v10 }
 0x26e   : > { %v1873_v23 = vmax.f32 %v1833_v34, 0.0 }
 0x26f   : > { %v1685_v35 = vpop.f32.mrf.mxu2 }
 0x270   : > { %v1903_v44 = vpack.c.bf16 %v1873_v23, %v1871_v6  ;;  %v1686_v0 = vadd.f32 %v1685_v35, %v5562_v61  ;;  %v4339_v35 = vor.u32 %v4711_v4, %v4336_v40 }
 0x271   : > { %v1737_v37 = vpop.f32.mrf.mxu3  ;;  %v1786_v60 = vpop.f32.mrf.mxu0 }
 0x272   : > { %v1735_v7 = vadd.f32 %v1734_v58, %v1686_v0  ;;  %2137 = vmatmul.bf16.vlgmr.msrb.gmra.mxu3 %v1903_v44  ;;  %2235 = vmatmul.bf16.vlgmr.msra.gmra.mxu1 %v1903_v44  ;;  %v1787_v57 = vadd.f32 %v1786_v60, %v5558_v46  ;;  %v4262_v44 = vld [vmem:[#allocation5 + $0x460] sm:$0xf]  ;;  %v4694_v0 = vld [vmem:[#allocation5 + $0x464] sm:$0xf0] }
 0x273   : > { %v1837_v2 = vpop.f32.mrf.mxu1  ;;  %2729 = vmatpush.bf16.msrb.mxu1 %v4339_v35 }
 0x274   : > { %v1872_v27 = vmax.f32 %v1735_v7, 0.0  ;;  %v1836_v3 = vadd.f32 %v1835_v15, %v1787_v57  ;;  %v4263_v7 = vor.u32 %v4694_v0, %v4262_v44  ;;  %v4709_v44 = vld [vmem:[#allocation5 + $0x4e4] sm:$0xf]  ;;  %v4328_v0 = vld [vmem:[#allocation5 + $0x4e8] sm:$0xf0] }
 0x276   : > { %v1902_v8 = vpack.c.bf16 %v1872_v27, %v1870_v62  ;;  %v1875_v25 = vmax.f32 %v1836_v3, 0.0  ;;  %2583 = vmatpush.bf16.msra.mxu2 %v4263_v7  ;;  %v4693_v3 = vld [vmem:[#allocation5 + $0x464] sm:$0xf] }
 0x277   : > { %v1688_v30 = vpop.f32.mrf.mxu2 }
 0x278   : > { %2088 = vmatmul.bf16.vlgmr.msrb.gmra.mxu2 %v1902_v8  ;;  %2186 = vmatmul.bf16.vlgmr.msra.gmra.mxu0 %v1902_v8  ;;  %v1689_v6 = vadd.f32 %v1688_v30, %v5562_v61  ;;  %v4327_v30 = vor.u32 %v4710_v50, %v4326_v31 }
 0x279   : > { %v1739_v29 = vpop.f32.mrf.mxu3  ;;  %v1788_v58 = vpop.f32.mrf.mxu0 }
 0x27a   : > { %v1789_v54 = vadd.f32 %v1788_v58, %v5558_v46  ;;  %v1738_v62 = vadd.f32 %v1737_v37, %v1689_v6  ;;  %v4264_v37 = vld [vmem:[#allocation5 + $0x468] sm:$0xf0]  ;;  %2632 = vmatpush.bf16.msra.mxu3 %v4327_v30 }
 0x27b   : > { %v1840_v34 = vpop.f32.mrf.mxu1  ;;  %v4267_v6 = vor.u32 %v4693_v3, %v4264_v37  ;;  %v4318_v3 = vld [vmem:[#allocation5 + $0x4d0] sm:$0xf]  ;;  %v4708_v37 = vld [vmem:[#allocation5 + $0x4d4] sm:$0xf0] }
 0x27c   : > { %v1838_v23 = vadd.f32 %v1837_v2, %v1789_v54  ;;  %v1874_v8 = vmax.f32 %v1738_v62, 0.0 }
 0x27d   : > { %2681 = vmatpush.bf16.msrb.mxu0 %v4267_v6 }
 0x27e   : > { %v1877_v16 = vmax.f32 %v1838_v23, 0.0 }
 0x27f   : > { %v1690_v60 = vpop.f32.mrf.mxu2 }
 0x280   : > { %v1691_v27 = vadd.f32 %v1690_v60, %v5562_v61  ;;  %v1905_v15 = vpack.c.bf16 %v1877_v16, %v1875_v25  ;;  %v4331_v60 = vor.u32 %v4709_v44, %v4328_v0 }
 0x281   : > { %v1742_v42 = vpop.f32.mrf.mxu3  ;;  %v1791_v39 = vpop.f32.mrf.mxu0 }
 0x282   : > { %v1740_v22 = vadd.f32 %v1739_v29, %v1691_v27  ;;  %2142 = vmatmul.bf16.gmra.mxu3 %v1905_v15  ;;  %2240 = vmatmul.bf16.gmra.mxu1 %v1905_v15  ;;  %v1792_v10 = vadd.f32 %v1791_v39, %v5558_v46  ;;  %v4254_v27 = vld [vmem:[#allocation5 + $0x450] sm:$0xf]  ;;  %v4692_v15 = vld [vmem:[#allocation5 + $0x454] sm:$0xf0] }
 0x283   : > { %v1842_v2 = vpop.f32.mrf.mxu1  ;;  %2730 = vmatpush.bf16.msrb.mxu1 %v4331_v60 }
 0x284   : > { %v1876_v57 = vmax.f32 %v1740_v22, 0.0  ;;  %v1841_v4 = vadd.f32 %v1840_v34, %v1792_v10  ;;  %v4255_v22 = vor.u32 %v4692_v15, %v4254_v27  ;;  %v4707_v27 = vld [vmem:[#allocation5 + $0x4d4] sm:$0xf]  ;;  %v4320_v15 = vld [vmem:[#allocation5 + $0x4d8] sm:$0xf0] }
 0x286   : > { %v1904_v58 = vpack.c.bf16 %v1876_v57, %v1874_v8  ;;  %v1879_v7 = vmax.f32 %v1841_v4, 0.0  ;;  %2584 = vmatpush.bf16.msra.mxu2 %v4255_v22  ;;  %v4691_v4 = vld [vmem:[#allocation5 + $0x454] sm:$0xf] }
 0x287   : > { %v1693_v54 = vpop.f32.mrf.mxu2 }
 0x288   : > { %2093 = vmatmul.bf16.gmra.mxu2 %v1904_v58  ;;  %2191 = vmatmul.bf16.gmra.mxu0 %v1904_v58  ;;  %v1694_v25 = vadd.f32 %v1693_v54, %v5562_v61  ;;  %v4319_v54 = vor.u32 %v4708_v37, %v4318_v3 }
 0x289   : > { %v1744_v23 = vpop.f32.mrf.mxu3  ;;  %v1793_v29 = vpop.f32.mrf.mxu0 }
 0x28a   : > { %v1794_v40 = vadd.f32 %v1793_v29, %v5558_v46  ;;  %v1743_v8 = vadd.f32 %v1742_v42, %v1694_v25  ;;  %v4256_v42 = vld [vmem:[#allocation5 + $0x458] sm:$0xf0]  ;;  %2633 = vmatpush.bf16.msra.mxu3 %v4319_v54 }
 0x28b   : > { %v1845_v35 = vpop.f32.mrf.mxu1  ;;  %v4259_v25 = vor.u32 %v4691_v4, %v4256_v42  ;;  %v4310_v4 = vld [vmem:[#allocation5 + $0x4c0] sm:$0xf]  ;;  %v4706_v42 = vld [vmem:[#allocation5 + $0x4c4] sm:$0xf0] }
 0x28c   : > { %v1843_v16 = vadd.f32 %v1842_v2, %v1794_v40  ;;  %v1878_v10 = vmax.f32 %v1743_v8, 0.0 }
 0x28d   : > { %2682 = vmatpush.bf16.msrb.mxu0 %v4259_v25 }
 0x28e   : > { %v1881_v62 = vmax.f32 %v1843_v16, 0.0 }
 0x28f   : > { %v1695_v39 = vpop.f32.mrf.mxu2 }
 0x290   : > { %v1696_v57 = vadd.f32 %v1695_v39, %v5562_v61  ;;  %v1907_v34 = vpack.c.bf16 %v1881_v62, %v1879_v7  ;;  %v4323_v39 = vor.u32 %v4707_v27, %v4320_v15 }
 0x291   : > { %v1747_v31 = vpop.f32.mrf.mxu3  ;;  %v1796_v50 = vpop.f32.mrf.mxu0 }
 0x292   : > { %v1745_v30 = vadd.f32 %v1744_v23, %v1696_v57  ;;  %2147 = vmatmul.bf16.gmra.mxu3 %v1907_v34  ;;  %2245 = vmatmul.bf16.gmra.mxu1 %v1907_v34  ;;  %v1797_v6 = vadd.f32 %v1796_v50, %v5558_v46  ;;  %v4246_v57 = vld [vmem:[#allocation5 + $0x440] sm:$0xf]  ;;  %v4690_v34 = vld [vmem:[#allocation5 + $0x444] sm:$0xf0] }
 0x293   : > { %v1847_v2 = vpop.f32.mrf.mxu1  ;;  %2731 = vmatpush.bf16.msrb.mxu1 %v4323_v39 }
 0x294   : > { %v1880_v58 = vmax.f32 %v1745_v30, 0.0  ;;  %v1846_v44 = vadd.f32 %v1845_v35, %v1797_v6  ;;  %v4247_v30 = vor.u32 %v4690_v34, %v4246_v57  ;;  %v4705_v57 = vld [vmem:[#allocation5 + $0x4c4] sm:$0xf]  ;;  %v4312_v34 = vld [vmem:[#allocation5 + $0x4c8] sm:$0xf0] }
 0x296   : > { %v1906_v29 = vpack.c.bf16 %v1880_v58, %v1878_v10  ;;  %v1883_v22 = vmax.f32 %v1846_v44, 0.0  ;;  %2585 = vmatpush.bf16.msra.mxu2 %v4247_v30  ;;  %v4689_v44 = vld [vmem:[#allocation5 + $0x444] sm:$0xf] }
 0x297   : > { %v1698_v40 = vpop.f32.mrf.mxu2 }
 0x298   : > { %2098 = vmatmul.bf16.gmra.mxu2 %v1906_v29  ;;  %2196 = vmatmul.bf16.gmra.mxu0 %v1906_v29  ;;  %v1699_v7 = vadd.f32 %v1698_v40, %v5562_v61  ;;  %v4311_v40 = vor.u32 %v4706_v42, %v4310_v4 }
 0x299   : > { %v1749_v16 = vpop.f32.mrf.mxu3  ;;  %v1798_v23 = vpop.f32.mrf.mxu0 }
 0x29a   : > { %v1799_v0 = vadd.f32 %v1798_v23, %v5558_v46  ;;  %v1748_v10 = vadd.f32 %v1747_v31, %v1699_v7  ;;  %v4248_v31 = vld [vmem:[#allocation5 + $0x448] sm:$0xf0]  ;;  %2634 = vmatpush.bf16.msra.mxu3 %v4311_v40 }
 0x29b   : > { %v1850_v60 = vpop.f32.mrf.mxu1  ;;  %v4251_v7 = vor.u32 %v4689_v44, %v4248_v31  ;;  %v4302_v44 = vld [vmem:[#allocation5 + $0x4b0] sm:$0xf]  ;;  %v4704_v31 = vld [vmem:[#allocation5 + $0x4b4] sm:$0xf0] }
 0x29c   : > { %v1848_v62 = vadd.f32 %v1847_v2, %v1799_v0  ;;  %v1882_v6 = vmax.f32 %v1748_v10, 0.0 }
 0x29d   : > { %2683 = vmatpush.bf16.msrb.mxu0 %v4251_v7 }
 0x29e   : > { %v1885_v8 = vmax.f32 %v1848_v62, 0.0 }
 0x29f   : > { %v1700_v50 = vpop.f32.mrf.mxu2 }
 0x2a0   : > { %v1701_v58 = vadd.f32 %v1700_v50, %v5562_v61  ;;  %v1909_v35 = vpack.c.bf16 %v1885_v8, %v1883_v22  ;;  %v4315_v50 = vor.u32 %v4705_v57, %v4312_v34 }
 0x2a1   : > { %v1752_v3 = vpop.f32.mrf.mxu3  ;;  %v1801_v37 = vpop.f32.mrf.mxu0 }
 0x2a2   : > { %v1750_v54 = vadd.f32 %v1749_v16, %v1701_v58  ;;  %2152 = vmatmul.bf16.gmra.mxu3 %v1909_v35  ;;  %2250 = vmatmul.bf16.gmra.mxu1 %v1909_v35  ;;  %v1802_v25 = vadd.f32 %v1801_v37, %v5558_v46  ;;  %v4238_v58 = vld [vmem:[#allocation5 + $0x430] sm:$0xf]  ;;  %v4688_v35 = vld [vmem:[#allocation5 + $0x434] sm:$0xf0] }
 0x2a3   : > { %v1852_v2 = vpop.f32.mrf.mxu1  ;;  %2732 = vmatpush.bf16.msrb.mxu1 %v4315_v50 }
 0x2a4   : > { %v1884_v29 = vmax.f32 %v1750_v54, 0.0  ;;  %v1851_v27 = vadd.f32 %v1850_v60, %v1802_v25  ;;  %v4239_v54 = vor.u32 %v4688_v35, %v4238_v58  ;;  %v4304_v58 = vld [vmem:[#allocation5 + $0x4b8] sm:$0xf0] }
 0x2a6   : > { %v1908_v23 = vpack.c.bf16 %v1884_v29, %v1882_v6  ;;  %v1887_v30 = vmax.f32 %v1851_v27, 0.0  ;;  %2586 = vmatpush.bf16.msra.mxu2 %v4239_v54  ;;  %v4687_v27 = vld [vmem:[#allocation5 + $0x434] sm:$0xf] }
 0x2a7   : > { %v1703_v0 = vpop.f32.mrf.mxu2 }
 0x2a8   : > { %2103 = vmatmul.bf16.gmra.mxu2 %v1908_v23  ;;  %2201 = vmatmul.bf16.gmra.mxu0 %v1908_v23  ;;  %v1704_v22 = vadd.f32 %v1703_v0, %v5562_v61  ;;  %v4303_v0 = vor.u32 %v4704_v31, %v4302_v44 }
 0x2a9   : > { %v1754_v62 = vpop.f32.mrf.mxu3  ;;  %v1803_v16 = vpop.f32.mrf.mxu0 }
 0x2aa   : > { %v1804_v15 = vadd.f32 %v1803_v16, %v5558_v46  ;;  %v1753_v6 = vadd.f32 %v1752_v3, %v1704_v22  ;;  %v4240_v3 = vld [vmem:[#allocation5 + $0x438] sm:$0xf0]  ;;  %2635 = vmatpush.bf16.msra.mxu3 %v4303_v0 }
 0x2ab   : > { %v1855_v39 = vpop.f32.mrf.mxu1  ;;  %v4243_v22 = vor.u32 %v4687_v27, %v4240_v3  ;;  %v4702_v27 = vld [vmem:[#allocation5 + $0x4a4] sm:$0xf0] }
 0x2ac   : > { %v1853_v8 = vadd.f32 %v1852_v2, %v1804_v15  ;;  %v1886_v25 = vmax.f32 %v1753_v6, 0.0 }
 0x2ad   : > { %2684 = vmatpush.bf16.msrb.mxu0 %v4243_v22  ;;  %v4232_v22 = vld [vmem:[#allocation5 + $0x428] sm:$0xf0] }
 0x2ae   : > { %v1889_v10 = vmax.f32 %v1853_v8, 0.0 }
 0x2af   : > { %v1705_v37 = vpop.f32.mrf.mxu2 }
 0x2b0   : > { %v1706_v29 = vadd.f32 %v1705_v37, %v5562_v61  ;;  %v1911_v60 = vpack.c.bf16 %v1889_v10, %v1887_v30  ;;  %v4703_v10 = vld [vmem:[#allocation5 + $0x4b4] sm:$0xf] }
 0x2b1   : > { %v1757_v4 = vpop.f32.mrf.mxu3  ;;  %v1806_v42 = vpop.f32.mrf.mxu0  ;;  %v4307_v37 = vor.u32 %v4703_v10, %v4304_v58  ;;  %v4222_v10 = vld [vmem:[#allocation5 + $0x410] sm:$0xf] }
 0x2b2   : > { %v1755_v40 = vadd.f32 %v1754_v62, %v1706_v29  ;;  %2157 = vmatmul.bf16.gmra.mxu3 %v1911_v60  ;;  %2255 = vmatmul.bf16.gmra.mxu1 %v1911_v60  ;;  %v1807_v7 = vadd.f32 %v1806_v42, %v5558_v46  ;;  %v4230_v29 = vld [vmem:[#allocation5 + $0x420] sm:$0xf]  ;;  %v4686_v60 = vld [vmem:[#allocation5 + $0x424] sm:$0xf0] }
 0x2b3   : > { %v1857_v2 = vpop.f32.mrf.mxu1  ;;  %2733 = vmatpush.bf16.msrb.mxu1 %v4307_v37 }
 0x2b4   : > { %v1888_v23 = vmax.f32 %v1755_v40, 0.0  ;;  %v1856_v57 = vadd.f32 %v1855_v39, %v1807_v7  ;;  %v4231_v40 = vor.u32 %v4686_v60, %v4230_v29 }
 0x2b6   : > { %v1910_v16 = vpack.c.bf16 %v1888_v23, %v1886_v25  ;;  %v1891_v54 = vmax.f32 %v1856_v57, 0.0  ;;  %2587 = vmatpush.bf16.msra.mxu2 %v4231_v40 }
 0x2b7   : > { %v1708_v15 = vpop.f32.mrf.mxu2 }
 0x2b8   : > { %2108 = vmatmul.bf16.gmra.mxu2 %v1910_v16  ;;  %2206 = vmatmul.bf16.gmra.mxu0 %v1910_v16  ;;  %v1709_v50 = vadd.f32 %v1708_v15, %v5562_v61  ;;  %v4294_v16 = vld [vmem:[#allocation5 + $0x4a0] sm:$0xf]  ;;  %v4685_v15 = vld [vmem:[#allocation5 + $0x424] sm:$0xf] }
 0x2b9   : > { %v1759_v8 = vpop.f32.mrf.mxu3  ;;  %v1808_v62 = vpop.f32.mrf.mxu0  ;;  %v4295_v3 = vor.u32 %v4702_v27, %v4294_v16 }
 0x2ba   : > { %v1809_v34 = vadd.f32 %v1808_v62, %v5558_v46  ;;  %v1758_v25 = vadd.f32 %v1757_v4, %v1709_v50  ;;  %v4235_v4 = vor.u32 %v4685_v15, %v4232_v22 }
 0x2bb   : > { %v1860_v35 = vpop.f32.mrf.mxu1  ;;  %2636 = vmatpush.bf16.msra.mxu3 %v4295_v3 }
 0x2bc   : > { %v1858_v30 = vadd.f32 %v1857_v2, %v1809_v34  ;;  %v1890_v0 = vmax.f32 %v1758_v25, 0.0  ;;  %2685 = vmatpush.bf16.msrb.mxu0 %v4235_v4 }
 0x2be   : > { %v1893_v6 = vmax.f32 %v1858_v30, 0.0  ;;  %v4296_v30 = vld [vmem:[#allocation5 + $0x4a8] sm:$0xf0] }
 0x2bf   : > { %v1710_v42 = vpop.f32.mrf.mxu2 }
 0x2c0   : > { %v1711_v23 = vadd.f32 %v1710_v42, %v5562_v61  ;;  %v1913_v39 = vpack.c.bf16 %v1893_v6, %v1891_v54  ;;  %v4684_v54 = vld [vmem:[#allocation5 + $0x414] sm:$0xf0] }
 0x2c1   : > { %v1811_v44 = vpop.f32.mrf.mxu0  ;;  %v1762_v2 = vpop.f32.mrf.mxu3  ;;  %v4223_v60 = vor.u32 %v4684_v54, %v4222_v10 }
 0x2c2   : > { %v1760_v31 = vadd.f32 %v1759_v8, %v1711_v23  ;;  %2162 = vmatmul.bf16.gmra.mxu3 %v1913_v39  ;;  %2260 = vmatmul.bf16.gmra.mxu1 %v1913_v39  ;;  %v1812_v62 = vadd.f32 %v1811_v44, %v5558_v46  ;;  %v4701_v8 = vld [vmem:[#allocation5 + $0x4a4] sm:$0xf] }
 0x2c3   : > { %v1862_v34 = vpop.f32.mrf.mxu1  ;;  %v4299_v37 = vor.u32 %v4701_v8, %v4296_v30  ;;  %2588 = vmatpush.bf16.msra.mxu2 %v4223_v60 }
 0x2c4   : > { %v1892_v7 = vmax.f32 %v1760_v31, 0.0  ;;  %v1861_v6 = vadd.f32 %v1860_v35, %v1812_v62  ;;  %v4286_v31 = vld [vmem:[#allocation5 + $0x490] sm:$0xf] }
 0x2c5   : > { %2734 = vmatpush.bf16.msrb.mxu1 %v4299_v37 }
 0x2c6   : > { %v1912_v57 = vpack.c.bf16 %v1892_v7, %v1890_v0  ;;  %v1895_v23 = vmax.f32 %v1861_v6, 0.0  ;;  %v4700_v0 = vld [vmem:[#allocation5 + $0x494] sm:$0xf0]  ;;  %v4683_v6 = vld [vmem:[#allocation5 + $0x414] sm:$0xf] }
 0x2c7   : > { %v1713_v50 = vpop.f32.mrf.mxu2  ;;  %v4287_v3 = vor.u32 %v4700_v0, %v4286_v31 }
 0x2c8   : > { %2113 = vmatmul.bf16.gmra.mxu2 %v1912_v57  ;;  %2211 = vmatmul.bf16.gmra.mxu0 %v1912_v57  ;;  %v1714_v42 = vadd.f32 %v1713_v50, %v5562_v61 }
 0x2c9   : > { %v1813_v58 = vpop.f32.mrf.mxu0  ;;  %v1764_v25 = vpop.f32.mrf.mxu3  ;;  %2637 = vmatpush.bf16.msra.mxu3 %v4287_v3  ;;  %v4698_v3 = vld [vmem:[#allocation5 + $0x484] sm:$0xf0] }
 0x2ca   : > { %v1814_v29 = vadd.f32 %v1813_v58, %v5558_v46  ;;  %v1763_v7 = vadd.f32 %v1762_v2, %v1714_v42  ;;  %v4699_v42 = vld [vmem:[#allocation5 + $0x494] sm:$0xf] }
 0x2cb   : > { %v1865_v35 = vpop.f32.mrf.mxu1 }
 0x2cc   : > { %v1863_v40 = vadd.f32 %v1862_v34, %v1814_v29  ;;  %v1894_v62 = vmax.f32 %v1763_v7, 0.0  ;;  %v4224_v29 = vld [vmem:[#allocation5 + $0x418] sm:$0xf0] }
 0x2cd   : > { %v4227_v60 = vor.u32 %v4683_v6, %v4224_v29 }
 0x2ce   : > { %v1897_v39 = vmax.f32 %v1863_v40, 0.0  ;;  %v4288_v40 = vld [vmem:[#allocation5 + $0x498] sm:$0xf0] }
 0x2cf   : > { %v1715_v44 = vpop.f32.mrf.mxu2  ;;  %2686 = vmatpush.bf16.msrb.mxu0 %v4227_v60 }
 0x2d0   : > { %v1716_v16 = vadd.f32 %v1715_v44, %v5562_v61  ;;  %v1915_v27 = vpack.c.bf16 %v1897_v39, %v1895_v23  ;;  %v4291_v39 = vor.u32 %v4699_v42, %v4288_v40  ;;  %v5607_v40 = vld [vmem:[%s6010_s3] sm:$0x7f] }
 0x2d1   : > { %v1816_v15 = vpop.f32.mrf.mxu0  ;;  %v1767_v50 = vpop.f32.mrf.mxu3 }
 0x2d2   : > { %v1765_v22 = vadd.f32 %v1764_v25, %v1716_v16  ;;  %2167 = vmatmul.bf16.gmra.mxu3 %v1915_v27  ;;  %2265 = vmatmul.bf16.gmra.mxu1 %v1915_v27  ;;  %v1817_v4 = vadd.f32 %v1816_v15, %v5558_v46  ;;  %v4278_v27 = vld [vmem:[#allocation5 + $0x480] sm:$0xf] }
 0x2d3   : > { %v1867_v58 = vpop.f32.mrf.mxu1  ;;  %2735 = vmatpush.bf16.msrb.mxu1 %v4291_v39 }
 0x2d4   : > { %v1896_v57 = vmax.f32 %v1765_v22, 0.0  ;;  %v1866_v30 = vadd.f32 %v1865_v35, %v1817_v4  ;;  %v4697_v35 = vld [vmem:[#allocation5 + $0x484] sm:$0xf] }
 0x2d6   : > { %v1914_v34 = vpack.c.bf16 %v1896_v57, %v1894_v62  ;;  %v1899_v25 = vmax.f32 %v1866_v30, 0.0  ;;  %v4279_v62 = vor.u32 %v4698_v3, %v4278_v27  ;;  %v4280_v57 = vld [vmem:[#allocation5 + $0x488] sm:$0xf0] }
 0x2d7   : > { %v1718_v8 = vpop.f32.mrf.mxu2  ;;  %v4283_v4 = vor.u32 %v4697_v35, %v4280_v57  ;;  %v4216_v30 = vld [vmem:[#allocation5 + $0x408] sm:$0xf0] }
 0x2d8   : > { %2118 = vmatmul.bf16.gmra.mxu2 %v1914_v34  ;;  %2216 = vmatmul.bf16.gmra.mxu0 %v1914_v34  ;;  %v1719_v37 = vadd.f32 %v1718_v8, %v5562_v61  ;;  %v4214_v8 = vld [vmem:[#allocation5 + $0x400] sm:$0xf] }
 0x2d9   : > { %v1818_v2 = vpop.f32.mrf.mxu0  ;;  %2638 = vmatpush.bf16.msra.mxu3 %v4279_v62  ;;  %2736 = vmatpush.bf16.msrb.mxu1 %v4283_v4 }
 0x2da   : > { %v1819_v10 = vadd.f32 %v1818_v2, %v5558_v46  ;;  %v1768_v31 = vadd.f32 %v1767_v50, %v1719_v37  ;;  %v1769_v46 = vpop.f32.mrf.mxu3  ;;  %v4682_v2 = vld [vmem:[#allocation5 + $0x404] sm:$0xf0] }
 0x2db   : > { %v4215_v50 = vor.u32 %v4682_v2, %v4214_v8  ;;  %v5598_v37 = vld [vmem:[%s6010_s3 + $0x8] sm:$0x7f] }
 0x2dc   : > { %v1868_v54 = vadd.f32 %v1867_v58, %v1819_v10  ;;  %v1898_v15 = vmax.f32 %v1768_v31, 0.0 }
 0x2dd   : > { %2589 = vmatpush.bf16.msra.mxu2 %v4215_v50 }
 0x2de   : > { %v1901_v23 = vmax.f32 %v1868_v54, 0.0  ;;  %v5601_v54 = vperm.slane %v5598_v37, 4 }
 0x2df   : > { %v1720_v44 = vpop.f32.mrf.mxu2 }
 0x2e0   : > { %v1721_v0 = vadd.f32 %v1720_v44, %v5562_v61  ;;  %v1917_v7 = vpack.c.bf16 %v1901_v23, %v1899_v25  ;;  %v4681_v61 = vld [vmem:[#allocation5 + $0x404] sm:$0xf]  ;;  %v5610_v25 = vperm.slane %v5607_v40, 4 }
 0x2e1   : > { %v4219_v10 = vor.u32 %v4681_v61, %v4216_v30 }
 0x2e2   : > { %v1770_v16 = vadd.f32 %v1769_v46, %v1721_v0  ;;  %2172 = vmatmul.bf16.gmra.mxu3 %v1917_v7  ;;  %2270 = vmatmul.bf16.gmra.mxu1 %v1917_v7 }
 0x2e3   : > { %2687 = vmatpush.bf16.msrb.mxu0 %v4219_v10 }
 0x2e4   : > { %v1900_v22 = vmax.f32 %v1770_v16, 0.0 }
 0x2e6   : > { %v1916_v34 = vpack.c.bf16 %v1900_v22, %v1898_v15  ;;  %v4398_v15 = vld [vmem:[#allocation5 + $0x570] sm:$0xf]  ;;  %v4728_v22 = vld [vmem:[#allocation5 + $0x574] sm:$0xf0] }
 0x2e7   : > { %v4399_v57 = vor.u32 %v4728_v22, %v4398_v15 }
 0x2e8   : > { %2123 = vmatmul.bf16.gmra.mxu2 %v1916_v34  ;;  %2221 = vmatmul.bf16.gmra.mxu0 %v1916_v34 }
 0x2e9   : > { %2988 = vmatpush.bf16.msrb.mxu2 %v4399_v57 }
 0x2ef   : > { %v2236_v58 = vpop.f32.mrf.mxu1 }
 0x2f5   : > { %v2138_v6 = vpop.f32.mrf.mxu3  ;;  %v2187_v29 = vpop.f32.mrf.mxu0 }
 0x2f6   : > { %v2188_v42 = vadd.f32 %v2187_v29, %v5601_v54 }
 0x2f7   : > { %v2238_v60 = vpop.f32.mrf.mxu1 }
 0x2f8   : > { %v2237_v39 = vadd.f32 %v2236_v58, %v2188_v42 }
 0x2fa   : > { %v2277_v16 = vmax.f32 %v2237_v39, 0.0 }
 0x2fb   : > { %v2089_v23 = vpop.f32.mrf.mxu2 }
 0x2fc   : > { %v2090_v0 = vadd.f32 %v2089_v23, %v5610_v25  ;;  %v5615_v4 = vadd.f32 %v2277_v16, %v5370_v5  ;;  %v4462_v5 = vld [vmem:[#allocation5 + $0x5f0] sm:$0xf] }
 0x2fd   : > { %v2140_v44 = vpop.f32.mrf.mxu3  ;;  %v2189_v31 = vpop.f32.mrf.mxu0 }
 0x2fe   : > { %v2190_v7 = vadd.f32 %v2189_v31, %v5601_v54  ;;  %v2139_v3 = vadd.f32 %v2138_v6, %v2090_v0  ;;  %v4727_v0 = vld [vmem:[#allocation5 + $0x574] sm:$0xf] }
 0x2ff   : > { %v2241_v46 = vpop.f32.mrf.mxu1 }
 0x300   : > { %v2239_v27 = vadd.f32 %v2238_v60, %v2190_v7  ;;  %v2276_v61 = vmax.f32 %v2139_v3, 0.0  ;;  %v4744_v60 = vld [vmem:[#allocation5 + $0x5f4] sm:$0xf0]  ;;  %v4400_v7 = vld [vmem:[#allocation5 + $0x578] sm:$0xf0] }
 0x301   : > { %v4403_v3 = vor.u32 %v4727_v0, %v4400_v7  ;;  %v4454_v7 = vld [vmem:[#allocation5 + $0x5e0] sm:$0xf] }
 0x302   : > { %v2279_v35 = vmax.f32 %v2239_v27, 0.0  ;;  %v5625_v42 = vadd.f32 %v2276_v61, %v5382_v52 }
 0x303   : > { %v2091_v62 = vpop.f32.mrf.mxu2  ;;  %3086 = vmatpush.bf16.msra.mxu0 %v4403_v3 }
 0x304   : > { %v5618_v34 = vadd.f32 %v2279_v35, %v5374_v63  ;;  %v2092_v8 = vadd.f32 %v2091_v62, %v5610_v25  ;;  %v4463_v63 = vor.u32 %v4744_v60, %v4462_v5 }
 0x305   : > { %v2143_v2 = vpop.f32.mrf.mxu3  ;;  %v2192_v50 = vpop.f32.mrf.mxu0 }
 0x306   : > { %v2405_v30 = vpack.c.bf16 %v5618_v34, %v5615_v4  ;;  %v2141_v10 = vadd.f32 %v2140_v44, %v2092_v8  ;;  %v2193_v29 = vadd.f32 %v2192_v50, %v5601_v54  ;;  %3037 = vmatpush.bf16.msrb.mxu3 %v4463_v63  ;;  %v4743_v8 = vld [vmem:[#allocation5 + $0x5f4] sm:$0xf]  ;;  %v4464_v50 = vld [vmem:[#allocation5 + $0x5f8] sm:$0xf0] }
 0x307   : > { %v2243_v58 = vpop.f32.mrf.mxu1  ;;  %v4467_v61 = vor.u32 %v4743_v8, %v4464_v50 }
 0x308   : > { %v2278_v6 = vmax.f32 %v2141_v10, 0.0  ;;  %2639 = vmatmul.bf16.vlgmr.msra.gmra.mxu3 %v2405_v30  ;;  %2737 = vmatmul.bf16.vlgmr.msrb.gmra.mxu1 %v2405_v30  ;;  %v2242_v31 = vadd.f32 %v2241_v46, %v2193_v29  ;;  %v4390_v30 = vld [vmem:[#allocation5 + $0x560] sm:$0xf]  ;;  %v4726_v10 = vld [vmem:[#allocation5 + $0x564] sm:$0xf0] }
 0x309   : > { %v4391_v60 = vor.u32 %v4726_v10, %v4390_v30  ;;  %3135 = vmatpush.bf16.msra.mxu1 %v4467_v61 }
 0x30a   : > { %v5628_v23 = vadd.f32 %v2278_v6, %v5386_v56  ;;  %v2281_v56 = vmax.f32 %v2242_v31, 0.0 }
 0x30b   : > { %v2094_v39 = vpop.f32.mrf.mxu2  ;;  %2989 = vmatpush.bf16.msrb.mxu2 %v4391_v60  ;;  %v4456_v60 = vld [vmem:[#allocation5 + $0x5e8] sm:$0xf0] }
 0x30c   : > { %v2404_v44 = vpack.c.bf16 %v5628_v23, %v5625_v42  ;;  %v2095_v35 = vadd.f32 %v2094_v39, %v5610_v25  ;;  %v5635_v6 = vadd.f32 %v2281_v56, %v5394_v20 }
 0x30d   : > { %v2145_v16 = vpop.f32.mrf.mxu3  ;;  %v2194_v27 = vpop.f32.mrf.mxu0 }
 0x30e   : > { %v2195_v15 = vadd.f32 %v2194_v27, %v5601_v54  ;;  %2590 = vmatmul.bf16.vlgmr.msra.gmra.mxu2 %v2404_v44  ;;  %2688 = vmatmul.bf16.vlgmr.msrb.gmra.mxu0 %v2404_v44  ;;  %v2144_v62 = vadd.f32 %v2143_v2, %v2095_v35  ;;  %v4742_v27 = vld [vmem:[#allocation5 + $0x5e4] sm:$0xf0] }
 0x30f   : > { %v2246_v52 = vpop.f32.mrf.mxu1 }
 0x310   : > { %v2244_v22 = vadd.f32 %v2243_v58, %v2195_v15  ;;  %v2280_v2 = vmax.f32 %v2144_v62, 0.0  ;;  %v4392_v62 = vld [vmem:[#allocation5 + $0x568] sm:$0xf0] }
 0x312   : > { %v2283_v57 = vmax.f32 %v2244_v22, 0.0  ;;  %v5645_v3 = vadd.f32 %v2280_v2, %v5406_v24  ;;  %v4725_v22 = vld [vmem:[#allocation5 + $0x564] sm:$0xf] }
 0x313   : > { %v2096_v46 = vpop.f32.mrf.mxu2  ;;  %v4395_v50 = vor.u32 %v4725_v22, %v4392_v62  ;;  %v4446_v62 = vld [vmem:[#allocation5 + $0x5d0] sm:$0xf] }
 0x314   : > { %v2097_v29 = vadd.f32 %v2096_v46, %v5610_v25  ;;  %v5639_v5 = vadd.f32 %v2283_v57, %v5399_v21  ;;  %v4455_v21 = vor.u32 %v4742_v27, %v4454_v7 }
 0x315   : > { %v2148_v63 = vpop.f32.mrf.mxu3  ;;  %v2197_v39 = vpop.f32.mrf.mxu0  ;;  %3087 = vmatpush.bf16.msra.mxu0 %v4395_v50 }
 0x316   : > { %v2146_v58 = vadd.f32 %v2145_v16, %v2097_v29  ;;  %v2407_v44 = vpack.c.bf16 %v5639_v5, %v5635_v6  ;;  %v2198_v20 = vadd.f32 %v2197_v39, %v5601_v54  ;;  %3038 = vmatpush.bf16.msrb.mxu3 %v4455_v21  ;;  %v4741_v29 = vld [vmem:[#allocation5 + $0x5e4] sm:$0xf] }
 0x317   : > { %v2248_v31 = vpop.f32.mrf.mxu1  ;;  %v4459_v2 = vor.u32 %v4741_v29, %v4456_v60 }
 0x318   : > { %v2282_v0 = vmax.f32 %v2146_v58, 0.0  ;;  %2644 = vmatmul.bf16.gmra.mxu3 %v2407_v44  ;;  %2742 = vmatmul.bf16.gmra.mxu1 %v2407_v44  ;;  %v2247_v15 = vadd.f32 %v2246_v52, %v2198_v20  ;;  %v4382_v58 = vld [vmem:[#allocation5 + $0x550] sm:$0xf]  ;;  %v4724_v44 = vld [vmem:[#allocation5 + $0x554] sm:$0xf0] }
 0x319   : > { %v4383_v27 = vor.u32 %v4724_v44, %v4382_v58  ;;  %3136 = vmatpush.bf16.msra.mxu1 %v4459_v2 }
 0x31a   : > { %v5648_v35 = vadd.f32 %v2282_v0, %v5410_v48  ;;  %v2285_v48 = vmax.f32 %v2247_v15, 0.0 }
 0x31b   : > { %v2099_v16 = vpop.f32.mrf.mxu2  ;;  %2990 = vmatpush.bf16.msrb.mxu2 %v4383_v27  ;;  %v4448_v27 = vld [vmem:[#allocation5 + $0x5d8] sm:$0xf0] }
 0x31c   : > { %v2406_v56 = vpack.c.bf16 %v5648_v35, %v5645_v3  ;;  %v2100_v46 = vadd.f32 %v2099_v16, %v5610_v25  ;;  %v5655_v0 = vadd.f32 %v2285_v48, %v5418_v43 }
 0x31d   : > { %v2150_v57 = vpop.f32.mrf.mxu3  ;;  %v2199_v8 = vpop.f32.mrf.mxu0 }
 0x31e   : > { %v2200_v61 = vadd.f32 %v2199_v8, %v5601_v54  ;;  %2595 = vmatmul.bf16.gmra.mxu2 %v2406_v56  ;;  %2693 = vmatmul.bf16.gmra.mxu0 %v2406_v56  ;;  %v2149_v10 = vadd.f32 %v2148_v63, %v2100_v46  ;;  %v4740_v8 = vld [vmem:[#allocation5 + $0x5d4] sm:$0xf0] }
 0x31f   : > { %v2251_v24 = vpop.f32.mrf.mxu1 }
 0x320   : > { %v2249_v30 = vadd.f32 %v2248_v31, %v2200_v61  ;;  %v2284_v63 = vmax.f32 %v2149_v10, 0.0  ;;  %v4384_v10 = vld [vmem:[#allocation5 + $0x558] sm:$0xf0] }
 0x322   : > { %v2287_v52 = vmax.f32 %v2249_v30, 0.0  ;;  %v5665_v50 = vadd.f32 %v2284_v63, %v5430_v13  ;;  %v4723_v30 = vld [vmem:[#allocation5 + $0x554] sm:$0xf] }
 0x323   : > { %v2101_v39 = vpop.f32.mrf.mxu2  ;;  %v4387_v60 = vor.u32 %v4723_v30, %v4384_v10  ;;  %v4438_v10 = vld [vmem:[#allocation5 + $0x5c0] sm:$0xf] }
 0x324   : > { %v2102_v20 = vadd.f32 %v2101_v39, %v5610_v25  ;;  %v5659_v7 = vadd.f32 %v2287_v52, %v5423_v12  ;;  %v4447_v12 = vor.u32 %v4740_v8, %v4446_v62 }
 0x325   : > { %v2153_v21 = vpop.f32.mrf.mxu3  ;;  %v2202_v16 = vpop.f32.mrf.mxu0  ;;  %3088 = vmatpush.bf16.msra.mxu0 %v4387_v60 }
 0x326   : > { %v2151_v31 = vadd.f32 %v2150_v57, %v2102_v20  ;;  %v2409_v15 = vpack.c.bf16 %v5659_v7, %v5655_v0  ;;  %v2203_v43 = vadd.f32 %v2202_v16, %v5601_v54  ;;  %3039 = vmatpush.bf16.msrb.mxu3 %v4447_v12  ;;  %v4739_v20 = vld [vmem:[#allocation5 + $0x5d4] sm:$0xf] }
 0x327   : > { %v2253_v56 = vpop.f32.mrf.mxu1  ;;  %v4451_v63 = vor.u32 %v4739_v20, %v4448_v27 }
 0x328   : > { %v2286_v22 = vmax.f32 %v2151_v31, 0.0  ;;  %2649 = vmatmul.bf16.gmra.mxu3 %v2409_v15  ;;  %2747 = vmatmul.bf16.gmra.mxu1 %v2409_v15  ;;  %v2252_v61 = vadd.f32 %v2251_v24, %v2203_v43  ;;  %v4374_v31 = vld [vmem:[#allocation5 + $0x540] sm:$0xf]  ;;  %v4722_v15 = vld [vmem:[#allocation5 + $0x544] sm:$0xf0] }
 0x329   : > { %v4375_v8 = vor.u32 %v4722_v15, %v4374_v31  ;;  %3137 = vmatpush.bf16.msra.mxu1 %v4451_v63 }
 0x32a   : > { %v5668_v46 = vadd.f32 %v2286_v22, %v5434_v11  ;;  %v2289_v11 = vmax.f32 %v2252_v61, 0.0 }
 0x32b   : > { %v2104_v57 = vpop.f32.mrf.mxu2  ;;  %2991 = vmatpush.bf16.msrb.mxu2 %v4375_v8  ;;  %v4440_v8 = vld [vmem:[#allocation5 + $0x5c8] sm:$0xf0] }
 0x32c   : > { %v2408_v48 = vpack.c.bf16 %v5668_v46, %v5665_v50  ;;  %v2105_v39 = vadd.f32 %v2104_v57, %v5610_v25  ;;  %v5675_v22 = vadd.f32 %v2289_v11, %v5442_v9 }
 0x32d   : > { %v2155_v52 = vpop.f32.mrf.mxu3  ;;  %v2204_v29 = vpop.f32.mrf.mxu0 }
 0x32e   : > { %v2205_v2 = vadd.f32 %v2204_v29, %v5601_v54  ;;  %2600 = vmatmul.bf16.gmra.mxu2 %v2408_v48  ;;  %2698 = vmatmul.bf16.gmra.mxu0 %v2408_v48  ;;  %v2154_v44 = vadd.f32 %v2153_v21, %v2105_v39  ;;  %v4738_v29 = vld [vmem:[#allocation5 + $0x5c4] sm:$0xf0] }
 0x32f   : > { %v2256_v13 = vpop.f32.mrf.mxu1 }
 0x330   : > { %v2254_v58 = vadd.f32 %v2253_v56, %v2205_v2  ;;  %v2288_v21 = vmax.f32 %v2154_v44, 0.0  ;;  %v4376_v44 = vld [vmem:[#allocation5 + $0x548] sm:$0xf0] }
 0x332   : > { %v2291_v24 = vmax.f32 %v2254_v58, 0.0  ;;  %v5685_v60 = vadd.f32 %v2288_v21, %v5454_v47  ;;  %v4721_v58 = vld [vmem:[#allocation5 + $0x544] sm:$0xf] }
 0x333   : > { %v2106_v16 = vpop.f32.mrf.mxu2  ;;  %v4379_v27 = vor.u32 %v4721_v58, %v4376_v44  ;;  %v4430_v44 = vld [vmem:[#allocation5 + $0x5b0] sm:$0xf] }
 0x334   : > { %v2107_v43 = vadd.f32 %v2106_v16, %v5610_v25  ;;  %v5679_v62 = vadd.f32 %v2291_v24, %v5447_v17  ;;  %v4439_v17 = vor.u32 %v4738_v29, %v4438_v10 }
 0x335   : > { %v2158_v12 = vpop.f32.mrf.mxu3  ;;  %v2207_v57 = vpop.f32.mrf.mxu0  ;;  %3089 = vmatpush.bf16.msra.mxu0 %v4379_v27 }
 0x336   : > { %v2156_v56 = vadd.f32 %v2155_v52, %v2107_v43  ;;  %v2411_v61 = vpack.c.bf16 %v5679_v62, %v5675_v22  ;;  %v2208_v9 = vadd.f32 %v2207_v57, %v5601_v54  ;;  %3040 = vmatpush.bf16.msrb.mxu3 %v4439_v17  ;;  %v4737_v43 = vld [vmem:[#allocation5 + $0x5c4] sm:$0xf] }
 0x337   : > { %v2258_v48 = vpop.f32.mrf.mxu1  ;;  %v4443_v21 = vor.u32 %v4737_v43, %v4440_v8 }
 0x338   : > { %v2290_v30 = vmax.f32 %v2156_v56, 0.0  ;;  %2654 = vmatmul.bf16.gmra.mxu3 %v2411_v61  ;;  %2752 = vmatmul.bf16.gmra.mxu1 %v2411_v61  ;;  %v2257_v2 = vadd.f32 %v2256_v13, %v2208_v9  ;;  %v4366_v56 = vld [vmem:[#allocation5 + $0x530] sm:$0xf]  ;;  %v4720_v61 = vld [vmem:[#allocation5 + $0x534] sm:$0xf0] }
 0x339   : > { %v4367_v29 = vor.u32 %v4720_v61, %v4366_v56  ;;  %3138 = vmatpush.bf16.msra.mxu1 %v4443_v21 }
 0x33a   : > { %v5688_v39 = vadd.f32 %v2290_v30, %v5458_v45  ;;  %v2293_v45 = vmax.f32 %v2257_v2, 0.0 }
 0x33b   : > { %v2109_v52 = vpop.f32.mrf.mxu2  ;;  %2992 = vmatpush.bf16.msrb.mxu2 %v4367_v29  ;;  %v4432_v29 = vld [vmem:[#allocation5 + $0x5b8] sm:$0xf0] }
 0x33c   : > { %v2410_v11 = vpack.c.bf16 %v5688_v39, %v5685_v60  ;;  %v2110_v16 = vadd.f32 %v2109_v52, %v5610_v25  ;;  %v5695_v30 = vadd.f32 %v2293_v45, %v5466_v51 }
 0x33d   : > { %v2160_v24 = vpop.f32.mrf.mxu3  ;;  %v2209_v20 = vpop.f32.mrf.mxu0 }
 0x33e   : > { %v2210_v63 = vadd.f32 %v2209_v20, %v5601_v54  ;;  %2605 = vmatmul.bf16.gmra.mxu2 %v2410_v11  ;;  %2703 = vmatmul.bf16.gmra.mxu0 %v2410_v11  ;;  %v2159_v15 = vadd.f32 %v2158_v12, %v2110_v16  ;;  %v4736_v20 = vld [vmem:[#allocation5 + $0x5b4] sm:$0xf0] }
 0x33f   : > { %v2261_v47 = vpop.f32.mrf.mxu1 }
 0x340   : > { %v2259_v31 = vadd.f32 %v2258_v48, %v2210_v63  ;;  %v2292_v12 = vmax.f32 %v2159_v15, 0.0  ;;  %v4368_v15 = vld [vmem:[#allocation5 + $0x538] sm:$0xf0] }
 0x342   : > { %v2295_v13 = vmax.f32 %v2259_v31, 0.0  ;;  %v5705_v27 = vadd.f32 %v2292_v12, %v5478_v53  ;;  %v4719_v31 = vld [vmem:[#allocation5 + $0x534] sm:$0xf] }
 0x343   : > { %v2111_v57 = vpop.f32.mrf.mxu2  ;;  %v4371_v8 = vor.u32 %v4719_v31, %v4368_v15  ;;  %v4734_v15 = vld [vmem:[#allocation5 + $0x5a4] sm:$0xf0] }
 0x344   : > { %v2112_v9 = vadd.f32 %v2111_v57, %v5610_v25  ;;  %v5699_v10 = vadd.f32 %v2295_v13, %v5471_v59  ;;  %v4431_v59 = vor.u32 %v4736_v20, %v4430_v44 }
 0x345   : > { %v2163_v17 = vpop.f32.mrf.mxu3  ;;  %v2212_v52 = vpop.f32.mrf.mxu0  ;;  %3090 = vmatpush.bf16.msra.mxu0 %v4371_v8  ;;  %v4360_v8 = vld [vmem:[#allocation5 + $0x528] sm:$0xf0] }
 0x346   : > { %v2161_v48 = vadd.f32 %v2160_v24, %v2112_v9  ;;  %v2413_v2 = vpack.c.bf16 %v5699_v10, %v5695_v30  ;;  %v2213_v51 = vadd.f32 %v2212_v52, %v5601_v54  ;;  %3041 = vmatpush.bf16.msrb.mxu3 %v4431_v59  ;;  %v4735_v9 = vld [vmem:[#allocation5 + $0x5b4] sm:$0xf] }
 0x347   : > { %v2263_v11 = vpop.f32.mrf.mxu1  ;;  %v4435_v12 = vor.u32 %v4735_v9, %v4432_v29 }
 0x348   : > { %v2294_v58 = vmax.f32 %v2161_v48, 0.0  ;;  %2659 = vmatmul.bf16.gmra.mxu3 %v2413_v2  ;;  %2757 = vmatmul.bf16.gmra.mxu1 %v2413_v2  ;;  %v2262_v63 = vadd.f32 %v2261_v47, %v2213_v51  ;;  %v4358_v48 = vld [vmem:[#allocation5 + $0x520] sm:$0xf]  ;;  %v4718_v2 = vld [vmem:[#allocation5 + $0x524] sm:$0xf0] }
 0x349   : > { %v4359_v20 = vor.u32 %v4718_v2, %v4358_v48  ;;  %3139 = vmatpush.bf16.msra.mxu1 %v4435_v12  ;;  %v4716_v2 = vld [vmem:[#allocation5 + $0x514] sm:$0xf0] }
 0x34a   : > { %v5708_v16 = vadd.f32 %v2294_v58, %v5482_v14  ;;  %v2297_v53 = vmax.f32 %v2262_v63, 0.0 }
 0x34b   : > { %v2114_v24 = vpop.f32.mrf.mxu2  ;;  %2993 = vmatpush.bf16.msrb.mxu2 %v4359_v20 }
 0x34c   : > { %v2412_v45 = vpack.c.bf16 %v5708_v16, %v5705_v27  ;;  %v2115_v57 = vadd.f32 %v2114_v24, %v5610_v25  ;;  %v5715_v58 = vadd.f32 %v2297_v53, %v5490_v33  ;;  %v4422_v33 = vld [vmem:[#allocation5 + $0x5a0] sm:$0xf] }
 0x34d   : > { %v2165_v13 = vpop.f32.mrf.mxu3  ;;  %v2214_v43 = vpop.f32.mrf.mxu0 }
 0x34e   : > { %v2215_v21 = vadd.f32 %v2214_v43, %v5601_v54  ;;  %2610 = vmatmul.bf16.gmra.mxu2 %v2412_v45  ;;  %2708 = vmatmul.bf16.gmra.mxu0 %v2412_v45  ;;  %v2164_v61 = vadd.f32 %v2163_v17, %v2115_v57  ;;  %v4423_v43 = vor.u32 %v4734_v15, %v4422_v33  ;;  %v4733_v57 = vld [vmem:[#allocation5 + $0x5a4] sm:$0xf] }
 0x34f   : > { %v2266_v56 = vpop.f32.mrf.mxu1 }
 0x350   : > { %v2264_v14 = vadd.f32 %v2263_v11, %v2215_v21  ;;  %v2296_v11 = vmax.f32 %v2164_v61, 0.0  ;;  %3042 = vmatpush.bf16.msrb.mxu3 %v4423_v43 }
 0x352   : > { %v2299_v47 = vmax.f32 %v2264_v14, 0.0  ;;  %v5725_v21 = vadd.f32 %v2296_v11, %v5502_v18  ;;  %v4424_v14 = vld [vmem:[#allocation5 + $0x5a8] sm:$0xf0] }
 0x353   : > { %v2116_v52 = vpop.f32.mrf.mxu2  ;;  %v4427_v9 = vor.u32 %v4733_v57, %v4424_v14  ;;  %v4352_v14 = vld [vmem:[#allocation5 + $0x518] sm:$0xf0] }
 0x354   : > { %v2117_v51 = vadd.f32 %v2116_v52, %v5610_v25  ;;  %v5719_v44 = vadd.f32 %v2299_v47, %v5495_v38  ;;  %v4717_v38 = vld [vmem:[#allocation5 + $0x524] sm:$0xf] }
 0x355   : > { %v2217_v59 = vpop.f32.mrf.mxu0  ;;  %v2168_v63 = vpop.f32.mrf.mxu3  ;;  %v4363_v53 = vor.u32 %v4717_v38, %v4360_v8  ;;  %3140 = vmatpush.bf16.msra.mxu1 %v4427_v9 }
 0x356   : > { %v2166_v17 = vadd.f32 %v2165_v13, %v2117_v51  ;;  %v2415_v24 = vpack.c.bf16 %v5719_v44, %v5715_v58  ;;  %v2218_v31 = vadd.f32 %v2217_v59, %v5601_v54  ;;  %v4414_v51 = vld [vmem:[#allocation5 + $0x590] sm:$0xf]  ;;  %v4732_v59 = vld [vmem:[#allocation5 + $0x594] sm:$0xf0] }
 0x357   : > { %v2268_v61 = vpop.f32.mrf.mxu1  ;;  %3091 = vmatpush.bf16.msra.mxu0 %v4363_v53  ;;  %v4715_v53 = vld [vmem:[#allocation5 + $0x514] sm:$0xf] }
 0x358   : > { %v2298_v45 = vmax.f32 %v2166_v17, 0.0  ;;  %2664 = vmatmul.bf16.gmra.mxu3 %v2415_v24  ;;  %2762 = vmatmul.bf16.gmra.mxu1 %v2415_v24  ;;  %v2267_v29 = vadd.f32 %v2266_v56, %v2218_v31  ;;  %v4415_v56 = vor.u32 %v4732_v59, %v4414_v51  ;;  %v4355_v9 = vor.u32 %v4715_v53, %v4352_v14 }
 0x35a   : > { %v5728_v13 = vadd.f32 %v2298_v45, %v5506_v49  ;;  %v4350_v49 = vld [vmem:[#allocation5 + $0x510] sm:$0xf]  ;;  %v2301_v11 = vmax.f32 %v2267_v29, 0.0  ;;  %3043 = vmatpush.bf16.msrb.mxu3 %v4415_v56  ;;  %v4416_v56 = vld [vmem:[#allocation5 + $0x598] sm:$0xf0] }
 0x35b   : > { %v2119_v47 = vpop.f32.mrf.mxu2  ;;  %v4351_v20 = vor.u32 %v4716_v2, %v4350_v49  ;;  %3092 = vmatpush.bf16.msra.mxu0 %v4355_v9  ;;  %v4406_v9 = vld [vmem:[#allocation5 + $0x580] sm:$0xf] }
 0x35c   : > { %v2414_v52 = vpack.c.bf16 %v5728_v13, %v5725_v21  ;;  %v2120_v48 = vadd.f32 %v2119_v47, %v5610_v25  ;;  %v5735_v15 = vadd.f32 %v2301_v11, %v5514_v28 }
 0x35d   : > { %v2219_v12 = vpop.f32.mrf.mxu0  ;;  %v2170_v24 = vpop.f32.mrf.mxu3  ;;  %2994 = vmatpush.bf16.msrb.mxu2 %v4351_v20 }
 0x35e   : > { %v2220_v18 = vadd.f32 %v2219_v12, %v5601_v54  ;;  %2615 = vmatmul.bf16.gmra.mxu2 %v2414_v52  ;;  %2713 = vmatmul.bf16.gmra.mxu0 %v2414_v52  ;;  %v2169_v45 = vadd.f32 %v2168_v63, %v2120_v48 }
 0x35f   : > { %v2271_v8 = vpop.f32.mrf.mxu1 }
 0x360   : > { %v2269_v17 = vadd.f32 %v2268_v61, %v2220_v18  ;;  %v2300_v61 = vmax.f32 %v2169_v45, 0.0 }
 0x362   : > { %v2303_v31 = vmax.f32 %v2269_v17, 0.0  ;;  %v5745_v28 = vadd.f32 %v2300_v61, %v5526_v26  ;;  %v4731_v17 = vld [vmem:[#allocation5 + $0x594] sm:$0xf]  ;;  %v4342_v61 = vld [vmem:[#allocation5 + $0x500] sm:$0xf] }
 0x363   : > { %v2121_v33 = vpop.f32.mrf.mxu2 }
 0x364   : > { %v2122_v43 = vadd.f32 %v2121_v33, %v5610_v25  ;;  %v5739_v38 = vadd.f32 %v2303_v31, %v5519_v55 }
 0x365   : > { %v2222_v57 = vpop.f32.mrf.mxu0  ;;  %v2173_v12 = vpop.f32.mrf.mxu3 }
 0x366   : > { %v2171_v47 = vadd.f32 %v2170_v24, %v2122_v43  ;;  %v2417_v63 = vpack.c.bf16 %v5739_v38, %v5735_v15  ;;  %v2223_v52 = vadd.f32 %v2222_v57, %v5601_v54 }
 0x367   : > { %v2273_v59 = vpop.f32.mrf.mxu1 }
 0x368   : > { %v2302_v29 = vmax.f32 %v2171_v47, 0.0  ;;  %2669 = vmatmul.bf16.gmra.mxu3 %v2417_v63  ;;  %2767 = vmatmul.bf16.gmra.mxu1 %v2417_v63  ;;  %v2272_v18 = vadd.f32 %v2271_v8, %v2223_v52  ;;  %v4714_v47 = vld [vmem:[#allocation5 + $0x504] sm:$0xf0]  ;;  %v4729_v52 = vld [vmem:[#allocation5 + $0x584] sm:$0xf] }
 0x369   : > { %v4343_v63 = vor.u32 %v4714_v47, %v4342_v61 }
 0x36a   : > { %v5748_v55 = vadd.f32 %v2302_v29, %v5530_v32  ;;  %v2305_v11 = vmax.f32 %v2272_v18, 0.0  ;;  %v4419_v32 = vor.u32 %v4731_v17, %v4416_v56  ;;  %v4730_v29 = vld [vmem:[#allocation5 + $0x584] sm:$0xf0] }
 0x36b   : > { %v2124_v48 = vpop.f32.mrf.mxu2  ;;  %2995 = vmatpush.bf16.msrb.mxu2 %v4343_v63 }
 0x36c   : > { %v2416_v49 = vpack.c.bf16 %v5748_v55, %v5745_v28  ;;  %v2125_v51 = vadd.f32 %v2124_v48, %v5610_v25  ;;  %3141 = vmatpush.bf16.msra.mxu1 %v4419_v32  ;;  %v5755_v33 = vadd.f32 %v2305_v11, %v5538_v41  ;;  %v4407_v41 = vor.u32 %v4730_v29, %v4406_v9 }
 0x36d   : > { %v2224_v2 = vpop.f32.mrf.mxu0  ;;  %v5776_v32 = vperm.slane %v5607_v40, 5 }
 0x36e   : > { %v2225_v20 = vadd.f32 %v2224_v2, %v5601_v54  ;;  %2620 = vmatmul.bf16.gmra.mxu2 %v2416_v49  ;;  %2718 = vmatmul.bf16.gmra.mxu0 %v2416_v49  ;;  %v2174_v24 = vadd.f32 %v2173_v12, %v2125_v51  ;;  %v2175_v54 = vpop.f32.mrf.mxu3  ;;  %v4713_v2 = vld [vmem:[#allocation5 + $0x504] sm:$0xf]  ;;  %v4344_v51 = vld [vmem:[#allocation5 + $0x508] sm:$0xf0] }
 0x36f   : > { %3044 = vmatpush.bf16.msrb.mxu3 %v4407_v41 }
 0x370   : > { %v2274_v26 = vadd.f32 %v2273_v59, %v2225_v20  ;;  %v2304_v57 = vmax.f32 %v2174_v24, 0.0  ;;  %v4347_v20 = vor.u32 %v4713_v2, %v4344_v51 }
 0x372   : > { %v2307_v45 = vmax.f32 %v2274_v26, 0.0  ;;  %v5764_v48 = vadd.f32 %v2304_v57, %v5549_v36  ;;  %3093 = vmatpush.bf16.msra.mxu0 %v4347_v20  ;;  %v5772_v36 = vperm.slane %v5598_v37, 5  ;;  %v4752_v37 = vld [vmem:[%s6011_s4 + $0x38] sm:$0xff] }
 0x373   : > { %v2126_v31 = vpop.f32.mrf.mxu2  ;;  %3395 = vmatpush.bf16.msra.mxu2 %v4752_v37 }
 0x374   : > { %v2127_v43 = vadd.f32 %v2126_v31, %v5610_v25  ;;  %v5759_v8 = vadd.f32 %v2307_v45, %v5543_v19  ;;  %v4408_v25 = vld [vmem:[#allocation5 + $0x588] sm:$0xf0] }
 0x375   : > { %v4411_v19 = vor.u32 %v4729_v52, %v4408_v25 }
 0x376   : > { %v2176_v53 = vadd.f32 %v2175_v54, %v2127_v43  ;;  %v2419_v14 = vpack.c.bf16 %v5759_v8, %v5755_v33 }
 0x377   : > { %3142 = vmatpush.bf16.msra.mxu1 %v4411_v19 }
 0x378   : > { %v2306_v12 = vmax.f32 %v2176_v53, 0.0  ;;  %2674 = vmatmul.bf16.gmra.mxu3 %v2419_v14  ;;  %2772 = vmatmul.bf16.gmra.mxu1 %v2419_v14 }
 0x37a   : > { %v5767_v18 = vadd.f32 %v2306_v12, %v5553_v1 }
 0x37c   : > { %v2418_v49 = vpack.c.bf16 %v5767_v18, %v5764_v48 }
 0x37e   : > { %2625 = vmatmul.bf16.gmra.mxu2 %v2418_v49  ;;  %2723 = vmatmul.bf16.gmra.mxu0 %v2418_v49  ;;  %v4760_v49 = vld [vmem:[%s6011_s4 + $0x78] sm:$0xff] }
 0x37f   : > { %3444 = vmatpush.bf16.msra.mxu3 %v4760_v49 }
 0x385   : > { %v2738_v59 = vpop.f32.mrf.mxu1 }
 0x38b   : > { %v2640_v11 = vpop.f32.mrf.mxu3  ;;  %v2689_v26 = vpop.f32.mrf.mxu0 }
 0x38c   : > { %v2690_v1 = vadd.f32 %v2689_v26, %v5772_v36 }
 0x38d   : > { %v2740_v17 = vpop.f32.mrf.mxu1 }
 0x38e   : > { %v2739_v31 = vadd.f32 %v2738_v59, %v2690_v1 }
 0x390   : > { %v2779_v14 = vmax.f32 %v2739_v31, 0.0 }
 0x391   : > { %v2591_v56 = vpop.f32.mrf.mxu2 }
 0x392   : > { %v2592_v57 = vadd.f32 %v2591_v56, %v5776_v32 }
 0x393   : > { %v2642_v24 = vpop.f32.mrf.mxu3  ;;  %v2691_v45 = vpop.f32.mrf.mxu0 }
 0x394   : > { %v2692_v43 = vadd.f32 %v2691_v45, %v5772_v36  ;;  %v2641_v63 = vadd.f32 %v2640_v11, %v2592_v57 }
 0x395   : > { %v2743_v54 = vpop.f32.mrf.mxu1 }
 0x396   : > { %v2741_v53 = vadd.f32 %v2740_v17, %v2692_v43  ;;  %v2778_v25 = vmax.f32 %v2641_v63, 0.0  ;;  %v4751_v43 = vld [vmem:[%s6011_s4 + $0x30] sm:$0xff] }
 0x397   : > { %3396 = vmatpush.bf16.msra.mxu2 %v4751_v43 }
 0x398   : > { %v2781_v61 = vmax.f32 %v2741_v53, 0.0 }
 0x399   : > { %v2593_v47 = vpop.f32.mrf.mxu2 }
 0x39a   : > { %v2811_v9 = vpack.c.bf16 %v2781_v61, %v2779_v14  ;;  %v2594_v40 = vadd.f32 %v2593_v47, %v5776_v32 }
 0x39b   : > { %v2645_v29 = vpop.f32.mrf.mxu3  ;;  %v2694_v52 = vpop.f32.mrf.mxu0 }
 0x39c   : > { %v2643_v12 = vadd.f32 %v2642_v24, %v2594_v40  ;;  %3045 = vmatmul.bf16.vlgmr.msrb.gmra.mxu3 %v2811_v9  ;;  %3143 = vmatmul.bf16.vlgmr.msra.gmra.mxu1 %v2811_v9  ;;  %v2695_v51 = vadd.f32 %v2694_v52, %v5772_v36  ;;  %v4759_v52 = vld [vmem:[%s6011_s4 + $0x70] sm:$0xff] }
 0x39d   : > { %v2745_v41 = vpop.f32.mrf.mxu1  ;;  %3445 = vmatpush.bf16.msra.mxu3 %v4759_v52 }
 0x39e   : > { %v2780_v19 = vmax.f32 %v2643_v12, 0.0  ;;  %v2744_v26 = vadd.f32 %v2743_v54, %v2695_v51 }
 0x3a0   : > { %v2810_v2 = vpack.c.bf16 %v2780_v19, %v2778_v25  ;;  %v2783_v45 = vmax.f32 %v2744_v26, 0.0 }
 0x3a1   : > { %v2596_v20 = vpop.f32.mrf.mxu2 }
 0x3a2   : > { %2996 = vmatmul.bf16.vlgmr.msrb.gmra.mxu2 %v2810_v2  ;;  %3094 = vmatmul.bf16.vlgmr.msra.gmra.mxu0 %v2810_v2  ;;  %v2597_v56 = vadd.f32 %v2596_v20, %v5776_v32 }
 0x3a3   : > { %v2647_v59 = vpop.f32.mrf.mxu3  ;;  %v2696_v11 = vpop.f32.mrf.mxu0 }
 0x3a4   : > { %v2697_v17 = vadd.f32 %v2696_v11, %v5772_v36  ;;  %v2646_v53 = vadd.f32 %v2645_v29, %v2597_v56 }
 0x3a5   : > { %v2748_v1 = vpop.f32.mrf.mxu1 }
 0x3a6   : > { %v2746_v24 = vadd.f32 %v2745_v41, %v2697_v17  ;;  %v2782_v9 = vmax.f32 %v2646_v53, 0.0  ;;  %v4750_v17 = vld [vmem:[%s6011_s4 + $0x28] sm:$0xff] }
 0x3a7   : > { %3397 = vmatpush.bf16.msra.mxu2 %v4750_v17 }
 0x3a8   : > { %v2785_v31 = vmax.f32 %v2746_v24, 0.0 }
 0x3a9   : > { %v2598_v57 = vpop.f32.mrf.mxu2 }
 0x3aa   : > { %v2599_v14 = vadd.f32 %v2598_v57, %v5776_v32  ;;  %v2813_v61 = vpack.c.bf16 %v2785_v31, %v2783_v45 }
 0x3ab   : > { %v2650_v37 = vpop.f32.mrf.mxu3  ;;  %v2699_v54 = vpop.f32.mrf.mxu0 }
 0x3ac   : > { %v2648_v47 = vadd.f32 %v2647_v59, %v2599_v14  ;;  %3050 = vmatmul.bf16.gmra.mxu3 %v2813_v61  ;;  %3148 = vmatmul.bf16.gmra.mxu1 %v2813_v61  ;;  %v2700_v12 = vadd.f32 %v2699_v54, %v5772_v36  ;;  %v4758_v54 = vld [vmem:[%s6011_s4 + $0x68] sm:$0xff] }
 0x3ad   : > { %v2750_v63 = vpop.f32.mrf.mxu1  ;;  %3446 = vmatpush.bf16.msra.mxu3 %v4758_v54 }
 0x3ae   : > { %v2784_v40 = vmax.f32 %v2648_v47, 0.0  ;;  %v2749_v49 = vadd.f32 %v2748_v1, %v2700_v12 }
 0x3b0   : > { %v2812_v41 = vpack.c.bf16 %v2784_v40, %v2782_v9  ;;  %v2787_v11 = vmax.f32 %v2749_v49, 0.0 }
 0x3b1   : > { %v2601_v29 = vpop.f32.mrf.mxu2 }
 0x3b2   : > { %3001 = vmatmul.bf16.gmra.mxu2 %v2812_v41  ;;  %3099 = vmatmul.bf16.gmra.mxu0 %v2812_v41  ;;  %v2602_v20 = vadd.f32 %v2601_v29, %v5776_v32 }
 0x3b3   : > { %v2652_v25 = vpop.f32.mrf.mxu3  ;;  %v2701_v19 = vpop.f32.mrf.mxu0 }
 0x3b4   : > { %v2702_v2 = vadd.f32 %v2701_v19, %v5772_v36  ;;  %v2651_v24 = vadd.f32 %v2650_v37, %v2602_v20 }
 0x3b5   : > { %v2753_v51 = vpop.f32.mrf.mxu1 }
 0x3b6   : > { %v2751_v59 = vadd.f32 %v2750_v63, %v2702_v2  ;;  %v2786_v14 = vmax.f32 %v2651_v24, 0.0  ;;  %v4749_v2 = vld [vmem:[%s6011_s4 + $0x20] sm:$0xff] }
 0x3b7   : > { %3398 = vmatpush.bf16.msra.mxu2 %v4749_v2 }
 0x3b8   : > { %v2789_v26 = vmax.f32 %v2751_v59, 0.0 }
 0x3b9   : > { %v2603_v56 = vpop.f32.mrf.mxu2 }
 0x3ba   : > { %v2604_v45 = vadd.f32 %v2603_v56, %v5776_v32  ;;  %v2815_v31 = vpack.c.bf16 %v2789_v26, %v2787_v11 }
 0x3bb   : > { %v2655_v43 = vpop.f32.mrf.mxu3  ;;  %v2704_v1 = vpop.f32.mrf.mxu0 }
 0x3bc   : > { %v2653_v57 = vadd.f32 %v2652_v25, %v2604_v45  ;;  %3055 = vmatmul.bf16.gmra.mxu3 %v2815_v31  ;;  %3153 = vmatmul.bf16.gmra.mxu1 %v2815_v31  ;;  %v2705_v47 = vadd.f32 %v2704_v1, %v5772_v36  ;;  %v4757_v1 = vld [vmem:[%s6011_s4 + $0x60] sm:$0xff] }
 0x3bd   : > { %v2755_v53 = vpop.f32.mrf.mxu1  ;;  %3447 = vmatpush.bf16.msra.mxu3 %v4757_v1 }
 0x3be   : > { %v2788_v61 = vmax.f32 %v2653_v57, 0.0  ;;  %v2754_v52 = vadd.f32 %v2753_v51, %v2705_v47 }
 0x3c0   : > { %v2814_v63 = vpack.c.bf16 %v2788_v61, %v2786_v14  ;;  %v2791_v19 = vmax.f32 %v2754_v52, 0.0 }
 0x3c1   : > { %v2606_v37 = vpop.f32.mrf.mxu2 }
 0x3c2   : > { %3006 = vmatmul.bf16.gmra.mxu2 %v2814_v63  ;;  %3104 = vmatmul.bf16.gmra.mxu0 %v2814_v63  ;;  %v2607_v29 = vadd.f32 %v2606_v37, %v5776_v32 }
 0x3c3   : > { %v2657_v9 = vpop.f32.mrf.mxu3  ;;  %v2706_v40 = vpop.f32.mrf.mxu0 }
 0x3c4   : > { %v2707_v12 = vadd.f32 %v2706_v40, %v5772_v36  ;;  %v2656_v59 = vadd.f32 %v2655_v43, %v2607_v29 }
 0x3c5   : > { %v2758_v41 = vpop.f32.mrf.mxu1 }
 0x3c6   : > { %v2756_v25 = vadd.f32 %v2755_v53, %v2707_v12  ;;  %v2790_v45 = vmax.f32 %v2656_v59, 0.0  ;;  %v4748_v12 = vld [vmem:[%s6011_s4 + $0x18] sm:$0xff] }
 0x3c7   : > { %3399 = vmatpush.bf16.msra.mxu2 %v4748_v12 }
 0x3c8   : > { %v2793_v49 = vmax.f32 %v2756_v25, 0.0 }
 0x3c9   : > { %v2608_v20 = vpop.f32.mrf.mxu2 }
 0x3ca   : > { %v2609_v11 = vadd.f32 %v2608_v20, %v5776_v32  ;;  %v2817_v26 = vpack.c.bf16 %v2793_v49, %v2791_v19 }
 0x3cb   : > { %v2660_v17 = vpop.f32.mrf.mxu3  ;;  %v2709_v51 = vpop.f32.mrf.mxu0 }
 0x3cc   : > { %v2658_v56 = vadd.f32 %v2657_v9, %v2609_v11  ;;  %3060 = vmatmul.bf16.gmra.mxu3 %v2817_v26  ;;  %3158 = vmatmul.bf16.gmra.mxu1 %v2817_v26  ;;  %v2710_v57 = vadd.f32 %v2709_v51, %v5772_v36  ;;  %v4756_v51 = vld [vmem:[%s6011_s4 + $0x58] sm:$0xff] }
 0x3cd   : > { %v2760_v24 = vpop.f32.mrf.mxu1  ;;  %3448 = vmatpush.bf16.msra.mxu3 %v4756_v51 }
 0x3ce   : > { %v2792_v31 = vmax.f32 %v2658_v56, 0.0  ;;  %v2759_v54 = vadd.f32 %v2758_v41, %v2710_v57 }
 0x3d0   : > { %v2816_v53 = vpack.c.bf16 %v2792_v31, %v2790_v45  ;;  %v2795_v40 = vmax.f32 %v2759_v54, 0.0 }
 0x3d1   : > { %v2611_v43 = vpop.f32.mrf.mxu2 }
 0x3d2   : > { %3011 = vmatmul.bf16.gmra.mxu2 %v2816_v53  ;;  %3109 = vmatmul.bf16.gmra.mxu0 %v2816_v53  ;;  %v2612_v37 = vadd.f32 %v2611_v43, %v5776_v32 }
 0x3d3   : > { %v2662_v14 = vpop.f32.mrf.mxu3  ;;  %v2711_v61 = vpop.f32.mrf.mxu0 }
 0x3d4   : > { %v2712_v47 = vadd.f32 %v2711_v61, %v5772_v36  ;;  %v2661_v25 = vadd.f32 %v2660_v17, %v2612_v37 }
 0x3d5   : > { %v2763_v63 = vpop.f32.mrf.mxu1 }
 0x3d6   : > { %v2761_v9 = vadd.f32 %v2760_v24, %v2712_v47  ;;  %v2794_v11 = vmax.f32 %v2661_v25, 0.0  ;;  %v4747_v47 = vld [vmem:[%s6011_s4 + $0x10] sm:$0xff] }
 0x3d7   : > { %3400 = vmatpush.bf16.msra.mxu2 %v4747_v47 }
 0x3d8   : > { %v2797_v52 = vmax.f32 %v2761_v9, 0.0 }
 0x3d9   : > { %v2613_v29 = vpop.f32.mrf.mxu2 }
 0x3da   : > { %v2614_v19 = vadd.f32 %v2613_v29, %v5776_v32  ;;  %v2819_v49 = vpack.c.bf16 %v2797_v52, %v2795_v40 }
 0x3db   : > { %v2665_v2 = vpop.f32.mrf.mxu3  ;;  %v2714_v41 = vpop.f32.mrf.mxu0 }
 0x3dc   : > { %v2663_v20 = vadd.f32 %v2662_v14, %v2614_v19  ;;  %3065 = vmatmul.bf16.gmra.mxu3 %v2819_v49  ;;  %3163 = vmatmul.bf16.gmra.mxu1 %v2819_v49  ;;  %v2715_v56 = vadd.f32 %v2714_v41, %v5772_v36  ;;  %v4755_v49 = vld [vmem:[%s6011_s4 + $0x50] sm:$0xff] }
 0x3dd   : > { %v2765_v59 = vpop.f32.mrf.mxu1  ;;  %3449 = vmatpush.bf16.msra.mxu3 %v4755_v49 }
 0x3de   : > { %v2796_v26 = vmax.f32 %v2663_v20, 0.0  ;;  %v2764_v1 = vadd.f32 %v2763_v63, %v2715_v56 }
 0x3e0   : > { %v2818_v24 = vpack.c.bf16 %v2796_v26, %v2794_v11  ;;  %v2799_v61 = vmax.f32 %v2764_v1, 0.0  ;;  %v4746_v11 = vld [vmem:[%s6011_s4 + $0x8] sm:$0xff] }
 0x3e1   : > { %v2616_v17 = vpop.f32.mrf.mxu2  ;;  %3401 = vmatpush.bf16.msra.mxu2 %v4746_v11 }
 0x3e2   : > { %3016 = vmatmul.bf16.gmra.mxu2 %v2818_v24  ;;  %3114 = vmatmul.bf16.gmra.mxu0 %v2818_v24  ;;  %v2617_v53 = vadd.f32 %v2616_v17, %v5776_v32 }
 0x3e3   : > { %v2667_v45 = vpop.f32.mrf.mxu3  ;;  %v2716_v31 = vpop.f32.mrf.mxu0 }
 0x3e4   : > { %v2717_v57 = vadd.f32 %v2716_v31, %v5772_v36  ;;  %v2666_v9 = vadd.f32 %v2665_v2, %v2617_v53  ;;  %v4754_v53 = vld [vmem:[%s6011_s4 + $0x48] sm:$0xff] }
 0x3e5   : > { %v2768_v14 = vpop.f32.mrf.mxu1  ;;  %3450 = vmatpush.bf16.msra.mxu3 %v4754_v53  ;;  %v4745_v53 = vld [vmem:[%s6011_s4] sm:$0xff] }
 0x3e6   : > { %v2766_v43 = vadd.f32 %v2765_v59, %v2717_v57  ;;  %v2798_v25 = vmax.f32 %v2666_v9, 0.0  ;;  %3402 = vmatpush.bf16.msra.mxu2 %v4745_v53 }
 0x3e8   : > { %v2801_v54 = vmax.f32 %v2766_v43, 0.0 }
 0x3e9   : > { %v2618_v37 = vpop.f32.mrf.mxu2 }
 0x3ea   : > { %v2619_v40 = vadd.f32 %v2618_v37, %v5776_v32  ;;  %v2821_v52 = vpack.c.bf16 %v2801_v54, %v2799_v61 }
 0x3eb   : > { %v2719_v12 = vpop.f32.mrf.mxu0  ;;  %v2670_v29 = vpop.f32.mrf.mxu3 }
 0x3ec   : > { %v2668_v63 = vadd.f32 %v2667_v45, %v2619_v40  ;;  %3070 = vmatmul.bf16.gmra.mxu3 %v2821_v52  ;;  %3168 = vmatmul.bf16.gmra.mxu1 %v2821_v52  ;;  %v2720_v41 = vadd.f32 %v2719_v12, %v5772_v36 }
 0x3ed   : > { %v2770_v2 = vpop.f32.mrf.mxu1 }
 0x3ee   : > { %v2800_v19 = vmax.f32 %v2668_v63, 0.0  ;;  %v2769_v51 = vadd.f32 %v2768_v14, %v2720_v41 }
 0x3f0   : > { %v2820_v20 = vpack.c.bf16 %v2800_v19, %v2798_v25  ;;  %v2803_v31 = vmax.f32 %v2769_v51, 0.0 }
 0x3f1   : > { %v2621_v59 = vpop.f32.mrf.mxu2 }
 0x3f2   : > { %3021 = vmatmul.bf16.gmra.mxu2 %v2820_v20  ;;  %3119 = vmatmul.bf16.gmra.mxu0 %v2820_v20  ;;  %v2622_v24 = vadd.f32 %v2621_v59, %v5776_v32 }
 0x3f3   : > { %v2721_v26 = vpop.f32.mrf.mxu0  ;;  %v2672_v45 = vpop.f32.mrf.mxu3 }
 0x3f4   : > { %v2722_v56 = vadd.f32 %v2721_v26, %v5772_v36  ;;  %v2671_v43 = vadd.f32 %v2670_v29, %v2622_v24 }
 0x3f5   : > { %v2773_v47 = vpop.f32.mrf.mxu1 }
 0x3f6   : > { %v2771_v17 = vadd.f32 %v2770_v2, %v2722_v56  ;;  %v2802_v9 = vmax.f32 %v2671_v43, 0.0  ;;  %v4830_v43 = vld [vmem:[%s6010_s3 + $0x8] sm:$0x7f] }
 0x3f8   : > { %v2805_v1 = vmax.f32 %v2771_v17, 0.0 }
 0x3f9   : > { %v2623_v57 = vpop.f32.mrf.mxu2 }
 0x3fa   : > { %v2624_v61 = vadd.f32 %v2623_v57, %v5776_v32  ;;  %v2823_v54 = vpack.c.bf16 %v2805_v1, %v2803_v31 }
 0x3fb   : > { %v2724_v14 = vpop.f32.mrf.mxu0  ;;  %v2675_v63 = vpop.f32.mrf.mxu3 }
 0x3fc   : > { %v2673_v37 = vadd.f32 %v2672_v45, %v2624_v61  ;;  %3075 = vmatmul.bf16.gmra.mxu3 %v2823_v54  ;;  %3173 = vmatmul.bf16.gmra.mxu1 %v2823_v54  ;;  %v2725_v52 = vadd.f32 %v2724_v14, %v5772_v36  ;;  %v5860_v61 = vperm.slane %v4830_v43, 6 }
 0x3fd   : > { %v2775_v41 = vpop.f32.mrf.mxu1 }
 0x3fe   : > { %v2804_v40 = vmax.f32 %v2673_v37, 0.0  ;;  %v2774_v29 = vadd.f32 %v2773_v47, %v2725_v52 }
 0x400   : > { %v2822_v12 = vpack.c.bf16 %v2804_v40, %v2802_v9  ;;  %v2807_v59 = vmax.f32 %v2774_v29, 0.0  ;;  %v4831_v9 = vld [vmem:[%s6010_s3] sm:$0x7f] }
 0x401   : > { %v2626_v25 = vpop.f32.mrf.mxu2  ;;  %v5866_v40 = vperm.slane %v4831_v9, 6 }
 0x402   : > { %3026 = vmatmul.bf16.gmra.mxu2 %v2822_v12  ;;  %3124 = vmatmul.bf16.gmra.mxu0 %v2822_v12  ;;  %v2627_v20 = vadd.f32 %v2626_v25, %v5776_v32 }
 0x403   : > { %v2726_v19 = vpop.f32.mrf.mxu0  ;;  %v2677_v17 = vpop.f32.mrf.mxu3 }
 0x404   : > { %v2727_v49 = vadd.f32 %v2726_v19, %v5772_v36  ;;  %v2676_v51 = vadd.f32 %v2675_v63, %v2627_v20  ;;  %v4753_v36 = vld [vmem:[%s6011_s4 + $0x40] sm:$0xff] }
 0x405   : > { %3451 = vmatpush.bf16.msra.mxu3 %v4753_v36 }
 0x406   : > { %v2776_v2 = vadd.f32 %v2775_v41, %v2727_v49  ;;  %v2806_v31 = vmax.f32 %v2676_v51, 0.0 }
 0x408   : > { %v2809_v11 = vmax.f32 %v2776_v2, 0.0 }
 0x409   : > { %v2628_v26 = vpop.f32.mrf.mxu2 }
 0x40a   : > { %v2629_v56 = vadd.f32 %v2628_v26, %v5776_v32  ;;  %v2825_v24 = vpack.c.bf16 %v2809_v11, %v2807_v59 }
 0x40c   : > { %v2678_v45 = vadd.f32 %v2677_v17, %v2629_v56  ;;  %3080 = vmatmul.bf16.gmra.mxu3 %v2825_v24  ;;  %3178 = vmatmul.bf16.gmra.mxu1 %v2825_v24 }
 0x40e   : > { %v2808_v1 = vmax.f32 %v2678_v45, 0.0 }
 0x410   : > { %v2824_v57 = vpack.c.bf16 %v2808_v1, %v2806_v31 }
 0x412   : > { %3031 = vmatmul.bf16.gmra.mxu2 %v2824_v57  ;;  %3129 = vmatmul.bf16.gmra.mxu0 %v2824_v57 }
 0x419   : > { %v3144_v32 = vpop.f32.mrf.mxu1 }
 0x41f   : > { %v3046_v54 = vpop.f32.mrf.mxu3  ;;  %v3095_v47 = vpop.f32.mrf.mxu0 }
 0x420   : > { %v3096_v37 = vadd.f32 %v3095_v47, %v5860_v61 }
 0x421   : > { %v3146_v14 = vpop.f32.mrf.mxu1 }
 0x422   : > { %v3145_v12 = vadd.f32 %v3144_v32, %v3096_v37 }
 0x424   : > { %v3185_v41 = vmax.f32 %v3145_v12, 0.0 }
 0x425   : > { %v2997_v52 = vpop.f32.mrf.mxu2 }
 0x426   : > { %v2998_v19 = vadd.f32 %v2997_v52, %v5866_v40  ;;  %v3217_v26 = vadd.f32 %v3185_v41, %v5615_v4 }
 0x427   : > { %v3048_v63 = vpop.f32.mrf.mxu3  ;;  %v3097_v25 = vpop.f32.mrf.mxu0 }
 0x428   : > { %v3098_v29 = vadd.f32 %v3097_v25, %v5860_v61  ;;  %v3047_v2 = vadd.f32 %v3046_v54, %v2998_v19 }
 0x429   : > { %v3149_v49 = vpop.f32.mrf.mxu1 }
 0x42a   : > { %v3147_v20 = vadd.f32 %v3146_v14, %v3098_v29  ;;  %v3184_v45 = vmax.f32 %v3047_v2, 0.0 }
 0x42c   : > { %v3187_v59 = vmax.f32 %v3147_v20, 0.0  ;;  %v3216_v32 = vadd.f32 %v3184_v45, %v5625_v42 }
 0x42d   : > { %v2999_v11 = vpop.f32.mrf.mxu2 }
 0x42e   : > { %v3219_v51 = vadd.f32 %v3187_v59, %v5618_v34  ;;  %v3000_v56 = vadd.f32 %v2999_v11, %v5866_v40 }
 0x42f   : > { %v3051_v24 = vpop.f32.mrf.mxu3  ;;  %v3100_v17 = vpop.f32.mrf.mxu0 }
 0x430   : > { %v3283_v31 = vpack.c.bf16 %v3219_v51, %v3217_v26  ;;  %v3049_v1 = vadd.f32 %v3048_v63, %v3000_v56  ;;  %v3101_v53 = vadd.f32 %v3100_v17, %v5860_v61 }
 0x431   : > { %v3151_v36 = vpop.f32.mrf.mxu1 }
 0x432   : > { %v3186_v57 = vmax.f32 %v3049_v1, 0.0  ;;  %3452 = vmatmul.bf16.vlgmr.msra.gmra.mxu3 %v3283_v31  ;;  %v3150_v47 = vadd.f32 %v3149_v49, %v3101_v53 }
 0x434   : > { %v3218_v43 = vadd.f32 %v3186_v57, %v5628_v23  ;;  %v3189_v12 = vmax.f32 %v3150_v47, 0.0 }
 0x435   : > { %v3002_v54 = vpop.f32.mrf.mxu2 }
 0x436   : > { %v3282_v4 = vpack.c.bf16 %v3218_v43, %v3216_v32  ;;  %v3003_v37 = vadd.f32 %v3002_v54, %v5866_v40  ;;  %v3221_v42 = vadd.f32 %v3189_v12, %v5635_v6 }
 0x437   : > { %v3053_v34 = vpop.f32.mrf.mxu3  ;;  %v3102_v14 = vpop.f32.mrf.mxu0 }
 0x438   : > { %v3103_v9 = vadd.f32 %v3102_v14, %v5860_v61  ;;  %3403 = vmatmul.bf16.vlgmr.msra.gmra.mxu2 %v3282_v4  ;;  %v3052_v25 = vadd.f32 %v3051_v24, %v3003_v37 }
 0x439   : > { %v3154_v52 = vpop.f32.mrf.mxu1 }
 0x43a   : > { %v3152_v63 = vadd.f32 %v3151_v36, %v3103_v9  ;;  %v3188_v2 = vmax.f32 %v3052_v25, 0.0 }
 0x43c   : > { %v3191_v19 = vmax.f32 %v3152_v63, 0.0  ;;  %v3220_v24 = vadd.f32 %v3188_v2, %v5645_v3 }
 0x43d   : > { %v3004_v29 = vpop.f32.mrf.mxu2 }
 0x43e   : > { %v3223_v23 = vadd.f32 %v3191_v19, %v5639_v5  ;;  %v3005_v41 = vadd.f32 %v3004_v29, %v5866_v40 }
 0x43f   : > { %v3056_v49 = vpop.f32.mrf.mxu3  ;;  %v3105_v20 = vpop.f32.mrf.mxu0 }
 0x440   : > { %v3054_v59 = vadd.f32 %v3053_v34, %v3005_v41  ;;  %v3285_v11 = vpack.c.bf16 %v3223_v23, %v3221_v42  ;;  %v3106_v56 = vadd.f32 %v3105_v20, %v5860_v61 }
 0x441   : > { %v3156_v26 = vpop.f32.mrf.mxu1 }
 0x442   : > { %v3190_v51 = vmax.f32 %v3054_v59, 0.0  ;;  %3457 = vmatmul.bf16.gmra.mxu3 %v3285_v11  ;;  %v3155_v6 = vadd.f32 %v3154_v52, %v3106_v56 }
 0x444   : > { %v3222_v17 = vadd.f32 %v3190_v51, %v5648_v35  ;;  %v3193_v32 = vmax.f32 %v3155_v6, 0.0 }
 0x445   : > { %v3007_v45 = vpop.f32.mrf.mxu2 }
 0x446   : > { %v3284_v31 = vpack.c.bf16 %v3222_v17, %v3220_v24  ;;  %v3008_v36 = vadd.f32 %v3007_v45, %v5866_v40  ;;  %v3225_v3 = vadd.f32 %v3193_v32, %v5655_v0 }
 0x447   : > { %v3058_v5 = vpop.f32.mrf.mxu3  ;;  %v3107_v1 = vpop.f32.mrf.mxu0 }
 0x448   : > { %v3108_v57 = vadd.f32 %v3107_v1, %v5860_v61  ;;  %3408 = vmatmul.bf16.gmra.mxu2 %v3284_v31  ;;  %v3057_v54 = vadd.f32 %v3056_v49, %v3008_v36 }
 0x449   : > { %v3159_v53 = vpop.f32.mrf.mxu1 }
 0x44a   : > { %v3157_v43 = vadd.f32 %v3156_v26, %v3108_v57  ;;  %v3192_v9 = vmax.f32 %v3057_v54, 0.0 }
 0x44c   : > { %v3195_v4 = vmax.f32 %v3157_v43, 0.0  ;;  %v3224_v29 = vadd.f32 %v3192_v9, %v5665_v50 }
 0x44d   : > { %v3009_v47 = vpop.f32.mrf.mxu2 }
 0x44e   : > { %v3227_v35 = vadd.f32 %v3195_v4, %v5659_v7  ;;  %v3010_v34 = vadd.f32 %v3009_v47, %v5866_v40 }
 0x44f   : > { %v3061_v14 = vpop.f32.mrf.mxu3  ;;  %v3110_v37 = vpop.f32.mrf.mxu0 }
 0x450   : > { %v3059_v52 = vadd.f32 %v3058_v5, %v3010_v34  ;;  %v3287_v12 = vpack.c.bf16 %v3227_v35, %v3225_v3  ;;  %v3111_v19 = vadd.f32 %v3110_v37, %v5860_v61 }
 0x451   : > { %v3161_v63 = vpop.f32.mrf.mxu1 }
 0x452   : > { %v3194_v25 = vmax.f32 %v3059_v52, 0.0  ;;  %3462 = vmatmul.bf16.gmra.mxu3 %v3287_v12  ;;  %v3160_v0 = vadd.f32 %v3159_v53, %v3111_v19 }
 0x454   : > { %v3226_v42 = vadd.f32 %v3194_v25, %v5668_v46  ;;  %v3197_v11 = vmax.f32 %v3160_v0, 0.0 }
 0x455   : > { %v3012_v23 = vpop.f32.mrf.mxu2 }
 0x456   : > { %v3286_v41 = vpack.c.bf16 %v3226_v42, %v3224_v29  ;;  %v3013_v20 = vadd.f32 %v3012_v23, %v5866_v40  ;;  %v3229_v50 = vadd.f32 %v3197_v11, %v5675_v22 }
 0x457   : > { %v3063_v7 = vpop.f32.mrf.mxu3  ;;  %v3112_v49 = vpop.f32.mrf.mxu0 }
 0x458   : > { %v3113_v2 = vadd.f32 %v3112_v49, %v5860_v61  ;;  %3413 = vmatmul.bf16.gmra.mxu2 %v3286_v41  ;;  %v3062_v51 = vadd.f32 %v3061_v14, %v3013_v20 }
 0x459   : > { %v3164_v59 = vpop.f32.mrf.mxu1 }
 0x45a   : > { %v3162_v26 = vadd.f32 %v3161_v63, %v3113_v2  ;;  %v3196_v31 = vmax.f32 %v3062_v51, 0.0 }
 0x45c   : > { %v3199_v56 = vmax.f32 %v3162_v26, 0.0  ;;  %v3228_v32 = vadd.f32 %v3196_v31, %v5685_v60 }
 0x45d   : > { %v3014_v24 = vpop.f32.mrf.mxu2 }
 0x45e   : > { %v3231_v46 = vadd.f32 %v3199_v56, %v5679_v62  ;;  %v3015_v17 = vadd.f32 %v3014_v24, %v5866_v40 }
 0x45f   : > { %v3066_v45 = vpop.f32.mrf.mxu3  ;;  %v3115_v6 = vpop.f32.mrf.mxu0 }
 0x460   : > { %v3064_v5 = vadd.f32 %v3063_v7, %v3015_v17  ;;  %v3289_v1 = vpack.c.bf16 %v3231_v46, %v3229_v50  ;;  %v3116_v53 = vadd.f32 %v3115_v6, %v5860_v61 }
 0x461   : > { %v3166_v36 = vpop.f32.mrf.mxu1 }
 0x462   : > { %v3198_v57 = vmax.f32 %v3064_v5, 0.0  ;;  %3467 = vmatmul.bf16.gmra.mxu3 %v3289_v1  ;;  %v3165_v22 = vadd.f32 %v3164_v59, %v3116_v53 }
 0x464   : > { %v3230_v43 = vadd.f32 %v3198_v57, %v5688_v39  ;;  %v3201_v14 = vmax.f32 %v3165_v22, 0.0 }
 0x465   : > { %v3017_v54 = vpop.f32.mrf.mxu2 }
 0x466   : > { %v3288_v4 = vpack.c.bf16 %v3230_v43, %v3228_v32  ;;  %v3018_v3 = vadd.f32 %v3017_v54, %v5866_v40  ;;  %v3233_v60 = vadd.f32 %v3201_v14, %v5695_v30 }
 0x467   : > { %v3068_v62 = vpop.f32.mrf.mxu3  ;;  %v3117_v47 = vpop.f32.mrf.mxu0 }
 0x468   : > { %v3118_v35 = vadd.f32 %v3117_v47, %v5860_v61  ;;  %3418 = vmatmul.bf16.gmra.mxu2 %v3288_v4  ;;  %v3067_v9 = vadd.f32 %v3066_v45, %v3018_v3 }
 0x469   : > { %v3169_v34 = vpop.f32.mrf.mxu1 }
 0x46a   : > { %v3167_v37 = vadd.f32 %v3166_v36, %v3118_v35  ;;  %v3200_v29 = vmax.f32 %v3067_v9, 0.0 }
 0x46c   : > { %v3203_v52 = vmax.f32 %v3167_v37, 0.0  ;;  %v3232_v49 = vadd.f32 %v3200_v29, %v5705_v27 }
 0x46d   : > { %v3019_v12 = vpop.f32.mrf.mxu2 }
 0x46e   : > { %v3235_v39 = vadd.f32 %v3203_v52, %v5699_v10  ;;  %v3020_v63 = vadd.f32 %v3019_v12, %v5866_v40 }
 0x46f   : > { %v3071_v25 = vpop.f32.mrf.mxu3  ;;  %v3120_v19 = vpop.f32.mrf.mxu0 }
 0x470   : > { %v3069_v42 = vadd.f32 %v3068_v62, %v3020_v63  ;;  %v3291_v23 = vpack.c.bf16 %v3235_v39, %v3233_v60  ;;  %v3121_v7 = vadd.f32 %v3120_v19, %v5860_v61 }
 0x471   : > { %v3171_v0 = vpop.f32.mrf.mxu1 }
 0x472   : > { %v3202_v41 = vmax.f32 %v3069_v42, 0.0  ;;  %3472 = vmatmul.bf16.gmra.mxu3 %v3291_v23  ;;  %v3170_v30 = vadd.f32 %v3169_v34, %v3121_v7 }
 0x474   : > { %v3234_v20 = vadd.f32 %v3202_v41, %v5708_v16  ;;  %v3205_v56 = vmax.f32 %v3170_v30, 0.0 }
 0x475   : > { %v3022_v2 = vpop.f32.mrf.mxu2 }
 0x476   : > { %v3290_v59 = vpack.c.bf16 %v3234_v20, %v3232_v49  ;;  %v3023_v26 = vadd.f32 %v3022_v2, %v5866_v40  ;;  %v3237_v27 = vadd.f32 %v3205_v56, %v5715_v58 }
 0x477   : > { %v3073_v10 = vpop.f32.mrf.mxu3  ;;  %v3122_v11 = vpop.f32.mrf.mxu0 }
 0x478   : > { %v3123_v51 = vadd.f32 %v3122_v11, %v5860_v61  ;;  %3423 = vmatmul.bf16.gmra.mxu2 %v3290_v59  ;;  %v3072_v46 = vadd.f32 %v3071_v25, %v3023_v26 }
 0x479   : > { %v3174_v50 = vpop.f32.mrf.mxu1 }
 0x47a   : > { %v3172_v24 = vadd.f32 %v3171_v0, %v3123_v51  ;;  %v3204_v5 = vmax.f32 %v3072_v46, 0.0 }
 0x47c   : > { %v3207_v17 = vmax.f32 %v3172_v24, 0.0  ;;  %v3236_v43 = vadd.f32 %v3204_v5, %v5725_v21 }
 0x47d   : > { %v3024_v45 = vpop.f32.mrf.mxu2 }
 0x47e   : > { %v3239_v16 = vadd.f32 %v3207_v17, %v5719_v44  ;;  %v3025_v6 = vadd.f32 %v3024_v45, %v5866_v40 }
 0x47f   : > { %v3125_v31 = vpop.f32.mrf.mxu0  ;;  %v3076_v57 = vpop.f32.mrf.mxu3 }
 0x480   : > { %v3074_v1 = vadd.f32 %v3073_v10, %v3025_v6  ;;  %v3293_v36 = vpack.c.bf16 %v3239_v16, %v3237_v27  ;;  %v3126_v32 = vadd.f32 %v3125_v31, %v5860_v61 }
 0x481   : > { %v3176_v22 = vpop.f32.mrf.mxu1 }
 0x482   : > { %v3206_v53 = vmax.f32 %v3074_v1, 0.0  ;;  %3477 = vmatmul.bf16.gmra.mxu3 %v3293_v36  ;;  %v3175_v58 = vadd.f32 %v3174_v50, %v3126_v32 }
 0x484   : > { %v3238_v54 = vadd.f32 %v3206_v53, %v5728_v13  ;;  %v3209_v35 = vmax.f32 %v3175_v58, 0.0 }
 0x485   : > { %v3027_v4 = vpop.f32.mrf.mxu2 }
 0x486   : > { %v3292_v62 = vpack.c.bf16 %v3238_v54, %v3236_v43  ;;  %v3028_v47 = vadd.f32 %v3027_v4, %v5866_v40  ;;  %v3241_v21 = vadd.f32 %v3209_v35, %v5735_v15 }
 0x487   : > { %v3127_v44 = vpop.f32.mrf.mxu0  ;;  %v3078_v14 = vpop.f32.mrf.mxu3 }
 0x488   : > { %v3128_v3 = vadd.f32 %v3127_v44, %v5860_v61  ;;  %3428 = vmatmul.bf16.gmra.mxu2 %v3292_v62  ;;  %v3077_v37 = vadd.f32 %v3076_v57, %v3028_v47 }
 0x489   : > { %v3179_v60 = vpop.f32.mrf.mxu1 }
 0x48a   : > { %v3177_v34 = vadd.f32 %v3176_v22, %v3128_v3  ;;  %v3208_v63 = vmax.f32 %v3077_v37, 0.0 }
 0x48c   : > { %v3211_v9 = vmax.f32 %v3177_v34, 0.0  ;;  %v3240_v23 = vadd.f32 %v3208_v63, %v5745_v28 }
 0x48d   : > { %v3029_v52 = vpop.f32.mrf.mxu2 }
 0x48e   : > { %v3243_v13 = vadd.f32 %v3211_v9, %v5739_v38  ;;  %v3030_v12 = vadd.f32 %v3029_v52, %v5866_v40 }
 0x48f   : > { %v3130_v39 = vpop.f32.mrf.mxu0  ;;  %v3081_v41 = vpop.f32.mrf.mxu3 }
 0x490   : > { %v3079_v25 = vadd.f32 %v3078_v14, %v3030_v12  ;;  %v3295_v19 = vpack.c.bf16 %v3243_v13, %v3241_v21  ;;  %v3131_v42 = vadd.f32 %v3130_v39, %v5860_v61 }
 0x491   : > { %v3181_v30 = vpop.f32.mrf.mxu1 }
 0x492   : > { %v3210_v29 = vmax.f32 %v3079_v25, 0.0  ;;  %3482 = vmatmul.bf16.gmra.mxu3 %v3295_v19  ;;  %v3180_v15 = vadd.f32 %v3179_v60, %v3131_v42 }
 0x494   : > { %v3242_v0 = vadd.f32 %v3210_v29, %v5748_v55  ;;  %v3213_v59 = vmax.f32 %v3180_v15, 0.0 }
 0x495   : > { %v3032_v7 = vpop.f32.mrf.mxu2 }
 0x496   : > { %v3294_v49 = vpack.c.bf16 %v3242_v0, %v3240_v23  ;;  %v3033_v20 = vadd.f32 %v3032_v7, %v5866_v40  ;;  %v3245_v28 = vadd.f32 %v3213_v59, %v5755_v33  ;;  %v3280_v33 = vld [vmem:[%s6011_s4 + $0x80] sm:$0x1] }
 0x497   : > { %v3132_v38 = vpop.f32.mrf.mxu0  ;;  %v3083_v24 = vpop.f32.mrf.mxu3 }
 0x498   : > { %v3133_v2 = vadd.f32 %v3132_v38, %v5860_v61  ;;  %3433 = vmatmul.bf16.gmra.mxu2 %v3294_v49  ;;  %v3082_v11 = vadd.f32 %v3081_v41, %v3033_v20 }
 0x49a   : > { %v3182_v10 = vadd.f32 %v3181_v30, %v3133_v2  ;;  %v3212_v50 = vmax.f32 %v3082_v11, 0.0 }
 0x49c   : > { %v3215_v26 = vmax.f32 %v3182_v10, 0.0  ;;  %v3244_v45 = vadd.f32 %v3212_v50, %v5764_v48 }
 0x49d   : > { %v3034_v51 = vpop.f32.mrf.mxu2 }
 0x49e   : > { %v3247_v55 = vadd.f32 %v3215_v26, %v5759_v8  ;;  %v3035_v56 = vadd.f32 %v3034_v51, %v5866_v40  ;;  %v3281_v8 = vunpack.c.l.bf16 %v3280_v33 }
 0x4a0   : > { %v3084_v46 = vadd.f32 %v3083_v24, %v3035_v56  ;;  %v3297_v17 = vpack.c.bf16 %v3247_v55, %v3245_v28  ;;  %v5935_v40 = vperm.slane %v3281_v8, 0 }
 0x4a2   : > { %v3214_v61 = vmax.f32 %v3084_v46, 0.0  ;;  %3487 = vmatmul.bf16.gmra.mxu3 %v3297_v17 }
 0x4a4   : > { %v3246_v27 = vadd.f32 %v3214_v61, %v5767_v18 }
 0x4a6   : > { %v3296_v16 = vpack.c.bf16 %v3246_v27, %v3244_v45 }
 0x4a8   : > { %3438 = vmatmul.bf16.gmra.mxu2 %v3296_v16 }
 0x4b5   : > { %v3453_v6 = vpop.f32.mrf.mxu3 }
 0x4bb   : > { %v3404_v31 = vpop.f32.mrf.mxu2 }
 0x4bc   : > { %v3405_v5 = vadd.f32 %v3404_v31, %v5935_v40 }
 0x4bd   : > { %v3455_v1 = vpop.f32.mrf.mxu3 }
 0x4be   : > { %v3454_v48 = vadd.f32 %v3453_v6, %v3405_v5 }
 0x4c0   : > { %3493 = vst [vmem:[%s5940_s11] sm:$0xff] %v3454_v48 }
 0x4c3   : > { %v3406_v18 = vpop.f32.mrf.mxu2 }
 0x4c4   : > { %v3407_v36 = vadd.f32 %v3406_v18, %v5935_v40 }
 0x4c5   : > { %v3458_v57 = vpop.f32.mrf.mxu3 }
 0x4c6   : > { %v3456_v53 = vadd.f32 %v3455_v1, %v3407_v36 }
 0x4c8   : > { %3494 = vst [vmem:[%s5940_s11 + $0x8] sm:$0xff] %v3456_v53 }
 0x4cb   : > { %v3409_v32 = vpop.f32.mrf.mxu2 }
 0x4cc   : > { %v3410_v43 = vadd.f32 %v3409_v32, %v5935_v40 }
 0x4cd   : > { %v3460_v54 = vpop.f32.mrf.mxu3 }
 0x4ce   : > { %v3459_v22 = vadd.f32 %v3458_v57, %v3410_v43 }
 0x4d0   : > { %3495 = vst [vmem:[%s5940_s11 + $0x10] sm:$0xff] %v3459_v22 }
 0x4d3   : > { %v3411_v4 = vpop.f32.mrf.mxu2 }
 0x4d4   : > { %v3412_v58 = vadd.f32 %v3411_v4, %v5935_v40 }
 0x4d5   : > { %v3463_v62 = vpop.f32.mrf.mxu3 }
 0x4d6   : > { %v3461_v44 = vadd.f32 %v3460_v54, %v3412_v58 }
 0x4d8   : > { %3496 = vst [vmem:[%s5940_s11 + $0x18] sm:$0xff] %v3461_v44 }
 0x4db   : > { %v3414_v47 = vpop.f32.mrf.mxu2 }
 0x4dc   : > { %v3415_v3 = vadd.f32 %v3414_v47, %v5935_v40 }
 0x4dd   : > { %v3465_v35 = vpop.f32.mrf.mxu3 }
 0x4de   : > { %v3464_v34 = vadd.f32 %v3463_v62, %v3415_v3 }
 0x4e0   : > { %3497 = vst [vmem:[%s5940_s11 + $0x20] sm:$0xff] %v3464_v34 }
 0x4e3   : > { %v3416_v14 = vpop.f32.mrf.mxu2 }
 0x4e4   : > { %v3417_v37 = vadd.f32 %v3416_v14, %v5935_v40 }
 0x4e5   : > { %v3468_v9 = vpop.f32.mrf.mxu3 }
 0x4e6   : > { %v3466_v52 = vadd.f32 %v3465_v35, %v3417_v37 }
 0x4e8   : > { %3498 = vst [vmem:[%s5940_s11 + $0x28] sm:$0xff] %v3466_v52 }
 0x4eb   : > { %v3419_v21 = vpop.f32.mrf.mxu2 }
 0x4ec   : > { %v3420_v13 = vadd.f32 %v3419_v21, %v5935_v40 }
 0x4ed   : > { %v3470_v12 = vpop.f32.mrf.mxu3 }
 0x4ee   : > { %v3469_v60 = vadd.f32 %v3468_v9, %v3420_v13 }
 0x4f0   : > { %3499 = vst [vmem:[%s5940_s11 + $0x30] sm:$0xff] %v3469_v60 }
 0x4f3   : > { %v3421_v39 = vpop.f32.mrf.mxu2 }
 0x4f4   : > { %v3422_v63 = vadd.f32 %v3421_v39, %v5935_v40 }
 0x4f5   : > { %v3473_v25 = vpop.f32.mrf.mxu3 }
 0x4f6   : > { %v3471_v19 = vadd.f32 %v3470_v12, %v3422_v63 }
 0x4f8   : > { %3500 = vst [vmem:[%s5940_s11 + $0x38] sm:$0xff] %v3471_v19 }
 0x4fb   : > { %v3424_v29 = vpop.f32.mrf.mxu2 }
 0x4fc   : > { %v3425_v42 = vadd.f32 %v3424_v29, %v5935_v40 }
 0x4fd   : > { %v3475_v23 = vpop.f32.mrf.mxu3 }
 0x4fe   : > { %v3474_v0 = vadd.f32 %v3473_v25, %v3425_v42 }
 0x500   : > { %3501 = vst [vmem:[%s5940_s11 + $0x40] sm:$0xff] %v3474_v0 }
 0x503   : > { %v3426_v41 = vpop.f32.mrf.mxu2 }
 0x504   : > { %v3427_v7 = vadd.f32 %v3426_v41, %v5935_v40 }
 0x505   : > { %v3478_v15 = vpop.f32.mrf.mxu3 }
 0x506   : > { %v3476_v49 = vadd.f32 %v3475_v23, %v3427_v7 }
 0x508   : > { %3502 = vst [vmem:[%s5940_s11 + $0x48] sm:$0xff] %v3476_v49 }
 0x50b   : > { %v3429_v38 = vpop.f32.mrf.mxu2 }
 0x50c   : > { %v3430_v20 = vadd.f32 %v3429_v38, %v5935_v40 }
 0x50d   : > { %v3480_v2 = vpop.f32.mrf.mxu3 }
 0x50e   : > { %v3479_v30 = vadd.f32 %v3478_v15, %v3430_v20 }
 0x510   : > { %3503 = vst [vmem:[%s5940_s11 + $0x50] sm:$0xff] %v3479_v30 }
 0x513   : > { %v3431_v59 = vpop.f32.mrf.mxu2 }
 0x514   : > { %v3432_v10 = vadd.f32 %v3431_v59, %v5935_v40 }
 0x515   : > { %v3483_v26 = vpop.f32.mrf.mxu3 }
 0x516   : > { %v3481_v11 = vadd.f32 %v3480_v2, %v3432_v10 }
 0x518   : > { %3504 = vst [vmem:[%s5940_s11 + $0x58] sm:$0xff] %v3481_v11 }
 0x51b   : > { %v3434_v51 = vpop.f32.mrf.mxu2 }
 0x51c   : > { %v3435_v28 = vadd.f32 %v3434_v51, %v5935_v40 }
 0x51d   : > { %v3485_v56 = vpop.f32.mrf.mxu3 }
 0x51e   : > { %v3484_v55 = vadd.f32 %v3483_v26, %v3435_v28 }
 0x520   : > { %3505 = vst [vmem:[%s5940_s11 + $0x60] sm:$0xff] %v3484_v55 }
 0x523   : > { %v3436_v24 = vpop.f32.mrf.mxu2 }
 0x524   : > { %v3437_v50 = vadd.f32 %v3436_v24, %v5935_v40 }
 0x525   : > { %v3488_v17 = vpop.f32.mrf.mxu3 }
 0x526   : > { %v3486_v46 = vadd.f32 %v3485_v56, %v3437_v50 }
 0x528   : > { %3506 = vst [vmem:[%s5940_s11 + $0x68] sm:$0xff] %v3486_v46 }
 0x52b   : > { %v3439_v61 = vpop.f32.mrf.mxu2 }
 0x52c   : > { %v3440_v45 = vadd.f32 %v3439_v61, %v5935_v40 }
 0x52d   : > { %v3490_v8 = vpop.f32.mrf.mxu3 }
 0x52e   : > { %v3489_v27 = vadd.f32 %v3488_v17, %v3440_v45 }
 0x530   : > { %3507 = vst [vmem:[%s5940_s11 + $0x70] sm:$0xff] %v3489_v27 }
 0x533   : > { %v3441_v16 = vpop.f32.mrf.mxu2 }
 0x534   : > { %v3442_v33 = vadd.f32 %v3441_v16, %v5935_v40 }
 0x536   : > { %v3491_v6 = vadd.f32 %v3490_v8, %v3442_v33 }
 0x538   : > { %3508 = vst [vmem:[%s5940_s11 + $0x78] sm:$0xff] %v3491_v6 }
 0x539   : > { %4919 = shalt.err (!%p4916_p8)
}
 0x53a   : > { %s4968_s9 = smov 128   ;;  %s4969_s10 = smov 8  }
 0x53b   : > { %4770 = dma.vmem_to_hbm [thread:$0]  (%p5038_p5), %s3523_s16, 2048, %s3525_s17, %s3510_s23, %s4968_s9, %s4968_s9, %s4969_s10  }
 0x53c PF: > { %p4787_p9 = scmp.ge.s32.totalorder %s4962_s21, 2  ;;  %s3539_s11 = sand.u32 1, %s4950_s18  }
 0x53d   : > { %s3540_s12 = scalar_lea.sflag [#allocation4], %s3539_s11 }
 0x53e   : > { %p4780_p10 = pnand %p4787_p9, %p5042_p6 }
 0x540   : > { %p4781_p11 = pneg %p4780_p10 }
 0x542   : > { %4945 = dma.done.wait (%p4781_p11), %s3540_s12, 2048  }
 0x543   : > { %4947 = vsyncadd (%p4781_p11), %s3540_s12, 4294965248  ;;  %p17_p12 = scmp.ge.s32.totalorder %s5025_s24, 4   ;;  %s6068_s18 = smov %s4954_s19 }
 0x544   : > { %s6069_s19 = smov %s4958_s20  ;;  %s6070_s20 = smov %s5036_s27 }
 0x545   : > { %s6071_s21 = smov %s5025_s24  ;;  %19 = sbr.rel (!%p17_p12) target bundleno = 5 (0x5), region = 84 }
 0x54a   :  { %3546 = vsyncpa [#allocation3], 1 }
 0x54b   :  { %3548 = vsyncpa [#allocation3 + $0x1], 1 }
 0x54c   :  { %3549 = vsyncpa [#allocation6], 1 }
 0x54d   :  { %3550 = vsyncpa [#allocation4], 1 }
 0x54e   :  { %3552 = vsyncpa [#allocation4 + $0x1], 1 }

</bundles_post_ra>
